<compile_context>
chip_gen: v7x
topology: tpu7x:2x2x1
jax: 0.10.0
libtpu: 0.0.40
codegen_flags: <defaults>
</compile_context>

<pallas_src>
import functools

import jax
import jax.numpy as jnp
from jax import lax
from jax.experimental import pallas as pl
from jax.experimental.pallas import tpu as pltpu


def _line_pooling_kernel(lines_ref, tspan_ref, feat_ref, ey_ref, ex_ref,
                         out_ref, *, h, w, s, f):
    # lines_ref: (TN, 4)   per-line [ux, uy, vx, vy], f32
    # tspan_ref: (1, S)    linspace(0, 1, S), f32 (matches the torch buffer)
    # feat_ref:  (HW, C)   feature map, spatial-major, bf16 (grid-invariant)
    # ey_ref:    (H, HW)   E_y[hh, j] = (j // W == hh), bf16 (grid-invariant)
    # ex_ref:    (W, HW)   E_x[ww, j] = (j %  W == ww), bf16 (grid-invariant)
    # out_ref:   (TN*F, C) lane-dense pooled output, f32
    tn = lines_ref.shape[0]
    hw, c = feat_ref.shape
    k = s // f                      # MaxPool1d kernel == stride
    p = tn * s                      # sampled points in this block

    lines = lines_ref[...]                                   # (TN, 4)
    ux, uy = lines[:, 0:1], lines[:, 1:2]                    # (TN, 1)
    vx, vy = lines[:, 2:3], lines[:, 3:4]

    t = tspan_ref[...]                                       # (1, S)

    # sampled_points = U * t + V * (1 - t) - 0.5   -> 2D (TN, S)
    px = ux * t + vx * (1.0 - t) - 0.5
    py = uy * t + vy * (1.0 - t) - 0.5

    px0 = jnp.clip(jnp.floor(px), 0.0, float(w - 1))
    py0 = jnp.clip(jnp.floor(py), 0.0, float(h - 1))
    px1 = jnp.clip(px0 + 1.0, 0.0, float(w - 1))
    py1 = jnp.clip(py0 + 1.0, 0.0, float(h - 1))

    # Separable bilinear weights (exactly equivalent to the 4-corner form of
    # the torch module, including the clipped / extrapolated edge cases).
    wx0, wx1 = px1 - px, px - px0
    wy0, wy1 = py1 - py, py - py0
    ix0, ix1 = px0.astype(jnp.int32), px1.astype(jnp.int32)
    iy0, iy1 = py0.astype(jnp.int32), py1.astype(jnp.int32)

    h_iota = lax.broadcasted_iota(jnp.int32, (1, 1, h), 2)
    w_iota = lax.broadcasted_iota(jnp.int32, (1, 1, w), 2)

    # Row / column factors of the sparse weight matrix: small-lane compares.
    yfac = (jnp.where(iy0[:, :, None] == h_iota, wy0[:, :, None], 0.0)
            + jnp.where(iy1[:, :, None] == h_iota, wy1[:, :, None], 0.0))
    xfac = (jnp.where(ix0[:, :, None] == w_iota, wx0[:, :, None], 0.0)
            + jnp.where(ix1[:, :, None] == w_iota, wx1[:, :, None], 0.0))

    # (TN, S, H) -> (P, H): leading-dim collapse, a layout no-op for S % 8 == 0.
    yfac2 = yfac.reshape(p, h).astype(jnp.bfloat16)
    xfac2 = xfac.reshape(p, w).astype(jnp.bfloat16)

    # Expand the factors onto the flattened-spatial (HW) lane axis with two
    # tiny MXU matmuls against constant 0/1 matrices (single bf16 pass each).
    y_e = jnp.dot(yfac2, ey_ref[...], preferred_element_type=jnp.float32)
    x_e = jnp.dot(xfac2, ex_ref[...], preferred_element_type=jnp.float32)

    # 4-sparse bilinear weight rows; one multiply at (P, HW), single bf16 cast.
    wmat = (y_e * x_e).astype(jnp.bfloat16)                  # (P, HW)

    # Interpolate all points for all channels: one bf16 MXU pass, f32 accum.
    interp = jnp.dot(wmat, feat_ref[...],
                     preferred_element_type=jnp.float32)     # (P, C)

    # MaxPool1d(kernel=K, stride=K) over contiguous groups of K points.
    # (K == 8 here makes the reshape a layout no-op; the sublane-axis max is
    # cheap XLU work and stays off the saturated VPU slot.)
    pooled = jnp.max(interp.reshape(tn * f, k, c), axis=1)   # (TN*F, C)
    out_ref[...] = pooled


def _round_up(x, m):
    return ((x + m - 1) // m) * m


def _vmem_capacity_bytes():
    try:
        return int(pltpu.get_tpu_info().vmem_capacity_bytes)
    except Exception:
        return 64 << 20            # v7x per-TensorCore floor


def _choose_tiling(n, s, hw):
    """Pick (block_lines, n_padded, vmem_limit) from the chip's VMEM size."""
    cap = _vmem_capacity_bytes()
    small_vmem = cap <= (64 << 20)                     # v7x-class TensorCore
    wmat_budget = (5 << 20) if small_vmem else (14 << 20)
    target_points = 512 if small_vmem else 1024
    # ~10 bytes per (point, pixel): Y_e + X_e in f32 plus wmat in bf16.
    per_line_bytes = s * hw * 10
    blk = min(max(1, wmat_budget // per_line_bytes),
              max(1, target_points // s),
              _round_up(n, 8))
    blk = max(8, (blk // 8) * 8)                       # multiple of 8 sublanes
    # Keep >= 2 grid steps so ("parallel",) can shard across both v7x cores
    # (one extra ~0.35us step elsewhere is noise).
    if _round_up(n, blk) // blk < 2 and blk > 8:
        blk = max(8, ((blk // 2) // 8) * 8)
    n_pad = max(_round_up(n, blk), 2 * blk)
    vmem_limit = int(min(max(cap - (16 << 20), 32 << 20), 64 << 20))
    return blk, n_pad, vmem_limit


def line_pooling(features_per_image, lines_per_im, n_sampling_points,
                 n_final_points, *, block_lines=None):
    c, h, w = features_per_image.shape
    n = lines_per_im.shape[0]
    s, f = n_sampling_points, n_final_points
    assert s >= 2, "need at least 2 sampling points"
    assert s % f == 0
    assert s % 8 == 0, "kernel assumes n_sampling_points is a multiple of 8"

    hw = h * w
    blk, n_pad, vmem_limit = _choose_tiling(n, s, hw)
    if block_lines is not None:
        blk = block_lines
        n_pad = max(_round_up(n, blk), 2 * blk)

    # ---- wrapper-side layout glue (plain XLA) --------------------------------
    # Feature map (C, H, W) -> (HW, C) in bf16 (single MXU pass, half the VMEM).
    feat_flat = jnp.transpose(features_per_image.reshape(c, hw),
                              (1, 0)).astype(jnp.bfloat16)
    # Constant 0/1 expansion matrices for the Y/X outer product.
    ey = jnp.repeat(jnp.eye(h, dtype=jnp.float32), w, axis=1).astype(jnp.bfloat16)
    ex = jnp.tile(jnp.eye(w, dtype=jnp.float32), (1, h)).astype(jnp.bfloat16)
    # tspan exactly as the torch buffer (hits 0 and 1 exactly).
    tspan = jnp.linspace(0.0, 1.0, s, dtype=jnp.float32).reshape(1, s)
    # Pad lines to a multiple of block_lines with dummy zero lines.
    lines_f = lines_per_im.astype(jnp.float32)
    if n_pad != n:
        lines_f = jnp.concatenate(
            [lines_f, jnp.zeros((n_pad - n, 4), jnp.float32)], axis=0)

    kernel = functools.partial(_line_pooling_kernel, h=h, w=w, s=s, f=f)
    out2 = pl.pallas_call(
        kernel,
        out_shape=jax.ShapeDtypeStruct((n_pad * f, c), jnp.float32),
        grid_spec=pltpu.PrefetchScalarGridSpec(
            num_scalar_prefetch=0,
            grid=(n_pad // blk,),
            in_specs=[
                pl.BlockSpec((blk, 4), lambda i: (i, 0)),
                pl.BlockSpec((1, s), lambda i: (0, 0)),
                pl.BlockSpec((hw, c), lambda i: (0, 0)),
                pl.BlockSpec((h, hw), lambda i: (0, 0)),
                pl.BlockSpec((w, hw), lambda i: (0, 0)),
            ],
            out_specs=pl.BlockSpec((blk * f, c), lambda i: (i, 0)),
        ),
        compiler_params=pltpu.CompilerParams(
            dimension_semantics=("parallel",),
            vmem_limit_bytes=vmem_limit),
    )(lines_f, tspan, feat_flat, ey, ex)

    # torch flattens (C, F) per line; kernel emits rows ordered (line, F) with
    # channels on lanes -> drop padded lines and do the layout fixup here.
    out = out2.reshape(n_pad, f, c)[:n]
    return jnp.transpose(out, (0, 2, 1)).reshape(n, c * f)


def line_pooling_reference(features_per_image, lines_per_im,
                           n_sampling_points, n_final_points):
    """Pure-JAX (f32) mirror of the torch forward (feature_depth == C == 128)."""
    c, h, w = features_per_image.shape
    n = lines_per_im.shape[0]
    s, f = n_sampling_points, n_final_points
    k = s // f
    tspan = jnp.linspace(0.0, 1.0, s)[None, None, :]
    u, v = lines_per_im[:, :2], lines_per_im[:, 2:]
    sp = u[:, :, None] * tspan + v[:, :, None] * (1.0 - tspan) - 0.5
    sp = jnp.transpose(sp, (0, 2, 1)).reshape(-1, 2)
    px, py = sp[:, 0], sp[:, 1]
    px0 = jnp.clip(jnp.floor(px), 0, w - 1)
    py0 = jnp.clip(jnp.floor(py), 0, h - 1)
    px1 = jnp.clip(px0 + 1, 0, w - 1)
    py1 = jnp.clip(py0 + 1, 0, h - 1)
    px0l, py0l = px0.astype(jnp.int32), py0.astype(jnp.int32)
    px1l, py1l = px1.astype(jnp.int32), py1.astype(jnp.int32)
    xp = (features_per_image[:, py0l, px0l] * (py1 - py) * (px1 - px)
          + features_per_image[:, py1l, px0l] * (py - py0) * (px1 - px)
          + features_per_image[:, py0l, px1l] * (py1 - py) * (px - px0)
          + features_per_image[:, py1l, px1l] * (py - py0) * (px - px0))
    xp = jnp.transpose(xp.reshape(c, n, s), (1, 0, 2))   # (N, C, S)
    xp = jnp.max(xp.reshape(n, c, f, k), axis=3)         # (N, C, F)
    return xp.reshape(n, f * c)


if __name__ == "__main__":
    # feature_depth = 128 is forced by the hardcoded `.reshape(128, -1, S)` in
    # the torch forward.
    C, H, W = 128, 16, 16
    N_SAMPLING, N_FINAL = 32, 4
    N_LINES = 16

    key = jax.random.PRNGKey(0)
    k1, k2 = jax.random.split(key)
    features_per_image = jax.random.normal(k1, (C, H, W), dtype=jnp.float32)
    # lines_per_im rows = [ux, uy, vx, vy] in image coordinates
    lines_per_im = (jax.random.uniform(k2, (N_LINES, 4), dtype=jnp.float32)
                    * jnp.array([W, H, W, H], dtype=jnp.float32))

    out = line_pooling(features_per_image, lines_per_im,
                       N_SAMPLING, N_FINAL)
    out = jax.block_until_ready(out)

    ref = line_pooling_reference(features_per_image, lines_per_im,
                                 N_SAMPLING, N_FINAL)
    assert out.shape == (N_LINES, N_FINAL * C), out.shape
    # Tolerance reflects the single bf16 MXU pass (weights + features rounded
    # to bf16, f32 accumulation) recommended by the perf review.
    if not bool(jnp.allclose(out, ref, atol=5e-2, rtol=2e-2)):
        raise AssertionError(
            f"mismatch, max abs err = {float(jnp.max(jnp.abs(out - ref)))}")
    print("KERNEL_OK")
</pallas_src>

<mosaic_0001>
module attributes {stable_mosaic.version = 11 : i64} {
  func.func @_line_pooling_kernel(%arg0: i32, %arg1: memref<8x4xf32, #tpu.memory_space<vmem>>, %arg2: memref<1x32xf32, #tpu.memory_space<vmem>>, %arg3: memref<256x128xbf16, #tpu.memory_space<vmem>>, %arg4: memref<16x256xbf16, #tpu.memory_space<vmem>>, %arg5: memref<16x256xbf16, #tpu.memory_space<vmem>>, %arg6: memref<32x128xf32, #tpu.memory_space<vmem>>) attributes {dimension_semantics = [#tpu.dimension_semantics<parallel>], iteration_bounds = array<i64: 2>, scalar_prefetch = 0 : i64, scratch_operands = 0 : i64, tpu.core_type = #tpu.core_type<tc>, window_params = [{transform_indices = @transform_0, window_bounds = array<i64: 8, 4>}, {pipeline_mode = #tpu.pipeline_mode<synchronous>, transform_indices = @transform_1, window_bounds = array<i64: 1, 32>}, {pipeline_mode = #tpu.pipeline_mode<synchronous>, transform_indices = @transform_2, window_bounds = array<i64: 256, 128>}, {pipeline_mode = #tpu.pipeline_mode<synchronous>, transform_indices = @transform_3, window_bounds = array<i64: 16, 256>}, {pipeline_mode = #tpu.pipeline_mode<synchronous>, transform_indices = @transform_4, window_bounds = array<i64: 16, 256>}, {transform_indices = @transform_5, window_bounds = array<i64: 32, 128>}]} {
    %c0 = arith.constant 0 : index
    %c0_0 = arith.constant 0 : index
    %0 = vector.load %arg1[%c0, %c0_0] : memref<8x4xf32, #tpu.memory_space<vmem>>, vector<8x4xf32>
    %1 = vector.extract_strided_slice %0 {offsets = [0, 0], sizes = [8, 1], strides = [1, 1]} : vector<8x4xf32> to vector<8x1xf32>
    %2 = vector.extract_strided_slice %0 {offsets = [0, 1], sizes = [8, 1], strides = [1, 1]} : vector<8x4xf32> to vector<8x1xf32>
    %3 = vector.extract_strided_slice %0 {offsets = [0, 2], sizes = [8, 1], strides = [1, 1]} : vector<8x4xf32> to vector<8x1xf32>
    %4 = vector.extract_strided_slice %0 {offsets = [0, 3], sizes = [8, 1], strides = [1, 1]} : vector<8x4xf32> to vector<8x1xf32>
    %c0_1 = arith.constant 0 : index
    %c0_2 = arith.constant 0 : index
    %5 = vector.load %arg2[%c0_1, %c0_2] : memref<1x32xf32, #tpu.memory_space<vmem>>, vector<1x32xf32>
    %6 = vector.broadcast %1 : vector<8x1xf32> to vector<8x32xf32>
    %7 = vector.broadcast %5 : vector<1x32xf32> to vector<8x32xf32>
    %8 = arith.mulf %6, %7 : vector<8x32xf32>
    %cst = arith.constant 1.000000e+00 : f32
    %9 = vector.broadcast %cst : f32 to vector<1x32xf32>
    %10 = arith.subf %9, %5 : vector<1x32xf32>
    %11 = vector.broadcast %3 : vector<8x1xf32> to vector<8x32xf32>
    %12 = vector.broadcast %10 : vector<1x32xf32> to vector<8x32xf32>
    %13 = arith.mulf %11, %12 : vector<8x32xf32>
    %14 = arith.addf %8, %13 : vector<8x32xf32>
    %cst_3 = arith.constant 5.000000e-01 : f32
    %15 = vector.broadcast %cst_3 : f32 to vector<8x32xf32>
    %16 = arith.subf %14, %15 : vector<8x32xf32>
    %17 = vector.broadcast %2 : vector<8x1xf32> to vector<8x32xf32>
    %18 = vector.broadcast %5 : vector<1x32xf32> to vector<8x32xf32>
    %19 = arith.mulf %17, %18 : vector<8x32xf32>
    %cst_4 = arith.constant 1.000000e+00 : f32
    %20 = vector.broadcast %cst_4 : f32 to vector<1x32xf32>
    %21 = arith.subf %20, %5 : vector<1x32xf32>
    %22 = vector.broadcast %4 : vector<8x1xf32> to vector<8x32xf32>
    %23 = vector.broadcast %21 : vector<1x32xf32> to vector<8x32xf32>
    %24 = arith.mulf %22, %23 : vector<8x32xf32>
    %25 = arith.addf %19, %24 : vector<8x32xf32>
    %cst_5 = arith.constant 5.000000e-01 : f32
    %26 = vector.broadcast %cst_5 : f32 to vector<8x32xf32>
    %27 = arith.subf %25, %26 : vector<8x32xf32>
    %28 = math.floor %16 : vector<8x32xf32>
    %cst_6 = arith.constant 0.000000e+00 : f32
    %cst_7 = arith.constant 1.500000e+01 : f32
    %29 = vector.broadcast %cst_6 : f32 to vector<8x32xf32>
    %30 = arith.maximumf %29, %28 : vector<8x32xf32>
    %31 = vector.broadcast %cst_7 : f32 to vector<8x32xf32>
    %32 = arith.minimumf %31, %30 : vector<8x32xf32>
    %33 = math.floor %27 : vector<8x32xf32>
    %cst_8 = arith.constant 0.000000e+00 : f32
    %cst_9 = arith.constant 1.500000e+01 : f32
    %34 = vector.broadcast %cst_8 : f32 to vector<8x32xf32>
    %35 = arith.maximumf %34, %33 : vector<8x32xf32>
    %36 = vector.broadcast %cst_9 : f32 to vector<8x32xf32>
    %37 = arith.minimumf %36, %35 : vector<8x32xf32>
    %cst_10 = arith.constant 1.000000e+00 : f32
    %38 = vector.broadcast %cst_10 : f32 to vector<8x32xf32>
    %39 = arith.addf %32, %38 : vector<8x32xf32>
    %cst_11 = arith.constant 0.000000e+00 : f32
    %cst_12 = arith.constant 1.500000e+01 : f32
    %40 = vector.broadcast %cst_11 : f32 to vector<8x32xf32>
    %41 = arith.maximumf %40, %39 : vector<8x32xf32>
    %42 = vector.broadcast %cst_12 : f32 to vector<8x32xf32>
    %43 = arith.minimumf %42, %41 : vector<8x32xf32>
    %cst_13 = arith.constant 1.000000e+00 : f32
    %44 = vector.broadcast %cst_13 : f32 to vector<8x32xf32>
    %45 = arith.addf %37, %44 : vector<8x32xf32>
    %cst_14 = arith.constant 0.000000e+00 : f32
    %cst_15 = arith.constant 1.500000e+01 : f32
    %46 = vector.broadcast %cst_14 : f32 to vector<8x32xf32>
    %47 = arith.maximumf %46, %45 : vector<8x32xf32>
    %48 = vector.broadcast %cst_15 : f32 to vector<8x32xf32>
    %49 = arith.minimumf %48, %47 : vector<8x32xf32>
    %50 = arith.subf %43, %16 : vector<8x32xf32>
    %51 = arith.subf %16, %32 : vector<8x32xf32>
    %52 = arith.subf %49, %27 : vector<8x32xf32>
    %53 = arith.subf %27, %37 : vector<8x32xf32>
    %54 = arith.fptosi %32 : vector<8x32xf32> to vector<8x32xi32>
    %55 = arith.fptosi %43 : vector<8x32xf32> to vector<8x32xi32>
    %56 = arith.fptosi %37 : vector<8x32xf32> to vector<8x32xi32>
    %57 = arith.fptosi %49 : vector<8x32xf32> to vector<8x32xi32>
    %58 = tpu.iota {dimensions = array<i32: 2>} : vector<1x1x16xi32>
    %59 = tpu.iota {dimensions = array<i32: 2>} : vector<1x1x16xi32>
    %60 = vector.shape_cast %56 : vector<8x32xi32> to vector<8x32x1xi32>
    %61 = vector.broadcast %60 : vector<8x32x1xi32> to vector<8x32x16xi32>
    %62 = vector.broadcast %58 : vector<1x1x16xi32> to vector<8x32x16xi32>
    %63 = arith.cmpi eq, %61, %62 : vector<8x32x16xi32>
    %64 = vector.shape_cast %52 : vector<8x32xf32> to vector<8x32x1xf32>
    %cst_16 = arith.constant 0.000000e+00 : f32
    %65 = vector.shape_cast %64 : vector<8x32x1xf32> to vector<8x32x1xf32>
    %66 = vector.broadcast %65 : vector<8x32x1xf32> to vector<8x32x16xf32>
    %67 = vector.broadcast %cst_16 : f32 to vector<8x32x16xf32>
    %68 = arith.select %63, %66, %67 : vector<8x32x16xi1>, vector<8x32x16xf32>
    %69 = vector.shape_cast %57 : vector<8x32xi32> to vector<8x32x1xi32>
    %70 = vector.broadcast %69 : vector<8x32x1xi32> to vector<8x32x16xi32>
    %71 = vector.broadcast %58 : vector<1x1x16xi32> to vector<8x32x16xi32>
    %72 = arith.cmpi eq, %70, %71 : vector<8x32x16xi32>
    %73 = vector.shape_cast %53 : vector<8x32xf32> to vector<8x32x1xf32>
    %cst_17 = arith.constant 0.000000e+00 : f32
    %74 = vector.shape_cast %73 : vector<8x32x1xf32> to vector<8x32x1xf32>
    %75 = vector.broadcast %74 : vector<8x32x1xf32> to vector<8x32x16xf32>
    %76 = vector.broadcast %cst_17 : f32 to vector<8x32x16xf32>
    %77 = arith.select %72, %75, %76 : vector<8x32x16xi1>, vector<8x32x16xf32>
    %78 = arith.addf %68, %77 : vector<8x32x16xf32>
    %79 = vector.shape_cast %54 : vector<8x32xi32> to vector<8x32x1xi32>
    %80 = vector.broadcast %79 : vector<8x32x1xi32> to vector<8x32x16xi32>
    %81 = vector.broadcast %59 : vector<1x1x16xi32> to vector<8x32x16xi32>
    %82 = arith.cmpi eq, %80, %81 : vector<8x32x16xi32>
    %83 = vector.shape_cast %50 : vector<8x32xf32> to vector<8x32x1xf32>
    %cst_18 = arith.constant 0.000000e+00 : f32
    %84 = vector.shape_cast %83 : vector<8x32x1xf32> to vector<8x32x1xf32>
    %85 = vector.broadcast %84 : vector<8x32x1xf32> to vector<8x32x16xf32>
    %86 = vector.broadcast %cst_18 : f32 to vector<8x32x16xf32>
    %87 = arith.select %82, %85, %86 : vector<8x32x16xi1>, vector<8x32x16xf32>
    %88 = vector.shape_cast %55 : vector<8x32xi32> to vector<8x32x1xi32>
    %89 = vector.broadcast %88 : vector<8x32x1xi32> to vector<8x32x16xi32>
    %90 = vector.broadcast %59 : vector<1x1x16xi32> to vector<8x32x16xi32>
    %91 = arith.cmpi eq, %89, %90 : vector<8x32x16xi32>
    %92 = vector.shape_cast %51 : vector<8x32xf32> to vector<8x32x1xf32>
    %cst_19 = arith.constant 0.000000e+00 : f32
    %93 = vector.shape_cast %92 : vector<8x32x1xf32> to vector<8x32x1xf32>
    %94 = vector.broadcast %93 : vector<8x32x1xf32> to vector<8x32x16xf32>
    %95 = vector.broadcast %cst_19 : f32 to vector<8x32x16xf32>
    %96 = arith.select %91, %94, %95 : vector<8x32x16xi1>, vector<8x32x16xf32>
    %97 = arith.addf %87, %96 : vector<8x32x16xf32>
    %98 = vector.shape_cast %78 : vector<8x32x16xf32> to vector<256x16xf32>
    %99 = arith.truncf %98 : vector<256x16xf32> to vector<256x16xbf16>
    %100 = vector.shape_cast %97 : vector<8x32x16xf32> to vector<256x16xf32>
    %101 = arith.truncf %100 : vector<256x16xf32> to vector<256x16xbf16>
    %c0_20 = arith.constant 0 : index
    %c0_21 = arith.constant 0 : index
    %102 = vector.load %arg4[%c0_20, %c0_21] : memref<16x256xbf16, #tpu.memory_space<vmem>>, vector<16x256xbf16>
    %cst_22 = arith.constant dense<0.000000e+00> : vector<256x256xf32>
    %103 = tpu.matmul %99, %102, %cst_22 {dimension_numbers = #tpu.dot_dimension_numbers<[1], [0], [0], [1], [0, 0, 1, 1], [], []>} : vector<256x16xbf16>, vector<16x256xbf16>, vector<256x256xf32> -> vector<256x256xf32>
    %c0_23 = arith.constant 0 : index
    %c0_24 = arith.constant 0 : index
    %104 = vector.load %arg5[%c0_23, %c0_24] : memref<16x256xbf16, #tpu.memory_space<vmem>>, vector<16x256xbf16>
    %cst_25 = arith.constant dense<0.000000e+00> : vector<256x256xf32>
    %105 = tpu.matmul %101, %104, %cst_25 {dimension_numbers = #tpu.dot_dimension_numbers<[1], [0], [0], [1], [0, 0, 1, 1], [], []>} : vector<256x16xbf16>, vector<16x256xbf16>, vector<256x256xf32> -> vector<256x256xf32>
    %106 = arith.mulf %103, %105 : vector<256x256xf32>
    %107 = arith.truncf %106 : vector<256x256xf32> to vector<256x256xbf16>
    %c0_26 = arith.constant 0 : index
    %c0_27 = arith.constant 0 : index
    %108 = vector.load %arg3[%c0_26, %c0_27] : memref<256x128xbf16, #tpu.memory_space<vmem>>, vector<256x128xbf16>
    %cst_28 = arith.constant dense<0.000000e+00> : vector<256x128xf32>
    %109 = tpu.matmul %107, %108, %cst_28 {dimension_numbers = #tpu.dot_dimension_numbers<[1], [0], [0], [1], [0, 0, 1, 1], [], []>} : vector<256x256xbf16>, vector<256x128xbf16>, vector<256x128xf32> -> vector<256x128xf32>
    %110 = vector.shape_cast %109 : vector<256x128xf32> to vector<32x8x128xf32>
    %cst_29 = arith.constant dense<0xFF800000> : vector<32x128xf32>
    %111 = vector.multi_reduction <maximumf>, %110, %cst_29 [1] : vector<32x8x128xf32> to vector<32x128xf32>
    %c0_30 = arith.constant 0 : index
    %c0_31 = arith.constant 0 : index
    %112 = vector.load %arg6[%c0_30, %c0_31] : memref<32x128xf32, #tpu.memory_space<vmem>>, vector<32x128xf32>
    tpu.vector_store %arg6[%c0_30, %c0_31], %111 {strides = array<i32>} : memref<32x128xf32, #tpu.memory_space<vmem>>, vector<32x128xf32>,
    return
  }
  func.func @transform_0(%arg0: i32) -> (i32, i32) {
    %c0_i32 = arith.constant 0 : i32
    %c0_i32_0 = arith.constant 0 : i32
    return %arg0, %c0_i32 : i32, i32
  }
  func.func @transform_1(%arg0: i32) -> (i32, i32) {
    %c0_i32 = arith.constant 0 : i32
    %c0_i32_0 = arith.constant 0 : i32
    %c0_i32_1 = arith.constant 0 : i32
    return %c0_i32, %c0_i32_0 : i32, i32
  }
  func.func @transform_2(%arg0: i32) -> (i32, i32) {
    %c0_i32 = arith.constant 0 : i32
    %c0_i32_0 = arith.constant 0 : i32
    %c0_i32_1 = arith.constant 0 : i32
    return %c0_i32, %c0_i32_0 : i32, i32
  }
  func.func @transform_3(%arg0: i32) -> (i32, i32) {
    %c0_i32 = arith.constant 0 : i32
    %c0_i32_0 = arith.constant 0 : i32
    %c0_i32_1 = arith.constant 0 : i32
    return %c0_i32, %c0_i32_0 : i32, i32
  }
  func.func @transform_4(%arg0: i32) -> (i32, i32) {
    %c0_i32 = arith.constant 0 : i32
    %c0_i32_0 = arith.constant 0 : i32
    %c0_i32_1 = arith.constant 0 : i32
    return %c0_i32, %c0_i32_0 : i32, i32
  }
  func.func @transform_5(%arg0: i32) -> (i32, i32) {
    %c0_i32 = arith.constant 0 : i32
    %c0_i32_0 = arith.constant 0 : i32
    return %arg0, %c0_i32 : i32, i32
  }
}

</mosaic_0001>

<bundles_post_ra>
// kernel: tpu_custom_call.1
= control target key start
LH: loop header
LB: loop body
LE: loop exit
PB: predicated region body
PF: predicated region fallthrough
CT: control target
= control target key end

     0   :  { %10 = vsyncpa [#allocation3], 0  ;;  %s4679_s0 = inlined_call_operand.vmem [shape: f32[16,4], index: 0, kind: input, shape index: {}]   ;;  %s4680_s1 = inlined_call_operand.vmem [shape: f32[1,32], index: 1, kind: input, shape index: {}]   ;;  %s4681_s2 = inlined_call_operand.hbm [shape: bf16[256,128], index: 2, kind: input, shape index: {}]   ;;  %s4682_s3 = inlined_call_operand.vmem [shape: bf16[16,256], index: 3, kind: input, shape index: {}]   ;;  %s4683_s4 = inlined_call_operand.vmem [shape: bf16[16,256], index: 4, kind: input, shape index: {}]   ;;  %s4684_s5 = inlined_call_operand.hbm [shape: f32[64,128], index: 5, kind: output, shape index: {}]  }
   0x1   :  { %11 = vsyncpa [#allocation4], 0 }
   0x2   :  { %13 = vsyncpa [#allocation4 + $0x1], 0  ;;  %s3524_s18 = smov 0   ;;  %s3526_s19 = smov 0  }
   0x3   :  { %s3528_s20 = smov 0   ;;  %s3530_s21 = smov 0  }
   0x4 LB: > { %s3545_s22 = sadd.s32 4294967295, %s3482_s21   ;;  %s3114_s23 = sadd.s32 4294967294, %s3482_s21   ;;  %s3482_s21 = sphi %s3530_s21, %s4814_s21   ;;  %s3478_s20 = sphi %s3528_s20, %s4813_s20   ;;  %s3474_s19 = sphi %s3526_s19, %s4812_s19   ;;  %s3470_s18 = sphi %s3524_s18, %s4811_s18  }
   0x5   : > { %s3549_s24 = sadd.s32 1, %s3482_s21   ;;  %s136_s25 = sadd.s32 1, %s3478_s20 }
   0x6   : > { %s133_s26 = ssub.s32 %s3482_s21, %s3549_s24  ;;  %p146_p0 = scmp.ne.s32.totalorder %s3478_s20, %s3474_s19 }
   0x7   : > { %p134_p1 = scmp.eq.s32.totalorder %s133_s26, 0  ;;  %p147_p2 = scmp.eq.s32.totalorder %s3545_s22, 1 }
   0x8   : > { %p152_p3 = scmp.ne.s32.totalorder %s3474_s19, %s3470_s18  ;;  %p153_p4 = scmp.eq.s32.totalorder %s3114_s23, 1 }
   0x9   : > { %s3560_s27 = scalar_select %p134_p1, %s3478_s20, %s136_s25  }
   0xa   : > { %p3562_p5 = por %p147_p2, %p146_p0  ;;  %p3566_p6 = por %p153_p4, %p152_p3 }
   0xb   : > { %p3115_p7 = scmp.ge.s32.totalorder %s3482_s21, 1  ;;  %p160_p8 = scmp.lt.s32.totalorder %s3482_s21, 3 }
   0xc   : > { %s4718_s28 = scalar_select %p3562_p5, 1, 0 }
   0xd   : > { %s4719_s29 = scalar_select %p3566_p6, 1, 0 }
   0xe   : > { %p4685_p9 = scmp.eq.s32.totalorder %s3545_s22, 0  ;;  %p3573_p10 = pnand %p3115_p7, %p160_p8 }
   0xf   : > { %s3484_s6 = smov [#allocation2]   ;;  %s3388_s11 = scalar_lea.hbm %s4681_s2, 2048 }
  0x10   : > { %s4720_s30 = scalar_select %p3573_p10, 1, 0 }
  0x11   : > { %s175_s7 = sshll.u32 %s3484_s6, 4  ;;  %p3310_p11 = pneg %p3573_p10  ;;  %s176_s7 = int_to_ptr.vmem [resolvable:$true] %s175_s7 }
  0x12   : > { %p3389_p13 = scmp.ne.s32.totalorder %s4681_s2, %s3388_s11  ;;  %p3395_p3 = scmp.lt.u32.totalorder %s3388_s11, %s4681_s2 }
  0x13   : > { %p3581_p12 = pnand %p4685_p9, %p3310_p11 }
  0x15   : > { %p3390_p0 = pneg %p3581_p12 }
  0x17   : > { %p3391_p1 = pnand %p3390_p0, %p3389_p13 }
  0x19   : > { %p3392_p2 = pneg %p3391_p1 }
  0x1b   : > { %p3397_p4 = pnand %p3395_p3, %p3392_p2 }
  0x1d   : > { %3400 = shalt.err (!%p3397_p4)
}
  0x1e   : > { %s3401_s16 = scalar_lea.vmem %s176_s7, 2048  ;;  %p3409_p9 = scmp.lt.s32.totalorder %s176_s7, %s176_s7 }
  0x1f   : > { %p3402_p7 = scmp.ne.s32.totalorder %s176_s7, %s3401_s16  ;;  %p3410_p6 = scmp.lt.s32.totalorder %s3401_s16, %s3401_s16 }
  0x21   : > { %p3404_p8 = pnand %p3402_p7, %p3390_p0  ;;  %p3411_p5 = por %p3410_p6, %p3409_p9 }
  0x23   : > { %p3405_p11 = pneg %p3404_p8 }
  0x25   : > { %p3412_p10 = pnand %p3411_p5, %p3405_p11 }
  0x27   : > { %3415 = shalt.err (!%p3412_p10)
}
  0x28   : > { %s3485_s17 = smov 64   ;;  %s3486_s23 = smov 4  }
  0x29   : > { %3313 = dma.hbm_to_vmem [thread:$0]  (!%p3581_p12), %s4681_s2, 2048, %s176_s7, [#allocation3], %s3485_s17, %s3485_s17, %s3486_s23  }
  0x2a   : > { %p4722_p13 = scmp.ne.s32.totalorder %s4720_s30, 0 }
  0x2c   : > { %204 = sbr.rel (%p4722_p13) target bundleno = 1305 (0x519), region = 40 }
  0x33   : > { %p4723_p1 = scmp.eq.s32.totalorder %s3545_s22, 0 }
  0x35   : > { %3461 = dma.done.wait (%p4723_p1), [#allocation3], 2048   ;;  %p4724_p0 = pmov %p4723_p1 }
  0x36   : > { %p231_p5 = scmp.lt.s32.totalorder %s3545_s22, 1  ;;  %v3487_v0 = vmov 1   ;;  %v4688_v1 = vmov 0   ;;  %v3489_v3 = vmov 3   ;;  %v3490_v4 = vmov 2   ;;  %s228_s26 = sand.u32 1, %s3474_s19  }
  0x37   : > { %3463 = vsyncadd (%p4724_p0), [#allocation3], 4294965248  ;;  %3362 = vset.pattern.permute.xlu0 %v3487_v0  ;;  %3364 = vset.pattern.permute.xlu1 %v4688_v1  ;;  %v4690_v5 = vlaneseq  ;;  %v238_v7 = vld [vmem:[%s4680_s1] sm:$0x1]  ;;  %vm1879_vm4 = vcmask 130048   ;;  %s3181_s7 = sshll.u32 %s3545_s22, 9 }
  0x38   : > { %s232_s6 = scalar_select %p231_p5, %s3545_s22, 1  ;;  %2040 = vmatprep.mubr.bf16.mxu1 %v4688_v1  ;;  %1960 = vmatprep.mubr.bf16.mxu0 %v4688_v1  ;;  %v251_v9 = vsub.f32 1.0, %v238_v7 }
  0x39   : > { %v3616_v6 = vshrl.u32 %v4690_v5, 7  ;;  %s4630_s11 = scalar_lea.hbm %s4684_s5, %s3181_s7  ;;  %s4638_s22 = scalar_lea.sflag [#allocation4], %s228_s26 }
  0x3a   : > { %s3121_s30 = sshll.u32 %s232_s6, 3  ;;  %s3120_s6 = sshll.u32 %s228_s26, 5 }
  0x3b   : > { %s234_s9 = scalar_lea.vmem %s4679_s0, %s3121_s30  ;;  %v3622_v8 = vsub.s32 0, %v3616_v6  ;;  %v3627_v29 = vsub.s32 4, %v3616_v6  ;;  %v3640_v43 = vsub.s32 5, %v3616_v6  ;;  %v320_v45 = vsub.s32 1, %v3616_v6  ;;  %s4592_s30 = scalar_lea.vmem [#allocation5], %s3120_s6 }
  0x3c   : > { %v237_v2 = vld [vmem:[%s234_s9] sm:$0xff]  ;;  %v3646_v48 = vsub.s32 6, %v3616_v6  ;;  %v3649_v49 = vsub.s32 7, %v3616_v6  ;;  %v339_v61 = vsub.s32 2, %v3616_v6  ;;  %s3040_s8 = sshll.u32 %s4592_s30, 4  ;;  %p4809_p9 = scmp.ne.s32.totalorder %s4718_s28, 0  ;;  %s4632_s8 = int_to_ptr.vmem [resolvable:$true] %s3040_s8 }
  0x3d   : > { %266 = vperm.xlu0 %3362, %v237_v2   ;;  %241 = vperm.xlu1 %3364, %v237_v2   ;;  %v248_v12 = vrot.slane %v238_v7, %v3622_v8  ;;  %v260_v13 = vrot.slane %v251_v9, %v3622_v8  ;;  %s3416_s12 = scalar_lea.vmem %s4632_s8, 512  ;;  %s3491_s13 = smov [#allocation5]  }
  0x3e   : > { %p3417_p6 = scmp.ne.s32.totalorder %s4632_s8, %s3416_s12  ;;  %s3420_s14 = sshll.u32 %s3491_s13, 4  ;;  %s3421_s14 = int_to_ptr.vmem [resolvable:$false] %s3420_s14 }
  0x3f   : > { %s3422_s15 = scalar_lea.vmem %s3421_s14, 1024  ;;  %p3423_p2 = scmp.lt.s32.totalorder %s4632_s8, %s3421_s14 }
  0x40   : > { %p3418_p10 = pnand %p3417_p6, %p4809_p9  ;;  %p3424_p3 = scmp.lt.s32.totalorder %s3422_s15, %s3416_s12 }
  0x41   : > { %3363 = vset.pattern.permute.xlu0 %v3489_v3  ;;  %3365 = vset.pattern.permute.xlu1 %v3490_v4 }
  0x42   : > { %271 = vperm.xlu0 %3363, %v237_v2   ;;  %253 = vperm.xlu1 %3365, %v237_v2   ;;  %p3419_p12 = pneg %p3418_p10  ;;  %p3425_p4 = por %p3424_p3, %p3423_p2 }
  0x44   : > { %p3426_p7 = pnand %p3425_p4, %p3419_p12 }
  0xbc   : > { %v267_v10 = vpop.permute.xlu0 %266  ;;  %v242_v11 = vpop.permute.xlu1 %241 }
  0xbd   : > { %v250_v14 = vmul.f32 %v248_v12, %v242_v11  ;;  %v269_v17 = vmul.f32 %v267_v10, %v248_v12  ;;  %v358_v12 = vsub.s32 3, %v3616_v6 }
  0xc1   : > { %v272_v15 = vpop.permute.xlu0 %271  ;;  %v254_v16 = vpop.permute.xlu1 %253 }
  0xc2   : > { %v274_v18 = vmul.f32 %v272_v15, %v260_v13  ;;  %v262_v19 = vmul.f32 %v260_v13, %v254_v16 }
  0xc4   : > { %v275_v20 = vadd.f32 %v274_v18, %v269_v17  ;;  %v263_v21 = vadd.f32 %v262_v19, %v250_v14 }
  0xc6   : > { %v3123_v22 = vadd.f32 -0.5, %v275_v20  ;;  %v3122_v23 = vadd.f32 -0.5, %v263_v21 }
  0xc8   : > { %v280_v24 = vfloor.f32 %v3123_v22  ;;  %v277_v25 = vfloor.f32 %v3122_v23 }
  0xca   : > { %v281_v26 = vmax.f32 %v280_v24, 0.0  ;;  %v278_v27 = vmax.f32 %v277_v25, 0.0 }
  0xcc   : > { %v282_v28 = vmin.f32 %v281_v26, 15.0  ;;  %v279_v30 = vmin.f32 %v278_v27, 15.0 }
  0xce   : > { %v286_v31 = vadd.f32 1.0, %v282_v28  ;;  %v3629_v32 = vsub.f32 %v3123_v22, %v282_v28  ;;  %v3300_v33 = vtrunc.f32 %v282_v28  ;;  %v283_v34 = vadd.f32 1.0, %v279_v30 }
  0xcf   : > { %v3631_v35 = vsub.f32 %v3122_v23, %v279_v30  ;;  %v3296_v36 = vtrunc.f32 %v279_v30 }
  0xd0   : > { %v287_v37 = vmax.f32 %v286_v31, 0.0  ;;  %v930_v38 = vrot.slane %v3629_v32, %v3627_v29  ;;  %v3635_v39 = vcvt.f32.s32 %v3300_v33  ;;  %v284_v40 = vmax.f32 %v283_v34, 0.0 }
  0xd1   : > { %v3637_v42 = vcvt.f32.s32 %v3296_v36  ;;  %v949_v58 = vrot.slane %v3629_v32, %v3640_v43  ;;  %v968_v3 = vrot.slane %v3629_v32, %v3646_v48  ;;  %v3710_v10 = vrot.slane %v3629_v32, %v320_v45 }
  0xd2   : > { %v288_v41 = vmin.f32 %v287_v37, 15.0  ;;  %936 = vbcast.lane.b32.xlu0 %v930_v38, 264  ;;  %932 = vbcast.lane.b32.xlu1 %v930_v38, 256  ;;  %v285_v44 = vmin.f32 %v284_v40, 15.0  ;;  %v3654_v52 = vrot.slane %v3635_v39, %v320_v45  ;;  %v3717_v13 = vrot.slane %v3631_v35, %v320_v45 }
  0xd3   : > { %v3657_v53 = vrot.slane %v3637_v42, %v320_v45  ;;  %v3720_v14 = vrot.slane %v3635_v39, %v339_v61  ;;  %v3726_v16 = vrot.slane %v3637_v42, %v339_v61  ;;  %v3735_v6 = vrot.slane %v3629_v32, %v339_v61 }
  0xd4   : > { %v3643_v46 = vsub.f32 %v288_v41, %v3123_v22  ;;  %v3302_v47 = vtrunc.f32 %v288_v41  ;;  %v3651_v50 = vsub.f32 %v285_v44, %v3122_v23  ;;  %v3298_v51 = vtrunc.f32 %v285_v44 }
  0xd5   : > { %4725 = vst [vmem:[#allocation8_spill] sm:$0xff] %v3735_v6  ;;  %v3741_v20 = vrot.slane %v3631_v35, %v339_v61  ;;  %v3744_v21 = vrot.slane %v3635_v39, %v358_v12  ;;  %v3750_v23 = vrot.slane %v3637_v42, %v358_v12  ;;  %v3759_v26 = vrot.slane %v3629_v32, %v358_v12 }
  0xd6   : > { %v3659_v54 = vcvt.f32.s32 %v3302_v47  ;;  %944 = vbcast.lane.b32.xlu0 %v930_v38, 280  ;;  %940 = vbcast.lane.b32.xlu1 %v930_v38, 272  ;;  %v3663_v55 = vrot.slane %v3643_v46, %v3627_v29  ;;  %v3667_v56 = vrot.slane %v3643_v46, %v3640_v43  ;;  %v3671_v57 = vrot.slane %v3643_v46, %v3646_v48 }
  0xd7   : > { %v3675_v59 = vcvt.f32.s32 %v3298_v51  ;;  %v3679_v60 = vrot.slane %v3643_v46, %v3649_v49  ;;  %v3707_v9 = vrot.slane %v3643_v46, %v320_v45  ;;  %v3713_v11 = vrot.slane %v3651_v50, %v320_v45  ;;  %4727 = vst [vmem:[#allocation10_spill] sm:$0xff] %v3741_v20  ;;  %4728 = vst [vmem:[#allocation11_spill] sm:$0xff] %v3744_v21 }
  0xd8   : > { %v3684_v62 = vrot.slane %v3659_v54, %v3627_v29  ;;  %v3688_v63 = vrot.slane %v3659_v54, %v3640_v43  ;;  %v3692_v0 = vrot.slane %v3659_v54, %v3646_v48  ;;  %v3696_v2 = vrot.slane %v3659_v54, %v3649_v49  ;;  %4730 = vst [vmem:[#allocation13_spill] sm:$0xff] %v3750_v23 }
  0xd9   : > { %v3701_v4 = vrot.slane %v3659_v54, %v320_v45  ;;  %v3704_v7 = vrot.slane %v3675_v59, %v320_v45  ;;  %v3723_v15 = vrot.slane %v3659_v54, %v339_v61  ;;  %v3729_v17 = vrot.slane %v3675_v59, %v339_v61  ;;  %4733 = vst [vmem:[#allocation16_spill] sm:$0xff] %v3759_v26 }
  0xda   : > { %955 = vbcast.lane.b32.xlu0 %v949_v58, 264  ;;  %951 = vbcast.lane.b32.xlu1 %v949_v58, 256  ;;  %v3732_v18 = vrot.slane %v3643_v46, %v339_v61  ;;  %v3738_v19 = vrot.slane %v3651_v50, %v339_v61  ;;  %v3747_v22 = vrot.slane %v3659_v54, %v358_v12 }
  0xdb   : > { %v3753_v24 = vrot.slane %v3675_v59, %v358_v12  ;;  %v3756_v25 = vrot.slane %v3643_v46, %v358_v12  ;;  %v3762_v27 = vrot.slane %v3651_v50, %v358_v12  ;;  %v3765_v28 = vrot.slane %v3631_v35, %v358_v12 }
  0xdc   : > { %4726 = vst [vmem:[#allocation9_spill] sm:$0xff] %v3738_v19  ;;  %4729 = vst [vmem:[#allocation12_spill] sm:$0xff] %v3747_v22  ;;  %v3769_v30 = vrot.slane %v3637_v42, %v3627_v29  ;;  %v3773_v31 = vrot.slane %v3675_v59, %v3627_v29  ;;  %v3777_v33 = vrot.slane %v3651_v50, %v3627_v29 }
  0xdd   : > { %4731 = vst [vmem:[#allocation14_spill] sm:$0xff] %v3753_v24  ;;  %4732 = vst [vmem:[#allocation15_spill] sm:$0xff] %v3756_v25  ;;  %v3781_v34 = vrot.slane %v3631_v35, %v3627_v29  ;;  %v3785_v36 = vrot.slane %v3637_v42, %v3640_v43  ;;  %v3789_v37 = vrot.slane %v3675_v59, %v3640_v43 }
  0xde   : > { %963 = vbcast.lane.b32.xlu0 %v949_v58, 280  ;;  %959 = vbcast.lane.b32.xlu1 %v949_v58, 272  ;;  %4734 = vst [vmem:[#allocation17_spill] sm:$0xff] %v3762_v27  ;;  %4735 = vst [vmem:[#allocation18_spill] sm:$0xff] %v3765_v28  ;;  %v3793_v38 = vrot.slane %v3651_v50, %v3640_v43  ;;  %v3797_v40 = vrot.slane %v3631_v35, %v3640_v43 }
  0xdf   : > { %4736 = vst [vmem:[#allocation19_spill] sm:$0xff] %v3769_v30  ;;  %4737 = vst [vmem:[#allocation20_spill] sm:$0xff] %v3773_v31  ;;  %v3801_v41 = vrot.slane %v3637_v42, %v3646_v48  ;;  %v3805_v44 = vrot.slane %v3675_v59, %v3646_v48  ;;  %v3809_v45 = vrot.slane %v3651_v50, %v3646_v48 }
  0xe0   : > { %4738 = vst [vmem:[#allocation21_spill] sm:$0xff] %v3777_v33  ;;  %4739 = vst [vmem:[#allocation22_spill] sm:$0xff] %v3781_v34  ;;  %v3813_v47 = vrot.slane %v3631_v35, %v3646_v48  ;;  %v3817_v51 = vrot.slane %v3637_v42, %v3649_v49  ;;  %v3821_v58 = vrot.slane %v3675_v59, %v3649_v49 }
  0xe1   : > { %4740 = vst [vmem:[#allocation23_spill] sm:$0xff] %v3785_v36  ;;  %4741 = vst [vmem:[#allocation24_spill] sm:$0xff] %v3789_v37  ;;  %v3825_v61 = vrot.slane %v3651_v50, %v3649_v49  ;;  %v3829_v12 = vrot.slane %v3631_v35, %v3649_v49  ;;  %v987_v1 = vrot.slane %v3629_v32, %v3649_v49 }
  0xe2   : > { %4742 = vst [vmem:[#allocation25_spill] sm:$0xff] %v3793_v38  ;;  %4743 = vst [vmem:[#allocation26_spill] sm:$0xff] %v3797_v40  ;;  %974 = vbcast.lane.b32.xlu0 %v968_v3, 264  ;;  %970 = vbcast.lane.b32.xlu1 %v968_v3, 256  ;;  %v3835_v5 = vrot.slane %v3629_v32, %v3622_v8  ;;  %v3849_v32 = vrot.slane %v3635_v39, %v3622_v8 }
  0xe3   : > { %4744 = vst [vmem:[#allocation27_spill] sm:$0xff] %v3801_v41  ;;  %4745 = vst [vmem:[#allocation28_spill] sm:$0xff] %v3805_v44 }
  0xe4   : > { %4746 = vst [vmem:[#allocation29_spill] sm:$0xff] %v3809_v45  ;;  %4747 = vst [vmem:[#allocation30_spill] sm:$0xff] %v3813_v47  ;;  %v1438_v45 = vrot.slane %v3675_v59, %v3622_v8 }
  0xe5   : > { %4748 = vst [vmem:[#allocation31_spill] sm:$0xff] %v3817_v51  ;;  %4749 = vst [vmem:[#allocation32_spill] sm:$0xff] %v3821_v58  ;;  %v670_v51 = vrot.slane %v3659_v54, %v3622_v8 }
  0xe6   : > { %4750 = vst [vmem:[#allocation33_spill] sm:$0xff] %v3825_v61  ;;  %4751 = vst [vmem:[#allocation34_spill] sm:$0xff] %v3829_v12  ;;  %982 = vbcast.lane.b32.xlu0 %v968_v3, 280  ;;  %978 = vbcast.lane.b32.xlu1 %v968_v3, 272  ;;  %v378_v12 = vrot.slane %v3635_v39, %v3627_v29  ;;  %v397_v3 = vrot.slane %v3635_v39, %v3640_v43 }
  0xe7   : > { %v435_v29 = vrot.slane %v3635_v39, %v3649_v49  ;;  %v3855_v43 = vrot.slane %v3637_v42, %v3622_v8  ;;  %v3366_v42 = vld [vmem:[%s4682_s3 + $0x4] ss:$8 sps:$4 sm:$0xff]   ;;  %v3889_v49 = vrot.slane %v3651_v50, %v3622_v8 }
  0xe8   : > { %3294 = vmatprep.subr.bf16.mxu1 %v3366_v42  ;;  %1928 = vmatprep.subr.bf16.mxu0 %v3366_v42 }
  0xea   : > { %993 = vbcast.lane.b32.xlu0 %v987_v1, 264  ;;  %989 = vbcast.lane.b32.xlu1 %v987_v1, 256 }
  0xee   : > { %1001 = vbcast.lane.b32.xlu0 %v987_v1, 280  ;;  %997 = vbcast.lane.b32.xlu1 %v987_v1, 272  ;;  %v416_v1 = vrot.slane %v3635_v39, %v3646_v48  ;;  %v3877_v39 = vrot.slane %v3643_v46, %v3622_v8  ;;  %v3368_v48 = vld [vmem:[%s4682_s3] ss:$8 sps:$4 sm:$0xff]  }
  0xef   : > { %3295 = vmatpush1.bf16.msra.mxu1 %v3368_v48  ;;  %1929 = vmatpush1.bf16.msra.mxu0 %v3368_v48 }
  0xf2   : > { %860 = vbcast.lane.b32.xlu0 %v3835_v5, 264  ;;  %856 = vbcast.lane.b32.xlu1 %v3835_v5, 256 }
  0xf6   : > { %384 = vbcast.lane.b32.xlu0 %v378_v12, 264  ;;  %380 = vbcast.lane.b32.xlu1 %v378_v12, 256 }
  0xfa   : > { %392 = vbcast.lane.b32.xlu0 %v378_v12, 280  ;;  %388 = vbcast.lane.b32.xlu1 %v378_v12, 272 }
  0xfe   : > { %403 = vbcast.lane.b32.xlu0 %v397_v3, 264  ;;  %399 = vbcast.lane.b32.xlu1 %v397_v3, 256 }
 0x102   : > { %411 = vbcast.lane.b32.xlu0 %v397_v3, 280  ;;  %407 = vbcast.lane.b32.xlu1 %v397_v3, 272 }
 0x106   : > { %422 = vbcast.lane.b32.xlu0 %v416_v1, 264  ;;  %418 = vbcast.lane.b32.xlu1 %v416_v1, 256 }
 0x10a   : > { %430 = vbcast.lane.b32.xlu0 %v416_v1, 280  ;;  %426 = vbcast.lane.b32.xlu1 %v416_v1, 272 }
 0x10e   : > { %441 = vbcast.lane.b32.xlu0 %v435_v29, 264  ;;  %437 = vbcast.lane.b32.xlu1 %v435_v29, 256 }
 0x112   : > { %449 = vbcast.lane.b32.xlu0 %v435_v29, 280  ;;  %445 = vbcast.lane.b32.xlu1 %v435_v29, 272 }
 0x116   : > { %308 = vbcast.lane.b32.xlu0 %v3849_v32, 264  ;;  %304 = vbcast.lane.b32.xlu1 %v3849_v32, 256 }
 0x11a   : > { %1076 = vbcast.lane.b32.xlu0 %v3855_v43, 264  ;;  %1072 = vbcast.lane.b32.xlu1 %v3855_v43, 256 }
 0x11e   : > { %568 = vbcast.lane.b32.xlu0 %v3663_v55, 264  ;;  %564 = vbcast.lane.b32.xlu1 %v3663_v55, 256 }
 0x122   : > { %576 = vbcast.lane.b32.xlu0 %v3663_v55, 280  ;;  %572 = vbcast.lane.b32.xlu1 %v3663_v55, 272 }
 0x126   : > { %587 = vbcast.lane.b32.xlu0 %v3667_v56, 264  ;;  %583 = vbcast.lane.b32.xlu1 %v3667_v56, 256 }
 0x12a   : > { %595 = vbcast.lane.b32.xlu0 %v3667_v56, 280  ;;  %591 = vbcast.lane.b32.xlu1 %v3667_v56, 272 }
 0x12e   : > { %606 = vbcast.lane.b32.xlu0 %v3671_v57, 264  ;;  %602 = vbcast.lane.b32.xlu1 %v3671_v57, 256 }
 0x132   : > { %614 = vbcast.lane.b32.xlu0 %v3671_v57, 280  ;;  %610 = vbcast.lane.b32.xlu1 %v3671_v57, 272 }
 0x136   : > { %625 = vbcast.lane.b32.xlu0 %v3679_v60, 264  ;;  %621 = vbcast.lane.b32.xlu1 %v3679_v60, 256 }
 0x13a   : > { %633 = vbcast.lane.b32.xlu0 %v3679_v60, 280  ;;  %629 = vbcast.lane.b32.xlu1 %v3679_v60, 272 }
 0x13e   : > { %492 = vbcast.lane.b32.xlu0 %v3877_v39, 264  ;;  %488 = vbcast.lane.b32.xlu1 %v3877_v39, 256 }
 0x142   : > { %752 = vbcast.lane.b32.xlu0 %v3684_v62, 264  ;;  %1256 = vbcast.lane.b32.xlu1 %v3889_v49, 256 }
 0x144   : > { %v3893_v46 = vpop.permute.xlu0 %936  ;;  %v3895_v55 = vpop.permute.xlu1 %932 }
 0x146   : > { %760 = vbcast.lane.b32.xlu0 %v3684_v62, 280  ;;  %748 = vbcast.lane.b32.xlu1 %v3684_v62, 256 }
 0x148   : > { %v3899_v56 = vpop.permute.xlu0 %944  ;;  %v3901_v57 = vpop.permute.xlu1 %940 }
 0x14a   : > { %771 = vbcast.lane.b32.xlu0 %v3688_v63, 264  ;;  %756 = vbcast.lane.b32.xlu1 %v3684_v62, 272 }
 0x14c   : > { %v3905_v50 = vpop.permute.xlu0 %955  ;;  %v3907_v60 = vpop.permute.xlu1 %951 }
 0x14e   : > { %779 = vbcast.lane.b32.xlu0 %v3688_v63, 280  ;;  %767 = vbcast.lane.b32.xlu1 %v3688_v63, 256 }
 0x150   : > { %v3911_v12 = vpop.permute.xlu0 %963  ;;  %v3913_v3 = vpop.permute.xlu1 %959 }
 0x152   : > { %790 = vbcast.lane.b32.xlu0 %v3692_v0, 264  ;;  %775 = vbcast.lane.b32.xlu1 %v3688_v63, 272 }
 0x154   : > { %v3917_v1 = vpop.permute.xlu0 %974  ;;  %v3919_v29 = vpop.permute.xlu1 %970 }
 0x156   : > { %798 = vbcast.lane.b32.xlu0 %v3692_v0, 280  ;;  %786 = vbcast.lane.b32.xlu1 %v3692_v0, 256 }
 0x158   : > { %v3923_v62 = vpop.permute.xlu0 %982  ;;  %v3925_v42 = vpop.permute.xlu1 %978 }
 0x15a   : > { %809 = vbcast.lane.b32.xlu0 %v3696_v2, 264  ;;  %794 = vbcast.lane.b32.xlu1 %v3692_v0, 272 }
 0x15c   : > { %v3929_v48 = vpop.permute.xlu0 %993  ;;  %v3931_v61 = vpop.permute.xlu1 %989 }
 0x15d   : > { %4752 = vst [vmem:[#allocation35_spill] sm:$0xff] %v3929_v48 }
 0x15e   : > { %817 = vbcast.lane.b32.xlu0 %v3696_v2, 280  ;;  %805 = vbcast.lane.b32.xlu1 %v3696_v2, 256 }
 0x160   : > { %v3935_v63 = vpop.permute.xlu0 %1001  ;;  %v3937_v58 = vpop.permute.xlu1 %997 }
 0x161   : > { %4753 = vst [vmem:[#allocation36_spill] sm:$0xff] %v3935_v63  ;;  %4754 = vst [vmem:[#allocation37_spill] sm:$0xff] %v3937_v58 }
 0x162   : > { %676 = vbcast.lane.b32.xlu0 %v670_v51, 264  ;;  %813 = vbcast.lane.b32.xlu1 %v3696_v2, 272  ;;  %v1622_v2 = vrot.slane %v3631_v35, %v3622_v8 }
 0x164   : > { %v3942_v47 = vpop.permute.xlu0 %860  ;;  %v3944_v0 = vpop.permute.xlu1 %856 }
 0x166   : > { %1444 = vbcast.lane.b32.xlu0 %v1438_v45, 264  ;;  %672 = vbcast.lane.b32.xlu1 %v670_v51, 256 }
 0x168   : > { %v3948_v44 = vpop.permute.xlu0 %384  ;;  %v3950_v41 = vpop.permute.xlu1 %380 }
 0x16a   : > { %1260 = vbcast.lane.b32.xlu0 %v3889_v49, 264  ;;  %1440 = vbcast.lane.b32.xlu1 %v1438_v45, 256 }
 0x16c   : > { %v3953_v54 = vpop.permute.xlu0 %392  ;;  %v3955_v40 = vpop.permute.xlu1 %388 }
 0x16e   : > { %1628 = vbcast.lane.b32.xlu0 %v1622_v2, 264  ;;  %1624 = vbcast.lane.b32.xlu1 %v1622_v2, 256 }
 0x170   : > { %v3959_v38 = vpop.permute.xlu0 %403  ;;  %v3961_v59 = vpop.permute.xlu1 %399 }
 0x172   : > { %316 = vbcast.lane.b32.xlu0 %v3849_v32, 280  ;;  %312 = vbcast.lane.b32.xlu1 %v3849_v32, 272  ;;  %v3371_v32 = vld [vmem:[%s4683_s4 + $0x4] ss:$8 sps:$4 sm:$0xff]  }
 0x173   : > { %2181 = vmatprep.subr.bf16.mxu1 %v3371_v32 }
 0x174   : > { %v3965_v37 = vpop.permute.xlu0 %411  ;;  %v3967_v36 = vpop.permute.xlu1 %407 }
 0x176   : > { %684 = vbcast.lane.b32.xlu0 %v670_v51, 280  ;;  %680 = vbcast.lane.b32.xlu1 %v670_v51, 272 }
 0x178   : > { %v3969_v34 = vpop.permute.xlu0 %422  ;;  %v3971_v33 = vpop.permute.xlu1 %418 }
 0x17a   : > { %1084 = vbcast.lane.b32.xlu0 %v3855_v43, 280  ;;  %1080 = vbcast.lane.b32.xlu1 %v3855_v43, 272 }
 0x17c   : > { %v3975_v8 = vpop.permute.xlu0 %430  ;;  %v3977_v35 = vpop.permute.xlu1 %426 }
 0x17e   : > { %1452 = vbcast.lane.b32.xlu0 %v1438_v45, 280  ;;  %1448 = vbcast.lane.b32.xlu1 %v1438_v45, 272 }
 0x180   : > { %v3982_v51 = vpop.permute.xlu0 %441  ;;  %v3984_v31 = vpop.permute.xlu1 %437 }
 0x181   : > { %4755 = vst [vmem:[#allocation38_spill] sm:$0xff] %v3982_v51  ;;  %4756 = vst [vmem:[#allocation39_spill] sm:$0xff] %v3984_v31 }
 0x182   : > { %500 = vbcast.lane.b32.xlu0 %v3877_v39, 280  ;;  %496 = vbcast.lane.b32.xlu1 %v3877_v39, 272 }
 0x184   : > { %v3988_v43 = vpop.permute.xlu0 %449  ;;  %v3990_v30 = vpop.permute.xlu1 %445 }
 0x185   : > { %4757 = vst [vmem:[#allocation40_spill] sm:$0xff] %v3988_v43  ;;  %4758 = vst [vmem:[#allocation41_spill] sm:$0xff] %v3990_v30 }
 0x186   : > { %868 = vbcast.lane.b32.xlu0 %v3835_v5, 280  ;;  %864 = vbcast.lane.b32.xlu1 %v3835_v5, 272 }
 0x188   : > { %v3994_v28 = vpop.permute.xlu0 %308  ;;  %v3996_v45 = vpop.permute.xlu1 %304 }
 0x18a   : > { %1268 = vbcast.lane.b32.xlu0 %v3889_v49, 280  ;;  %1264 = vbcast.lane.b32.xlu1 %v3889_v49, 272 }
 0x18c   : > { %v4000_v32 = vpop.permute.xlu0 %1076  ;;  %v4002_v27 = vpop.permute.xlu1 %1072 }
 0x18d   : > { %4759 = vst [vmem:[#allocation42_spill] sm:$0xff] %v4000_v32  ;;  %4760 = vst [vmem:[#allocation43_spill] sm:$0xff] %v4002_v27 }
 0x18e   : > { %1636 = vbcast.lane.b32.xlu0 %v1622_v2, 280  ;;  %1632 = vbcast.lane.b32.xlu1 %v1622_v2, 272 }
 0x190   : > { %v569_v39 = vpop.permute.xlu0 %568  ;;  %v565_v26 = vpop.permute.xlu1 %564 }
 0x192   : > { %327 = vbcast.lane.b32.xlu0 %v3654_v52, 264  ;;  %323 = vbcast.lane.b32.xlu1 %v3654_v52, 256 }
 0x194   : > { %v4006_v5 = vpop.permute.xlu0 %576  ;;  %v573_v25 = vpop.permute.xlu1 %572 }
 0x196   : > { %695 = vbcast.lane.b32.xlu0 %v3701_v4, 264  ;;  %691 = vbcast.lane.b32.xlu1 %v3701_v4, 256 }
 0x198   : > { %v4010_v49 = vpop.permute.xlu0 %587  ;;  %v4012_v24 = vpop.permute.xlu1 %583 }
 0x19a   : > { %1095 = vbcast.lane.b32.xlu0 %v3657_v53, 264  ;;  %1091 = vbcast.lane.b32.xlu1 %v3657_v53, 256 }
 0x19c   : > { %v4016_v2 = vpop.permute.xlu0 %595  ;;  %v4018_v23 = vpop.permute.xlu1 %591 }
 0x19e   : > { %1463 = vbcast.lane.b32.xlu0 %v3704_v7, 264  ;;  %1459 = vbcast.lane.b32.xlu1 %v3704_v7, 256 }
 0x1a0   : > { %v4022_v22 = vpop.permute.xlu0 %606  ;;  %v4024_v21 = vpop.permute.xlu1 %602 }
 0x1a2   : > { %511 = vbcast.lane.b32.xlu0 %v3707_v9, 264  ;;  %507 = vbcast.lane.b32.xlu1 %v3707_v9, 256 }
 0x1a4   : > { %v4028_v27 = vpop.permute.xlu0 %614  ;;  %v4030_v32 = vpop.permute.xlu1 %610 }
 0x1a6   : > { %879 = vbcast.lane.b32.xlu0 %v3710_v10, 264  ;;  %875 = vbcast.lane.b32.xlu1 %v3710_v10, 256 }
 0x1a8   : > { %v4034_v43 = vpop.permute.xlu0 %625  ;;  %v4036_v63 = vpop.permute.xlu1 %621 }
 0x1a9   : > { %4761 = vst [vmem:[#allocation44_spill] sm:$0xff] %v4034_v43  ;;  %4762 = vst [vmem:[#allocation45_spill] sm:$0xff] %v4036_v63  ;;  %v4765_v43 = vlaneseq }
 0x1aa   : > { %1279 = vbcast.lane.b32.xlu0 %v3713_v11, 264  ;;  %1275 = vbcast.lane.b32.xlu1 %v3713_v11, 256 }
 0x1ab   : > { %v4053_v51 = vand.u32 127, %v4765_v43 }
 0x1ac   : > { %v4040_v30 = vpop.permute.xlu0 %633  ;;  %v4042_v20 = vpop.permute.xlu1 %629 }
 0x1ad   : > { %4763 = vst [vmem:[#allocation46_spill] sm:$0xff] %v4040_v30  ;;  %4764 = vst [vmem:[#allocation47_spill] sm:$0xff] %v4042_v20  ;;  %vm468_vm1 = vcmp.eq.s32.totalorder %v3948_v44, %v4053_v51  ;;  %vm467_vm2 = vcmp.eq.s32.totalorder %v3950_v41, %v4053_v51  ;;  %v3369_v44 = vld [vmem:[%s4683_s4] ss:$8 sps:$4 sm:$0xff]   ;;  %vm469_vm7 = vcmp.eq.s32.totalorder %v3955_v40, %v4053_v51 }
 0x1ae   : > { %1647 = vbcast.lane.b32.xlu0 %v3717_v13, 264  ;;  %1643 = vbcast.lane.b32.xlu1 %v3717_v13, 256  ;;  %v651_v43 = vsel %vm467_vm2, %v565_v26, 0.0  ;;  %vm470_vm8 = vcmp.eq.s32.totalorder %v3953_v54, %v4053_v51  ;;  %vm471_vm11 = vcmp.eq.s32.totalorder %v3961_v59, %v4053_v51  ;;  %vm472_vm12 = vcmp.eq.s32.totalorder %v3959_v38, %v4053_v51 }
 0x1af   : > { %vm473_vm15 = vcmp.eq.s32.totalorder %v3967_v36, %v4053_v51 }
 0x1b0   : > { %v4046_v58 = vpop.permute.xlu0 %492  ;;  %v4048_v19 = vpop.permute.xlu1 %488 }
 0x1b2   : > { %335 = vbcast.lane.b32.xlu0 %v3654_v52, 280  ;;  %331 = vbcast.lane.b32.xlu1 %v3654_v52, 272  ;;  %v652_v52 = vsel %vm468_vm1, %v569_v39, 0.0 }
 0x1b4   : > { %v753_v48 = vpop.permute.xlu0 %752  ;;  %v4055_v63 = vpop.permute.xlu1 %1256 }
 0x1b5   : > { %4766 = vst [vmem:[#allocation48_spill] sm:$0xff] %v4055_v63  ;;  %vm836_vm0 = vcmp.eq.s32.totalorder %v753_v48, %v4053_v51 }
 0x1b6   : > { %703 = vbcast.lane.b32.xlu0 %v3701_v4, 280  ;;  %699 = vbcast.lane.b32.xlu1 %v3701_v4, 272  ;;  %v1020_v30 = vsel %vm836_vm0, %v3893_v46, 0.0  ;;  %vm474_vm0 = vcmp.eq.s32.totalorder %v3965_v37, %v4053_v51 }
 0x1b7   : > { %v1052_v4 = vadd.f32 %v1020_v30, %v652_v52 }
 0x1b8   : > { %v761_v20 = vpop.permute.xlu0 %760  ;;  %v749_v31 = vpop.permute.xlu1 %748 }
 0x1b9   : > { %vm835_vm3 = vcmp.eq.s32.totalorder %v749_v31, %v4053_v51  ;;  %vm838_vm5 = vcmp.eq.s32.totalorder %v761_v20, %v4053_v51  ;;  %v4767_v20 = vmov 0  }
 0x1ba   : > { %v1019_v48 = vsel %vm835_vm3, %v3895_v55, 0.0  ;;  %1103 = vbcast.lane.b32.xlu0 %v3657_v53, 280  ;;  %1099 = vbcast.lane.b32.xlu1 %v3657_v53, 272  ;;  %v653_v53 = vsel %vm469_vm7, %v573_v25, 0.0  ;;  %v1022_v30 = vsel %vm838_vm5, %v3899_v56, 0.0  ;;  %vm475_vm5 = vcmp.eq.s32.totalorder %v3971_v33, %v4053_v51 }
 0x1bb   : > { %v1051_v46 = vadd.f32 %v1019_v48, %v651_v43  ;;  %vm452_vm7 = vcmp.eq.s32.totalorder %v3994_v28, %v4053_v51 }
 0x1bc   : > { %v772_v63 = vpop.permute.xlu0 %771  ;;  %v757_v6 = vpop.permute.xlu1 %756 }
 0x1bd   : > { %v1843_v31 = vpack.c.bf16 %v1052_v4, %v1051_v46  ;;  %vm837_vm6 = vcmp.eq.s32.totalorder %v757_v6, %v4053_v51  ;;  %vm840_vm10 = vcmp.eq.s32.totalorder %v772_v63, %v4053_v51 }
 0x1be   : > { %v1021_v26 = vsel %vm837_vm6, %v3901_v57, 0.0  ;;  %1471 = vbcast.lane.b32.xlu0 %v3704_v7, 280  ;;  %1467 = vbcast.lane.b32.xlu1 %v3704_v7, 272  ;;  %v654_v57 = vsel %vm470_vm8, %v4006_v5, 0.0  ;;  %v1024_v54 = vsel %vm840_vm10, %v3905_v50, 0.0  ;;  %vm476_vm6 = vcmp.eq.s32.totalorder %v3969_v34, %v4053_v51 }
 0x1bf   : > { %3134 = vmatmul.mubr.msk.bf16.vlgmr.msra.gmra.mrb[0].mxu1 %vm1879_vm4, %v1843_v31  ;;  %v1053_v6 = vadd.f32 %v1021_v26, %v653_v53  ;;  %v1054_v7 = vadd.f32 %v1022_v30, %v654_v57  ;;  %vm451_vm8 = vcmp.eq.s32.totalorder %v3996_v45, %v4053_v51  ;;  %v636_v34 = vsel %vm452_vm7, %v4046_v58, 0.0 }
 0x1c0   : > { %v780_v41 = vpop.permute.xlu0 %779  ;;  %v768_v55 = vpop.permute.xlu1 %767  ;;  %2050 = vmatprep.mubr.bf16.mxu1 %v4767_v20  ;;  %2182 = vmatpush1.bf16.msra.mxu1 %v3369_v44 }
 0x1c1   : > { %vm839_vm9 = vcmp.eq.s32.totalorder %v768_v55, %v4053_v51  ;;  %v1844_v56 = vpack.c.bf16 %v1054_v7, %v1053_v6  ;;  %vm842_vm14 = vcmp.eq.s32.totalorder %v780_v41, %v4053_v51 }
 0x1c2   : > { %519 = vbcast.lane.b32.xlu0 %v3707_v9, 280  ;;  %515 = vbcast.lane.b32.xlu1 %v3707_v9, 272  ;;  %v1023_v39 = vsel %vm839_vm9, %v3907_v60, 0.0  ;;  %v655_v9 = vsel %vm471_vm11, %v4012_v24, 0.0  ;;  %v1026_v38 = vsel %vm842_vm14, %v3911_v12, 0.0 }
 0x1c3   : > { %v1055_v60 = vadd.f32 %v1023_v39, %v655_v9  ;;  %v4771_v39 = vld [vmem:[#allocation35_spill] sm:$0xff] }
 0x1c4   : > { %v791_v25 = vpop.permute.xlu0 %790  ;;  %v776_v40 = vpop.permute.xlu1 %775 }
 0x1c5   : > { %vm841_vm13 = vcmp.eq.s32.totalorder %v776_v40, %v4053_v51  ;;  %vm844_vm2 = vcmp.eq.s32.totalorder %v791_v25, %v4053_v51  ;;  %v4768_v25 = vld [vmem:[#allocation8_spill] sm:$0xff]  ;;  %v4770_v40 = vld [vmem:[#allocation45_spill] sm:$0xff] }
 0x1c6   : > { %887 = vbcast.lane.b32.xlu0 %v3710_v10, 280  ;;  %883 = vbcast.lane.b32.xlu1 %v3710_v10, 272  ;;  %v656_v10 = vsel %vm472_vm12, %v4010_v49, 0.0  ;;  %v1025_v43 = vsel %vm841_vm13, %v3913_v3, 0.0  ;;  %v1028_v46 = vsel %vm844_vm2, %v3917_v1, 0.0  ;;  %vm477_vm12 = vcmp.eq.s32.totalorder %v3977_v35, %v4053_v51 }
 0x1c7   : > { %3135 = vmatmul.mubr.msk.bf16.gmra.mrb[4].mxu1 %vm1879_vm4, %v1844_v56  ;;  %v1056_v63 = vadd.f32 %v1024_v54, %v656_v10  ;;  %vm478_vm13 = vcmp.eq.s32.totalorder %v3975_v8, %v4053_v51 }
 0x1c8   : > { %v4097_v5 = vpop.permute.xlu0 %798  ;;  %v787_v52 = vpop.permute.xlu1 %786  ;;  %2060 = vmatprep.mubr.bf16.mxu1 %v4767_v20  ;;  %v662_v35 = vsel %vm478_vm13, %v4028_v27, 0.0  ;;  %v4769_v27 = vld [vmem:[#allocation39_spill] sm:$0xff] }
 0x1c9   : > { %v1845_v59 = vpack.c.bf16 %v1056_v63, %v1055_v60  ;;  %vm843_vm1 = vcmp.eq.s32.totalorder %v787_v52, %v4053_v51  ;;  %vm846_vm11 = vcmp.eq.s32.totalorder %v4097_v5, %v4053_v51  ;;  %v4772_v52 = vld [vmem:[#allocation38_spill] sm:$0xff]  ;;  %v4773_v60 = vld [vmem:[#allocation44_spill] sm:$0xff]  ;;  %v4774_v63 = vld [vmem:[#allocation9_spill] sm:$0xff] }
 0x1ca   : > { %1287 = vbcast.lane.b32.xlu0 %v3713_v11, 280  ;;  %1283 = vbcast.lane.b32.xlu1 %v3713_v11, 272  ;;  %v657_v11 = vsel %vm473_vm15, %v4018_v23, 0.0  ;;  %v1027_v37 = vsel %vm843_vm1, %v3919_v29, 0.0  ;;  %v1030_v41 = vsel %vm846_vm11, %v3923_v62, 0.0  ;;  %vm480_vm1 = vcmp.eq.s32.totalorder %v4772_v52, %v4053_v51 }
 0x1cb   : > { %v1057_v3 = vadd.f32 %v1025_v43, %v657_v11  ;;  %v1062_v57 = vadd.f32 %v1030_v41, %v662_v35  ;;  %v664_v10 = vsel %vm480_vm1, %v4773_v60, 0.0  ;;  %v4775_v11 = vld [vmem:[#allocation37_spill] sm:$0xff] }
 0x1cc   : > { %v4106_v24 = vpop.permute.xlu0 %809  ;;  %v795_v50 = vpop.permute.xlu1 %794 }
 0x1cd   : > { %vm845_vm10 = vcmp.eq.s32.totalorder %v795_v50, %v4053_v51  ;;  %vm848_vm15 = vcmp.eq.s32.totalorder %v4106_v24, %v4053_v51 }
 0x1ce   : > { %1655 = vbcast.lane.b32.xlu0 %v3717_v13, 280  ;;  %1651 = vbcast.lane.b32.xlu1 %v3717_v13, 272  ;;  %v658_v13 = vsel %vm474_vm0, %v4016_v2, 0.0  ;;  %v659_v2 = vsel %vm475_vm5, %v4024_v21, 0.0  ;;  %v660_v21 = vsel %vm476_vm6, %v4022_v22, 0.0  ;;  %v1029_v58 = vsel %vm845_vm10, %v3925_v42, 0.0 }
 0x1cf   : > { %3136 = vmatmul.mubr.msk.bf16.gmra.mrb[8].mxu1 %vm1879_vm4, %v1845_v59  ;;  %v1058_v36 = vadd.f32 %v1026_v38, %v658_v13  ;;  %v1059_v33 = vadd.f32 %v1027_v37, %v659_v2  ;;  %v1060_v26 = vadd.f32 %v1028_v46, %v660_v21  ;;  %vm479_vm0 = vcmp.eq.s32.totalorder %v4769_v27, %v4053_v51  ;;  %v4778_v13 = vld [vmem:[#allocation47_spill] sm:$0xff]  ;;  %v4781_v46 = vld [vmem:[#allocation46_spill] sm:$0xff] }
 0x1d0   : > { %v4117_v49 = vpop.permute.xlu0 %817  ;;  %v4119_v48 = vpop.permute.xlu1 %805  ;;  %2070 = vmatprep.mubr.bf16.mxu1 %v4767_v20  ;;  %v663_v56 = vsel %vm479_vm0, %v4770_v40, 0.0  ;;  %v1032_v9 = vsel %vm848_vm15, %v4771_v39, 0.0 }
 0x1d1   : > { %v1846_v4 = vpack.c.bf16 %v1058_v36, %v1057_v3  ;;  %v1847_v22 = vpack.c.bf16 %v1060_v26, %v1059_v33  ;;  %vm847_vm14 = vcmp.eq.s32.totalorder %v4119_v48, %v4053_v51  ;;  %v1064_v24 = vadd.f32 %v1032_v9, %v664_v10  ;;  %v4776_v48 = vld [vmem:[#allocation10_spill] sm:$0xff]  ;;  %v4777_v3 = vld [vmem:[#allocation41_spill] sm:$0xff]  ;;  %v4783_v26 = vld [vmem:[#allocation43_spill] sm:$0xff] }
 0x1d2   : > { %346 = vbcast.lane.b32.xlu0 %v3720_v14, 264  ;;  %342 = vbcast.lane.b32.xlu1 %v3720_v14, 256  ;;  %v1031_v8 = vsel %vm847_vm14, %v3931_v61, 0.0  ;;  %vm481_vm5 = vcmp.eq.s32.totalorder %v4777_v3, %v4053_v51  ;;  %vm1219_vm10 = vcmp.eq.s32.totalorder %v4783_v26, %v4053_v51 }
 0x1d3   : > { %v1063_v61 = vadd.f32 %v1031_v8, %v663_v56  ;;  %v665_v36 = vsel %vm481_vm5, %v4778_v13, 0.0 }
 0x1d4   : > { %v677_v23 = vpop.permute.xlu0 %676  ;;  %v4128_v12 = vpop.permute.xlu1 %813 }
 0x1d5   : > { %vm820_vm3 = vcmp.eq.s32.totalorder %v677_v23, %v4053_v51  ;;  %vm849_vm2 = vcmp.eq.s32.totalorder %v4128_v12, %v4053_v51  ;;  %v1849_v43 = vpack.c.bf16 %v1064_v24, %v1063_v61  ;;  %v4779_v23 = vld [vmem:[#allocation36_spill] sm:$0xff]  ;;  %v4785_v24 = vld [vmem:[#allocation11_spill] sm:$0xff] }
 0x1d6   : > { %714 = vbcast.lane.b32.xlu0 %v3723_v15, 264  ;;  %710 = vbcast.lane.b32.xlu1 %v3723_v15, 256  ;;  %v1004_v44 = vsel %vm820_vm3, %v3942_v47, 0.0  ;;  %v635_v47 = vsel %vm451_vm8, %v4048_v19, 0.0  ;;  %vm850_vm3 = vcmp.eq.s32.totalorder %v4117_v49, %v4053_v51  ;;  %v1033_v38 = vsel %vm849_vm2, %v4775_v11, 0.0  ;;  %v4780_v49 = vld [vmem:[#allocation40_spill] sm:$0xff] }
 0x1d7   : > { %3137 = vmatmul.mubr.msk.bf16.gmra.mrb[12].mxu1 %vm1879_vm4, %v1846_v4  ;;  %v1036_v28 = vadd.f32 %v1004_v44, %v636_v34  ;;  %v1034_v12 = vsel %vm850_vm3, %v4779_v23, 0.0  ;;  %vm482_vm6 = vcmp.eq.s32.totalorder %v4780_v49, %v4053_v51  ;;  %v1065_v2 = vadd.f32 %v1033_v38, %v665_v36  ;;  %v4787_v23 = vld [vmem:[#allocation13_spill] sm:$0xff]  ;;  %v4788_v49 = vld [vmem:[#allocation14_spill] sm:$0xff] }
 0x1d8   : > { %v4143_v31 = vpop.permute.xlu0 %1444  ;;  %v673_v29 = vpop.permute.xlu1 %672  ;;  %2080 = vmatprep.mubr.bf16.mxu1 %v4767_v20  ;;  %v666_v44 = vsel %vm482_vm6, %v4781_v46, 0.0 }
 0x1d9   : > { %vm819_vm9 = vcmp.eq.s32.totalorder %v673_v29, %v4053_v51  ;;  %v1066_v29 = vadd.f32 %v1034_v12, %v666_v44  ;;  %vm1588_vm7 = vcmp.eq.s32.totalorder %v4143_v31, %v4053_v51 }
 0x1da   : > { %v1003_v1 = vsel %vm819_vm9, %v3944_v0, 0.0  ;;  %1114 = vbcast.lane.b32.xlu0 %v3726_v16, 264  ;;  %1110 = vbcast.lane.b32.xlu1 %v3726_v16, 256  ;;  %v661_v0 = vsel %vm477_vm12, %v4030_v32, 0.0 }
 0x1db   : > { %v1035_v45 = vadd.f32 %v1003_v1, %v635_v47  ;;  %v1061_v42 = vadd.f32 %v1029_v58, %v661_v0  ;;  %v4782_v1 = vld [vmem:[#allocation42_spill] sm:$0xff] }
 0x1dc   : > { %v4158_v53 = vpop.permute.xlu0 %1260  ;;  %v4160_v30 = vpop.permute.xlu1 %1440  ;;  %vm1220_vm9 = vcmp.eq.s32.totalorder %v4782_v1, %v4053_v51  ;;  %v4789_v1 = vld [vmem:[#allocation15_spill] sm:$0xff] }
 0x1dd   : > { %v1835_v19 = vpack.c.bf16 %v1036_v28, %v1035_v45  ;;  %v1848_v7 = vpack.c.bf16 %v1062_v57, %v1061_v42  ;;  %vm1587_vm8 = vcmp.eq.s32.totalorder %v4160_v30, %v4053_v51  ;;  %v1850_v28 = vpack.c.bf16 %v1066_v29, %v1065_v2  ;;  %v4784_v45 = vld [vmem:[#allocation48_spill] sm:$0xff] }
 0x1de   : > { %1482 = vbcast.lane.b32.xlu0 %v3729_v17, 264  ;;  %1478 = vbcast.lane.b32.xlu1 %v3729_v17, 256 }
 0x1df   : > { %3126 = vmatmul.mubr.msk.bf16.vlgmr.msra.gmra.mrb[0].mxu0 %vm1879_vm4, %v1835_v19  ;;  %3138 = vmatmul.mubr.msk.bf16.gmra.mrb[16].mxu1 %vm1879_vm4, %v1847_v22  ;;  %v1404_v22 = vsel %vm1220_vm9, %v4158_v53, 0.0 }
 0x1e0   : > { %v1629_v55 = vpop.permute.xlu0 %1628  ;;  %v1625_v6 = vpop.permute.xlu1 %1624  ;;  %2090 = vmatprep.mubr.bf16.mxu1 %v4767_v20  ;;  %1970 = vmatprep.mubr.bf16.mxu0 %v4767_v20 }
 0x1e1   : > { %v1772_v33 = vsel %vm1588_vm7, %v1629_v55, 0.0  ;;  %v1771_v21 = vsel %vm1587_vm8, %v1625_v6, 0.0 }
 0x1e2   : > { %530 = vbcast.lane.b32.xlu0 %v3732_v18, 264  ;;  %526 = vbcast.lane.b32.xlu1 %v3732_v18, 256  ;;  %v1804_v31 = vadd.f32 %v1772_v33, %v1404_v22 }
 0x1e4   : > { %v4182_v62 = vpop.permute.xlu0 %316  ;;  %v4184_v32 = vpop.permute.xlu1 %312 }
 0x1e5   : > { %vm454_vm11 = vcmp.eq.s32.totalorder %v4182_v62, %v4053_v51  ;;  %vm453_vm12 = vcmp.eq.s32.totalorder %v4184_v32, %v4053_v51 }
 0x1e6   : > { %898 = vbcast.lane.b32.xlu0 %v4768_v25, 264  ;;  %894 = vbcast.lane.b32.xlu1 %v4768_v25, 256 }
 0x1e7   : > { %3139 = vmatmul.mubr.msk.bf16.gmra.mrb[20].mxu1 %vm1879_vm4, %v1848_v7 }
 0x1e8   : > { %v685_v54 = vpop.permute.xlu0 %684  ;;  %v681_v5 = vpop.permute.xlu1 %680  ;;  %2100 = vmatprep.mubr.bf16.mxu1 %v4767_v20 }
 0x1e9   : > { %vm822_vm13 = vcmp.eq.s32.totalorder %v685_v54, %v4053_v51  ;;  %vm821_vm14 = vcmp.eq.s32.totalorder %v681_v5, %v4053_v51 }
 0x1ea   : > { %1298 = vbcast.lane.b32.xlu0 %v4774_v63, 264  ;;  %1294 = vbcast.lane.b32.xlu1 %v4774_v63, 256 }
 0x1ec   : > { %v4204_v50 = vpop.permute.xlu0 %1084  ;;  %v4206_v59 = vpop.permute.xlu1 %1080 }
 0x1ed   : > { %vm1222_vm15 = vcmp.eq.s32.totalorder %v4204_v50, %v4053_v51  ;;  %vm1221_vm0 = vcmp.eq.s32.totalorder %v4206_v59, %v4053_v51  ;;  %v4786_v59 = vld [vmem:[#allocation12_spill] sm:$0xff] }
 0x1ee   : > { %1666 = vbcast.lane.b32.xlu0 %v4776_v48, 264  ;;  %1662 = vbcast.lane.b32.xlu1 %v4776_v48, 256 }
 0x1ef   : > { %3140 = vmatmul.mubr.msk.bf16.gmra.mrb[24].mxu1 %vm1879_vm4, %v1849_v43 }
 0x1f0   : > { %v1453_v4 = vpop.permute.xlu0 %1452  ;;  %v1449_v37 = vpop.permute.xlu1 %1448  ;;  %2110 = vmatprep.mubr.bf16.mxu1 %v4767_v20 }
 0x1f1   : > { %vm1590_vm1 = vcmp.eq.s32.totalorder %v1453_v4, %v4053_v51  ;;  %vm1589_vm2 = vcmp.eq.s32.totalorder %v1449_v37, %v4053_v51 }
 0x1f2   : > { %354 = vbcast.lane.b32.xlu0 %v3720_v14, 280  ;;  %350 = vbcast.lane.b32.xlu1 %v3720_v14, 272  ;;  %v1403_v14 = vsel %vm1219_vm10, %v4784_v45, 0.0 }
 0x1f3   : > { %v1803_v30 = vadd.f32 %v1771_v21, %v1403_v14  ;;  %v4790_v14 = vld [vmem:[#allocation16_spill] sm:$0xff] }
 0x1f4   : > { %v501_v34 = vpop.permute.xlu0 %500  ;;  %v497_v47 = vpop.permute.xlu1 %496 }
 0x1f5   : > { %v638_v58 = vsel %vm454_vm11, %v501_v34, 0.0  ;;  %v1851_v62 = vpack.c.bf16 %v1804_v31, %v1803_v30  ;;  %v4791_v30 = vld [vmem:[#allocation17_spill] sm:$0xff] }
 0x1f6   : > { %722 = vbcast.lane.b32.xlu0 %v3723_v15, 280  ;;  %718 = vbcast.lane.b32.xlu1 %v3723_v15, 272  ;;  %v637_v15 = vsel %vm453_vm12, %v497_v47, 0.0 }
 0x1f7   : > { %3141 = vmatmul.mubr.msk.bf16.gmra.mrb[28].mxu1 %vm1879_vm4, %v1850_v28 }
 0x1f8   : > { %v869_v19 = vpop.permute.xlu0 %868  ;;  %v865_v53 = vpop.permute.xlu1 %864  ;;  %2213 = vmatprep.mubr.bf16.mxu1 %v4767_v20 }
 0x1f9   : > { %v1006_v0 = vsel %vm822_vm13, %v869_v19, 0.0  ;;  %v1005_v41 = vsel %vm821_vm14, %v865_v53, 0.0 }
 0x1fa   : > { %v1038_v55 = vadd.f32 %v1006_v0, %v638_v58  ;;  %v1037_v6 = vadd.f32 %v1005_v41, %v637_v15  ;;  %1122 = vbcast.lane.b32.xlu0 %v3726_v16, 280  ;;  %1118 = vbcast.lane.b32.xlu1 %v3726_v16, 272  ;;  %v4792_v58 = vld [vmem:[#allocation18_spill] sm:$0xff] }
 0x1fc   : > { %v1836_v42 = vpack.c.bf16 %v1038_v55, %v1037_v6  ;;  %v1269_v35 = vpop.permute.xlu0 %1268  ;;  %v1265_v57 = vpop.permute.xlu1 %1264 }
 0x1fd   : > { %v1405_v7 = vsel %vm1221_vm0, %v1265_v57, 0.0 }
 0x1fe   : > { %1490 = vbcast.lane.b32.xlu0 %v3729_v17, 280  ;;  %1486 = vbcast.lane.b32.xlu1 %v3729_v17, 272  ;;  %v1406_v17 = vsel %vm1222_vm15, %v1269_v35, 0.0 }
 0x1ff   : > { %3127 = vmatmul.mubr.msk.bf16.gmra.mrb[4].mxu0 %vm1879_vm4, %v1836_v42  ;;  %3144 = vmatmul.mubr.msk.bf16.vlgmr.msra.gmra.mrb[32].mxu1 %vm1879_vm4, %v1851_v62 }
 0x200   : > { %v1637_v16 = vpop.permute.xlu0 %1636  ;;  %v1633_v32 = vpop.permute.xlu1 %1632  ;;  %2223 = vmatprep.mubr.bf16.mxu1 %v4767_v20  ;;  %1980 = vmatprep.mubr.bf16.mxu0 %v4767_v20 }
 0x201   : > { %v1774_v8 = vsel %vm1590_vm1, %v1637_v16, 0.0  ;;  %v1773_v27 = vsel %vm1589_vm2, %v1633_v32, 0.0 }
 0x202   : > { %v1806_v40 = vadd.f32 %v1774_v8, %v1406_v17  ;;  %v1805_v56 = vadd.f32 %v1773_v27, %v1405_v7  ;;  %538 = vbcast.lane.b32.xlu0 %v3732_v18, 280  ;;  %534 = vbcast.lane.b32.xlu1 %v3732_v18, 272 }
 0x204   : > { %v1852_v39 = vpack.c.bf16 %v1806_v40, %v1805_v56  ;;  %v328_v9 = vpop.permute.xlu0 %327  ;;  %v324_v54 = vpop.permute.xlu1 %323  ;;  %v3372_v40 = vld [vmem:[#allocation2 + $0x40] sm:$0xff]  }
 0x205   : > { %vm456_vm3 = vcmp.eq.s32.totalorder %v328_v9, %v4053_v51  ;;  %vm455_vm5 = vcmp.eq.s32.totalorder %v324_v54, %v4053_v51  ;;  %v3373_v56 = vld [vmem:[#allocation2] sm:$0xff]   ;;  %3182 = vmatprep.subr.bf16.mxu0 %v3372_v40 }
 0x206   : > { %906 = vbcast.lane.b32.xlu0 %v4768_v25, 280  ;;  %902 = vbcast.lane.b32.xlu1 %v4768_v25, 272 }
 0x207   : > { %3145 = vmatmul.mubr.msk.bf16.gmra.mrb[36].mxu1 %vm1879_vm4, %v1852_v39  ;;  %v3374_v39 = vld [vmem:[#allocation2 + $0x48] sm:$0xff]   ;;  %3183 = vmatpush3.bf16.msra.mxu0 %v3373_v56 }
 0x208   : > { %v696_v5 = vpop.permute.xlu0 %695  ;;  %v692_v52 = vpop.permute.xlu1 %691  ;;  %2233 = vmatprep.mubr.bf16.mxu1 %v4767_v20  ;;  %3184 = vmatprep.subr.bf16.mxu0 %v3374_v39 }
 0x209   : > { %vm824_vm6 = vcmp.eq.s32.totalorder %v696_v5, %v4053_v51  ;;  %vm823_vm7 = vcmp.eq.s32.totalorder %v692_v52, %v4053_v51 }
 0x20a   : > { %1306 = vbcast.lane.b32.xlu0 %v4774_v63, 280  ;;  %1302 = vbcast.lane.b32.xlu1 %v4774_v63, 272 }
 0x20c   : > { %v1096_v61 = vpop.permute.xlu0 %1095  ;;  %v1092_v60 = vpop.permute.xlu1 %1091 }
 0x20d   : > { %vm1224_vm8 = vcmp.eq.s32.totalorder %v1096_v61, %v4053_v51  ;;  %vm1223_vm9 = vcmp.eq.s32.totalorder %v1092_v60, %v4053_v51 }
 0x20e   : > { %1674 = vbcast.lane.b32.xlu0 %v4776_v48, 280  ;;  %1670 = vbcast.lane.b32.xlu1 %v4776_v48, 272 }
 0x210   : > { %v1464_v18 = vpop.permute.xlu0 %1463  ;;  %v1460_v10 = vpop.permute.xlu1 %1459 }
 0x211   : > { %vm1592_vm10 = vcmp.eq.s32.totalorder %v1464_v18, %v4053_v51  ;;  %vm1591_vm11 = vcmp.eq.s32.totalorder %v1460_v10, %v4053_v51 }
 0x212   : > { %365 = vbcast.lane.b32.xlu0 %v4785_v24, 264  ;;  %361 = vbcast.lane.b32.xlu1 %v4785_v24, 256 }
 0x214   : > { %v512_v25 = vpop.permute.xlu0 %511  ;;  %v508_v50 = vpop.permute.xlu1 %507 }
 0x215   : > { %v640_v11 = vsel %vm456_vm3, %v512_v25, 0.0  ;;  %v639_v38 = vsel %vm455_vm5, %v508_v50, 0.0 }
 0x216   : > { %733 = vbcast.lane.b32.xlu0 %v4786_v59, 264  ;;  %729 = vbcast.lane.b32.xlu1 %v4786_v59, 256 }
 0x218   : > { %v880_v63 = vpop.permute.xlu0 %879  ;;  %v876_v43 = vpop.permute.xlu1 %875 }
 0x219   : > { %v1008_v48 = vsel %vm824_vm6, %v880_v63, 0.0  ;;  %v1007_v3 = vsel %vm823_vm7, %v876_v43, 0.0  ;;  %v3376_v63 = vld [vmem:[#allocation2 + $0x50] sm:$0xff]  }
 0x21a   : > { %v1040_v13 = vadd.f32 %v1008_v48, %v640_v11  ;;  %v1039_v36 = vadd.f32 %v1007_v3, %v639_v38  ;;  %1133 = vbcast.lane.b32.xlu0 %v4787_v23, 264  ;;  %1129 = vbcast.lane.b32.xlu1 %v4787_v23, 256  ;;  %v3377_v43 = vld [vmem:[#allocation2 + $0x10] sm:$0xff]   ;;  %v3378_v11 = vld [vmem:[#allocation2 + $0x58] sm:$0xff]  }
 0x21b   : > { %v3379_v3 = vld [vmem:[#allocation2 + $0x18] sm:$0xff]  }
 0x21c   : > { %v1837_v12 = vpack.c.bf16 %v1040_v13, %v1039_v36  ;;  %v1280_v4 = vpop.permute.xlu0 %1279  ;;  %v1276_v37 = vpop.permute.xlu1 %1275  ;;  %v3380_v13 = vld [vmem:[#allocation2 + $0x60] sm:$0xff]  }
 0x21d   : > { %v1408_v44 = vsel %vm1224_vm8, %v1280_v4, 0.0  ;;  %v1407_v29 = vsel %vm1223_vm9, %v1276_v37, 0.0  ;;  %v3382_v4 = vld [vmem:[#allocation2 + $0x68] sm:$0xff]  }
 0x21e   : > { %1501 = vbcast.lane.b32.xlu0 %v4788_v49, 264  ;;  %1497 = vbcast.lane.b32.xlu1 %v4788_v49, 256 }
 0x21f   : > { %3128 = vmatmul.mubr.msk.bf16.gmra.mrb[8].mxu0 %vm1879_vm4, %v1837_v12  ;;  %v3381_v12 = vld [vmem:[#allocation2 + $0x20] sm:$0xff]  }
 0x220   : > { %v1648_v2 = vpop.permute.xlu0 %1647  ;;  %v1644_v46 = vpop.permute.xlu1 %1643  ;;  %1990 = vmatprep.mubr.bf16.mxu0 %v4767_v20 }
 0x221   : > { %v1776_v33 = vsel %vm1592_vm10, %v1648_v2, 0.0  ;;  %v1775_v21 = vsel %vm1591_vm11, %v1644_v46, 0.0  ;;  %v4793_v2 = vld [vmem:[#allocation19_spill] sm:$0xff]  ;;  %v3383_v46 = vld [vmem:[#allocation2 + $0x28] sm:$0xff]  }
 0x222   : > { %v1808_v34 = vadd.f32 %v1776_v33, %v1408_v44  ;;  %v1807_v47 = vadd.f32 %v1775_v21, %v1407_v29  ;;  %549 = vbcast.lane.b32.xlu0 %v4789_v1, 264  ;;  %545 = vbcast.lane.b32.xlu1 %v4789_v1, 256  ;;  %v3384_v33 = vld [vmem:[#allocation2 + $0x70] sm:$0xff]   ;;  %v4794_v21 = vld [vmem:[#allocation20_spill] sm:$0xff] }
 0x224   : > { %v1853_v26 = vpack.c.bf16 %v1808_v34, %v1807_v47  ;;  %v336_v28 = vpop.permute.xlu0 %335  ;;  %v332_v45 = vpop.permute.xlu1 %331 }
 0x225   : > { %vm458_vm12 = vcmp.eq.s32.totalorder %v336_v28, %v4053_v51  ;;  %vm457_vm13 = vcmp.eq.s32.totalorder %v332_v45, %v4053_v51 }
 0x226   : > { %917 = vbcast.lane.b32.xlu0 %v4790_v14, 264  ;;  %913 = vbcast.lane.b32.xlu1 %v4790_v14, 256 }
 0x227   : > { %3146 = vmatmul.mubr.msk.bf16.gmra.mrb[40].mxu1 %vm1879_vm4, %v1853_v26 }
 0x228   : > { %v704_v22 = vpop.permute.xlu0 %703  ;;  %v700_v31 = vpop.permute.xlu1 %699  ;;  %2243 = vmatprep.mubr.bf16.mxu1 %v4767_v20 }
 0x229   : > { %vm826_vm14 = vcmp.eq.s32.totalorder %v704_v22, %v4053_v51  ;;  %vm825_vm15 = vcmp.eq.s32.totalorder %v700_v31, %v4053_v51  ;;  %v3386_v22 = vld [vmem:[#allocation2 + $0x78] sm:$0xff]  }
 0x22a   : > { %1317 = vbcast.lane.b32.xlu0 %v4791_v30, 264  ;;  %1313 = vbcast.lane.b32.xlu1 %v4791_v30, 256 }
 0x22c   : > { %v1104_v19 = vpop.permute.xlu0 %1103  ;;  %v1100_v53 = vpop.permute.xlu1 %1099 }
 0x22d   : > { %vm1226_vm0 = vcmp.eq.s32.totalorder %v1104_v19, %v4053_v51  ;;  %vm1225_vm1 = vcmp.eq.s32.totalorder %v1100_v53, %v4053_v51  ;;  %v4795_v19 = vld [vmem:[#allocation21_spill] sm:$0xff] }
 0x22e   : > { %1685 = vbcast.lane.b32.xlu0 %v4792_v58, 264  ;;  %1681 = vbcast.lane.b32.xlu1 %v4792_v58, 256 }
 0x230   : > { %v1472_v15 = vpop.permute.xlu0 %1471  ;;  %v1468_v0 = vpop.permute.xlu1 %1467 }
 0x231   : > { %vm1594_vm2 = vcmp.eq.s32.totalorder %v1472_v15, %v4053_v51  ;;  %vm1593_vm3 = vcmp.eq.s32.totalorder %v1468_v0, %v4053_v51  ;;  %v3387_v0 = vld [vmem:[#allocation2 + $0x38] sm:$0xff]  }
 0x232   : > { %373 = vbcast.lane.b32.xlu0 %v4785_v24, 280  ;;  %369 = vbcast.lane.b32.xlu1 %v4785_v24, 272  ;;  %v3375_v24 = vld [vmem:[#allocation2 + $0x8] sm:$0xff]  }
 0x233   : > { %3185 = vmatpush3.bf16.msra.mxu0 %v3375_v24 }
 0x234   : > { %v520_v41 = vpop.permute.xlu0 %519  ;;  %v516_v55 = vpop.permute.xlu1 %515  ;;  %3186 = vmatprep.subr.bf16.mxu0 %v3376_v63 }
 0x235   : > { %v642_v35 = vsel %vm458_vm12, %v520_v41, 0.0  ;;  %v641_v57 = vsel %vm457_vm13, %v516_v55, 0.0  ;;  %v4796_v41 = vld [vmem:[#allocation22_spill] sm:$0xff] }
 0x236   : > { %741 = vbcast.lane.b32.xlu0 %v4786_v59, 280  ;;  %737 = vbcast.lane.b32.xlu1 %v4786_v59, 272 }
 0x237   : > { %3187 = vmatpush3.bf16.msra.mxu0 %v3377_v43 }
 0x238   : > { %v888_v6 = vpop.permute.xlu0 %887  ;;  %v884_v42 = vpop.permute.xlu1 %883  ;;  %3188 = vmatprep.subr.bf16.mxu0 %v3378_v11  ;;  %v4799_v11 = vld [vmem:[#allocation25_spill] sm:$0xff] }
 0x239   : > { %v1010_v62 = vsel %vm826_vm14, %v888_v6, 0.0  ;;  %v1009_v16 = vsel %vm825_vm15, %v884_v42, 0.0 }
 0x23a   : > { %v1042_v32 = vadd.f32 %v1010_v62, %v642_v35  ;;  %v1041_v17 = vadd.f32 %v1009_v16, %v641_v57  ;;  %1141 = vbcast.lane.b32.xlu0 %v4787_v23, 280  ;;  %1137 = vbcast.lane.b32.xlu1 %v4787_v23, 272 }
 0x23b   : > { %3189 = vmatpush3.bf16.msra.mxu0 %v3379_v3 }
 0x23c   : > { %v1838_v7 = vpack.c.bf16 %v1042_v32, %v1041_v17  ;;  %v1288_v8 = vpop.permute.xlu0 %1287  ;;  %v1284_v27 = vpop.permute.xlu1 %1283  ;;  %3190 = vmatprep.subr.bf16.mxu0 %v3380_v13  ;;  %v4800_v13 = vld [vmem:[#allocation26_spill] sm:$0xff] }
 0x23d   : > { %v1410_v5 = vsel %vm1226_vm0, %v1288_v8, 0.0  ;;  %v1409_v52 = vsel %vm1225_vm1, %v1284_v27, 0.0 }
 0x23e   : > { %1509 = vbcast.lane.b32.xlu0 %v4788_v49, 280  ;;  %1505 = vbcast.lane.b32.xlu1 %v4788_v49, 272 }
 0x23f   : > { %3129 = vmatmul.mubr.msk.bf16.gmra.mrb[12].mxu0 %vm1879_vm4, %v1838_v7 }
 0x240   : > { %v1656_v9 = vpop.permute.xlu0 %1655  ;;  %v1652_v54 = vpop.permute.xlu1 %1651  ;;  %2000 = vmatprep.mubr.bf16.mxu0 %v4767_v20  ;;  %3191 = vmatpush3.bf16.msra.mxu0 %v3381_v12 }
 0x241   : > { %v1778_v61 = vsel %vm1594_vm2, %v1656_v9, 0.0  ;;  %v1777_v60 = vsel %vm1593_vm3, %v1652_v54, 0.0  ;;  %3192 = vmatprep.subr.bf16.mxu0 %v3382_v4 }
 0x242   : > { %v1810_v18 = vadd.f32 %v1778_v61, %v1410_v5  ;;  %v1809_v10 = vadd.f32 %v1777_v60, %v1409_v52  ;;  %557 = vbcast.lane.b32.xlu0 %v4789_v1, 280  ;;  %553 = vbcast.lane.b32.xlu1 %v4789_v1, 272  ;;  %v3385_v1 = vld [vmem:[#allocation2 + $0x30] sm:$0xff]   ;;  %v4797_v5 = vld [vmem:[#allocation23_spill] sm:$0xff]  ;;  %v4798_v60 = vld [vmem:[#allocation24_spill] sm:$0xff] }
 0x244   : > { %v1854_v25 = vpack.c.bf16 %v1810_v18, %v1809_v10  ;;  %v347_v50 = vpop.permute.xlu0 %346  ;;  %v343_v59 = vpop.permute.xlu1 %342  ;;  %3193 = vmatpush3.bf16.msra.mxu0 %v3383_v46 }
 0x245   : > { %3194 = vmatprep.subr.bf16.mxu0 %v3384_v33  ;;  %vm460_vm5 = vcmp.eq.s32.totalorder %v347_v50, %v4053_v51  ;;  %vm459_vm6 = vcmp.eq.s32.totalorder %v343_v59, %v4053_v51 }
 0x246   : > { %925 = vbcast.lane.b32.xlu0 %v4790_v14, 280  ;;  %921 = vbcast.lane.b32.xlu1 %v4790_v14, 272 }
 0x247   : > { %3147 = vmatmul.mubr.msk.bf16.gmra.mrb[44].mxu1 %vm1879_vm4, %v1854_v25 }
 0x248   : > { %v715_v38 = vpop.permute.xlu0 %714  ;;  %v711_v48 = vpop.permute.xlu1 %710  ;;  %2253 = vmatprep.mubr.bf16.mxu1 %v4767_v20  ;;  %3195 = vmatpush3.bf16.msra.mxu0 %v3385_v1 }
 0x249   : > { %vm828_vm7 = vcmp.eq.s32.totalorder %v715_v38, %v4053_v51  ;;  %vm827_vm8 = vcmp.eq.s32.totalorder %v711_v48, %v4053_v51  ;;  %3196 = vmatprep.subr.bf16.mxu0 %v3386_v22 }
 0x24a   : > { %1325 = vbcast.lane.b32.xlu0 %v4791_v30, 280  ;;  %1321 = vbcast.lane.b32.xlu1 %v4791_v30, 272 }
 0x24c   : > { %v1115_v36 = vpop.permute.xlu0 %1114  ;;  %v1111_v23 = vpop.permute.xlu1 %1110  ;;  %3197 = vmatpush3.bf16.msra.mxu0 %v3387_v0 }
 0x24d   : > { %vm1228_vm9 = vcmp.eq.s32.totalorder %v1115_v36, %v4053_v51  ;;  %vm1227_vm10 = vcmp.eq.s32.totalorder %v1111_v23, %v4053_v51 }
 0x24e   : > { %1693 = vbcast.lane.b32.xlu0 %v4792_v58, 280  ;;  %1689 = vbcast.lane.b32.xlu1 %v4792_v58, 272 }
 0x250   : > { %v1483_v37 = vpop.permute.xlu0 %1482  ;;  %v1479_v49 = vpop.permute.xlu1 %1478 }
 0x251   : > { %vm1596_vm11 = vcmp.eq.s32.totalorder %v1483_v37, %v4053_v51  ;;  %vm1595_vm12 = vcmp.eq.s32.totalorder %v1479_v49, %v4053_v51 }
 0x252   : > { %1152 = vbcast.lane.b32.xlu0 %v4793_v2, 264  ;;  %1148 = vbcast.lane.b32.xlu1 %v4793_v2, 256 }
 0x254   : > { %v531_v44 = vpop.permute.xlu0 %530  ;;  %v527_v29 = vpop.permute.xlu1 %526 }
 0x255   : > { %v644_v26 = vsel %vm460_vm5, %v531_v44, 0.0  ;;  %v643_v28 = vsel %vm459_vm6, %v527_v29, 0.0 }
 0x256   : > { %1520 = vbcast.lane.b32.xlu0 %v4794_v21, 264  ;;  %1516 = vbcast.lane.b32.xlu1 %v4794_v21, 256 }
 0x258   : > { %v899_v34 = vpop.permute.xlu0 %898  ;;  %v895_v47 = vpop.permute.xlu1 %894 }
 0x259   : > { %v1012_v45 = vsel %vm828_vm7, %v899_v34, 0.0  ;;  %v1011_v14 = vsel %vm827_vm8, %v895_v47, 0.0 }
 0x25a   : > { %v1044_v31 = vadd.f32 %v1012_v45, %v644_v26  ;;  %v1043_v30 = vadd.f32 %v1011_v14, %v643_v28  ;;  %1336 = vbcast.lane.b32.xlu0 %v4795_v19, 264  ;;  %1332 = vbcast.lane.b32.xlu1 %v4795_v19, 256  ;;  %v4801_v45 = vld [vmem:[#allocation27_spill] sm:$0xff] }
 0x25c   : > { %v1839_v53 = vpack.c.bf16 %v1044_v31, %v1043_v30  ;;  %v1299_v58 = vpop.permute.xlu0 %1298  ;;  %v1295_v15 = vpop.permute.xlu1 %1294 }
 0x25d   : > { %v1412_v42 = vsel %vm1228_vm9, %v1299_v58, 0.0  ;;  %v1411_v35 = vsel %vm1227_vm10, %v1295_v15, 0.0  ;;  %v4802_v58 = vld [vmem:[#allocation28_spill] sm:$0xff] }
 0x25e   : > { %1704 = vbcast.lane.b32.xlu0 %v4796_v41, 264  ;;  %1700 = vbcast.lane.b32.xlu1 %v4796_v41, 256 }
 0x25f   : > { %3130 = vmatmul.mubr.msk.bf16.gmra.mrb[16].mxu0 %vm1879_vm4, %v1839_v53 }
 0x260   : > { %v1667_v55 = vpop.permute.xlu0 %1666  ;;  %v1663_v6 = vpop.permute.xlu1 %1662  ;;  %2010 = vmatprep.mubr.bf16.mxu0 %v4767_v20 }
 0x261   : > { %v1780_v57 = vsel %vm1596_vm11, %v1667_v55, 0.0  ;;  %v1779_v62 = vsel %vm1595_vm12, %v1663_v6, 0.0 }
 0x262   : > { %v1812_v16 = vadd.f32 %v1780_v57, %v1412_v42  ;;  %v1811_v32 = vadd.f32 %v1779_v62, %v1411_v35  ;;  %1160 = vbcast.lane.b32.xlu0 %v4793_v2, 280  ;;  %1156 = vbcast.lane.b32.xlu1 %v4793_v2, 272  ;;  %v4803_v57 = vld [vmem:[#allocation29_spill] sm:$0xff] }
 0x264   : > { %v1855_v17 = vpack.c.bf16 %v1812_v16, %v1811_v32  ;;  %v355_v7 = vpop.permute.xlu0 %354  ;;  %v351_v8 = vpop.permute.xlu1 %350 }
 0x265   : > { %vm462_vm13 = vcmp.eq.s32.totalorder %v355_v7, %v4053_v51  ;;  %vm461_vm14 = vcmp.eq.s32.totalorder %v351_v8, %v4053_v51 }
 0x266   : > { %1528 = vbcast.lane.b32.xlu0 %v4794_v21, 280  ;;  %1524 = vbcast.lane.b32.xlu1 %v4794_v21, 272 }
 0x267   : > { %3148 = vmatmul.mubr.msk.bf16.gmra.mrb[48].mxu1 %vm1879_vm4, %v1855_v17 }
 0x268   : > { %v723_v27 = vpop.permute.xlu0 %722  ;;  %v719_v40 = vpop.permute.xlu1 %718  ;;  %2263 = vmatprep.mubr.bf16.mxu1 %v4767_v20 }
 0x269   : > { %vm830_vm15 = vcmp.eq.s32.totalorder %v723_v27, %v4053_v51  ;;  %vm829_vm0 = vcmp.eq.s32.totalorder %v719_v40, %v4053_v51 }
 0x26a   : > { %1344 = vbcast.lane.b32.xlu0 %v4795_v19, 280  ;;  %1340 = vbcast.lane.b32.xlu1 %v4795_v19, 272 }
 0x26c   : > { %v1123_v56 = vpop.permute.xlu0 %1122  ;;  %v1119_v39 = vpop.permute.xlu1 %1118 }
 0x26d   : > { %vm1230_vm1 = vcmp.eq.s32.totalorder %v1123_v56, %v4053_v51  ;;  %vm1229_vm2 = vcmp.eq.s32.totalorder %v1119_v39, %v4053_v51  ;;  %v4804_v56 = vld [vmem:[#allocation30_spill] sm:$0xff] }
 0x26e   : > { %1712 = vbcast.lane.b32.xlu0 %v4796_v41, 280  ;;  %1708 = vbcast.lane.b32.xlu1 %v4796_v41, 272 }
 0x270   : > { %v1491_v9 = vpop.permute.xlu0 %1490  ;;  %v1487_v54 = vpop.permute.xlu1 %1486 }
 0x271   : > { %vm1598_vm3 = vcmp.eq.s32.totalorder %v1491_v9, %v4053_v51  ;;  %vm1597_vm5 = vcmp.eq.s32.totalorder %v1487_v54, %v4053_v51 }
 0x272   : > { %1171 = vbcast.lane.b32.xlu0 %v4797_v5, 264  ;;  %1167 = vbcast.lane.b32.xlu1 %v4797_v5, 256 }
 0x274   : > { %v539_v52 = vpop.permute.xlu0 %538  ;;  %v535_v61 = vpop.permute.xlu1 %534 }
 0x275   : > { %v646_v24 = vsel %vm462_vm13, %v539_v52, 0.0  ;;  %v645_v25 = vsel %vm461_vm14, %v535_v61, 0.0 }
 0x276   : > { %1539 = vbcast.lane.b32.xlu0 %v4798_v60, 264  ;;  %1535 = vbcast.lane.b32.xlu1 %v4798_v60, 256 }
 0x278   : > { %v907_v18 = vpop.permute.xlu0 %906  ;;  %v903_v10 = vpop.permute.xlu1 %902 }
 0x279   : > { %v1014_v50 = vsel %vm830_vm15, %v907_v18, 0.0  ;;  %v1013_v59 = vsel %vm829_vm0, %v903_v10, 0.0 }
 0x27a   : > { %v1046_v63 = vadd.f32 %v1014_v50, %v646_v24  ;;  %v1045_v43 = vadd.f32 %v1013_v59, %v645_v25  ;;  %1355 = vbcast.lane.b32.xlu0 %v4799_v11, 264  ;;  %1351 = vbcast.lane.b32.xlu1 %v4799_v11, 256 }
 0x27c   : > { %v1840_v38 = vpack.c.bf16 %v1046_v63, %v1045_v43  ;;  %v1307_v48 = vpop.permute.xlu0 %1306  ;;  %v1303_v3 = vpop.permute.xlu1 %1302 }
 0x27d   : > { %v1414_v12 = vsel %vm1230_vm1, %v1307_v48, 0.0  ;;  %v1413_v4 = vsel %vm1229_vm2, %v1303_v3, 0.0 }
 0x27e   : > { %1723 = vbcast.lane.b32.xlu0 %v4800_v13, 264  ;;  %1719 = vbcast.lane.b32.xlu1 %v4800_v13, 256 }
 0x27f   : > { %3131 = vmatmul.mubr.msk.bf16.gmra.mrb[20].mxu0 %vm1879_vm4, %v1840_v38 }
 0x280   : > { %v1675_v36 = vpop.permute.xlu0 %1674  ;;  %v1671_v23 = vpop.permute.xlu1 %1670  ;;  %2020 = vmatprep.mubr.bf16.mxu0 %v4767_v20 }
 0x281   : > { %v1782_v37 = vsel %vm1598_vm3, %v1675_v36, 0.0  ;;  %v1781_v49 = vsel %vm1597_vm5, %v1671_v23, 0.0 }
 0x282   : > { %v1814_v2 = vadd.f32 %v1782_v37, %v1414_v12  ;;  %v1813_v46 = vadd.f32 %v1781_v49, %v1413_v4  ;;  %1179 = vbcast.lane.b32.xlu0 %v4797_v5, 280  ;;  %1175 = vbcast.lane.b32.xlu1 %v4797_v5, 272  ;;  %v4805_v49 = vld [vmem:[#allocation31_spill] sm:$0xff] }
 0x284   : > { %v1856_v44 = vpack.c.bf16 %v1814_v2, %v1813_v46  ;;  %v366_v29 = vpop.permute.xlu0 %365  ;;  %v362_v33 = vpop.permute.xlu1 %361 }
 0x285   : > { %vm464_vm6 = vcmp.eq.s32.totalorder %v366_v29, %v4053_v51  ;;  %vm463_vm8 = vcmp.eq.s32.totalorder %v362_v33, %v4053_v51 }
 0x286   : > { %1547 = vbcast.lane.b32.xlu0 %v4798_v60, 280  ;;  %1543 = vbcast.lane.b32.xlu1 %v4798_v60, 272 }
 0x287   : > { %3149 = vmatmul.mubr.msk.bf16.gmra.mrb[52].mxu1 %vm1879_vm4, %v1856_v44 }
 0x288   : > { %v734_v21 = vpop.permute.xlu0 %733  ;;  %v730_v34 = vpop.permute.xlu1 %729  ;;  %2273 = vmatprep.mubr.bf16.mxu1 %v4767_v20 }
 0x289   : > { %vm832_vm7 = vcmp.eq.s32.totalorder %v734_v21, %v4053_v51  ;;  %vm831_vm9 = vcmp.eq.s32.totalorder %v730_v34, %v4053_v51 }
 0x28a   : > { %1363 = vbcast.lane.b32.xlu0 %v4799_v11, 280  ;;  %1359 = vbcast.lane.b32.xlu1 %v4799_v11, 272 }
 0x28c   : > { %v1134_v47 = vpop.permute.xlu0 %1133  ;;  %v1130_v1 = vpop.permute.xlu1 %1129 }
 0x28d   : > { %vm1232_vm10 = vcmp.eq.s32.totalorder %v1134_v47, %v4053_v51  ;;  %vm1231_vm12 = vcmp.eq.s32.totalorder %v1130_v1, %v4053_v51 }
 0x28e   : > { %1731 = vbcast.lane.b32.xlu0 %v4800_v13, 280  ;;  %1727 = vbcast.lane.b32.xlu1 %v4800_v13, 272 }
 0x290   : > { %v1502_v26 = vpop.permute.xlu0 %1501  ;;  %v1498_v28 = vpop.permute.xlu1 %1497 }
 0x291   : > { %vm1600_vm11 = vcmp.eq.s32.totalorder %v1502_v26, %v4053_v51  ;;  %vm1599_vm13 = vcmp.eq.s32.totalorder %v1498_v28, %v4053_v51  ;;  %v4806_v28 = vld [vmem:[#allocation32_spill] sm:$0xff] }
 0x292   : > { %1190 = vbcast.lane.b32.xlu0 %v4801_v45, 264  ;;  %v4381_v14 = vpop.f32.mrb[0].mxu1  ;;  %1186 = vbcast.lane.b32.xlu1 %v4801_v45, 256 }
 0x293   : > { %v4384_v22 = vpop.f32.mrb[1].mxu1 }
 0x294   : > { %v550_v31 = vpop.permute.xlu0 %549  ;;  %v4386_v30 = vpop.f32.mrb[2].mxu1 }
 0x295   : > { %v546_v19 = vpop.permute.xlu1 %545  ;;  %v4388_v53 = vpop.f32.mrb[3].mxu1  ;;  %v648_v0 = vsel %vm464_vm6, %v550_v31, 0.0 }
 0x296   : > { %1558 = vbcast.lane.b32.xlu0 %v4802_v58, 264  ;;  %1554 = vbcast.lane.b32.xlu1 %v4802_v58, 256  ;;  %v647_v6 = vsel %vm463_vm8, %v546_v19, 0.0 }
 0x298   : > { %v918_v15 = vpop.permute.xlu0 %917 }
 0x299   : > { %v1016_v41 = vsel %vm832_vm7, %v918_v15, 0.0  ;;  %v914_v55 = vpop.permute.xlu1 %913 }
 0x29a   : > { %v1048_v42 = vadd.f32 %v1016_v41, %v648_v0  ;;  %v1015_v35 = vsel %vm831_vm9, %v914_v55, 0.0  ;;  %1374 = vbcast.lane.b32.xlu0 %v4803_v57, 264  ;;  %v4397_v62 = vpop.f32.mrb[4].mxu1  ;;  %1370 = vbcast.lane.b32.xlu1 %v4803_v57, 256  ;;  %v4807_v55 = vld [vmem:[#allocation33_spill] sm:$0xff] }
 0x29b   : > { %v1047_v16 = vadd.f32 %v1015_v35, %v647_v6  ;;  %v4400_v32 = vpop.f32.mrb[5].mxu1 }
 0x29c   : > { %v1318_v17 = vpop.permute.xlu0 %1317  ;;  %v4402_v7 = vpop.f32.mrb[6].mxu1 }
 0x29d   : > { %v1841_v8 = vpack.c.bf16 %v1048_v42, %v1047_v16  ;;  %v1314_v27 = vpop.permute.xlu1 %1313  ;;  %v4404_v40 = vpop.f32.mrb[7].mxu1  ;;  %v1416_v9 = vsel %vm1232_vm10, %v1318_v17, 0.0 }
 0x29e   : > { %1742 = vbcast.lane.b32.xlu0 %v4804_v56, 264  ;;  %1738 = vbcast.lane.b32.xlu1 %v4804_v56, 256  ;;  %v1415_v52 = vsel %vm1231_vm12, %v1314_v27, 0.0 }
 0x29f   : > { %3132 = vmatmul.mubr.msk.bf16.gmra.mrb[24].mxu0 %vm1879_vm4, %v1841_v8 }
 0x2a0   : > { %v1686_v39 = vpop.permute.xlu0 %1685  ;;  %2030 = vmatprep.mubr.bf16.mxu0 %v4767_v20 }
 0x2a1   : > { %v1784_v54 = vsel %vm1600_vm11, %v1686_v39, 0.0  ;;  %v1682_v5 = vpop.permute.xlu1 %1681 }
 0x2a2   : > { %v1816_v61 = vadd.f32 %v1784_v54, %v1416_v9  ;;  %v1783_v60 = vsel %vm1599_vm13, %v1682_v5, 0.0  ;;  %1198 = vbcast.lane.b32.xlu0 %v4801_v45, 280  ;;  %v4415_v18 = vpop.f32.mrb[8].mxu1  ;;  %1194 = vbcast.lane.b32.xlu1 %v4801_v45, 272 }
 0x2a3   : > { %v1815_v10 = vadd.f32 %v1783_v60, %v1415_v52  ;;  %v4418_v24 = vpop.f32.mrb[9].mxu1 }
 0x2a4   : > { %v374_v25 = vpop.permute.xlu0 %373  ;;  %v4420_v50 = vpop.f32.mrb[10].mxu1 }
 0x2a5   : > { %v1857_v59 = vpack.c.bf16 %v1816_v61, %v1815_v10  ;;  %v370_v63 = vpop.permute.xlu1 %369  ;;  %v4422_v43 = vpop.f32.mrb[11].mxu1  ;;  %vm466_vm14 = vcmp.eq.s32.totalorder %v374_v25, %v4053_v51 }
 0x2a6   : > { %1566 = vbcast.lane.b32.xlu0 %v4802_v58, 280  ;;  %1562 = vbcast.lane.b32.xlu1 %v4802_v58, 272  ;;  %vm465_vm0 = vcmp.eq.s32.totalorder %v370_v63, %v4053_v51 }
 0x2a7   : > { %3150 = vmatmul.mubr.msk.bf16.gmra.mrb[56].mxu1 %vm1879_vm4, %v1857_v59 }
 0x2a8   : > { %v742_v11 = vpop.permute.xlu0 %741  ;;  %2283 = vmatprep.mubr.bf16.mxu1 %v4767_v20 }
 0x2a9   : > { %v738_v38 = vpop.permute.xlu1 %737  ;;  %vm834_vm15 = vcmp.eq.s32.totalorder %v742_v11, %v4053_v51 }
 0x2aa   : > { %1382 = vbcast.lane.b32.xlu0 %v4803_v57, 280  ;;  %v4429_v48 = vpop.f32.mrb[12].mxu1  ;;  %1378 = vbcast.lane.b32.xlu1 %v4803_v57, 272  ;;  %vm833_vm1 = vcmp.eq.s32.totalorder %v738_v38, %v4053_v51 }
 0x2ab   : > { %v4432_v3 = vpop.f32.mrb[13].mxu1 }
 0x2ac   : > { %v1142_v13 = vpop.permute.xlu0 %1141  ;;  %v4434_v36 = vpop.f32.mrb[14].mxu1 }
 0x2ad   : > { %v1138_v23 = vpop.permute.xlu1 %1137  ;;  %v4436_v12 = vpop.f32.mrb[15].mxu1  ;;  %vm1234_vm2 = vcmp.eq.s32.totalorder %v1142_v13, %v4053_v51 }
 0x2ae   : > { %1750 = vbcast.lane.b32.xlu0 %v4804_v56, 280  ;;  %1746 = vbcast.lane.b32.xlu1 %v4804_v56, 272  ;;  %v4808_v56 = vld [vmem:[#allocation34_spill] sm:$0xff]  ;;  %vm1233_vm5 = vcmp.eq.s32.totalorder %v1138_v23, %v4053_v51 }
 0x2b0   : > { %v1510_v4 = vpop.permute.xlu0 %1509 }
 0x2b1   : > { %v1506_v37 = vpop.permute.xlu1 %1505  ;;  %vm1602_vm3 = vcmp.eq.s32.totalorder %v1510_v4, %v4053_v51 }
 0x2b2   : > { %1209 = vbcast.lane.b32.xlu0 %v4805_v49, 264  ;;  %v4441_v2 = vpop.f32.mrb[0].mxu0  ;;  %v4443_v46 = vpop.f32.mrb[16].mxu1  ;;  %1205 = vbcast.lane.b32.xlu1 %v4805_v49, 256  ;;  %vm1601_vm6 = vcmp.eq.s32.totalorder %v1506_v37, %v4053_v51 }
 0x2b3   : > { %v4446_v44 = vpop.f32.mrb[1].mxu0  ;;  %v4448_v29 = vpop.f32.mrb[17].mxu1 }
 0x2b4   : > { %v558_v33 = vpop.permute.xlu0 %557  ;;  %v4450_v21 = vpop.f32.mrb[2].mxu0 }
 0x2b5   : > { %v4452_v34 = vpop.f32.mrb[18].mxu1  ;;  %v554_v47 = vpop.permute.xlu1 %553  ;;  %v650_v31 = vsel %vm466_vm14, %v558_v33, 0.0 }
 0x2b6   : > { %v4454_v1 = vpop.f32.mrb[3].mxu0  ;;  %v4456_v26 = vpop.f32.mrb[19].mxu1  ;;  %1577 = vbcast.lane.b32.xlu0 %v4806_v28, 264  ;;  %1573 = vbcast.lane.b32.xlu1 %v4806_v28, 256  ;;  %v649_v15 = vsel %vm465_vm0, %v554_v47, 0.0 }
 0x2b8   : > { %v926_v45 = vpop.permute.xlu0 %925 }
 0x2b9   : > { %v1018_v19 = vsel %vm834_vm15, %v926_v45, 0.0  ;;  %v922_v58 = vpop.permute.xlu1 %921 }
 0x2ba   : > { %v1050_v0 = vadd.f32 %v1018_v19, %v650_v31  ;;  %v1017_v41 = vsel %vm833_vm1, %v922_v58, 0.0  ;;  %1393 = vbcast.lane.b32.xlu0 %v4807_v55, 264  ;;  %v4465_v6 = vpop.f32.mrb[20].mxu1  ;;  %1389 = vbcast.lane.b32.xlu1 %v4807_v55, 256 }
 0x2bb   : > { %v1049_v42 = vadd.f32 %v1017_v41, %v649_v15  ;;  %v4468_v35 = vpop.f32.mrb[21].mxu1 }
 0x2bc   : > { %v1326_v57 = vpop.permute.xlu0 %1325  ;;  %v4470_v16 = vpop.f32.mrb[22].mxu1 }
 0x2bd   : > { %v1842_v17 = vpack.c.bf16 %v1050_v0, %v1049_v42  ;;  %v1322_v8 = vpop.permute.xlu1 %1321  ;;  %v4472_v27 = vpop.f32.mrb[23].mxu1  ;;  %v1418_v9 = vsel %vm1234_vm2, %v1326_v57, 0.0 }
 0x2be   : > { %1761 = vbcast.lane.b32.xlu0 %v4808_v56, 264  ;;  %1757 = vbcast.lane.b32.xlu1 %v4808_v56, 256  ;;  %v1417_v52 = vsel %vm1233_vm5, %v1322_v8, 0.0 }
 0x2bf   : > { %3133 = vmatmul.mubr.msk.bf16.gmra.mrb[28].mxu0 %vm1879_vm4, %v1842_v17 }
 0x2c0   : > { %v1694_v39 = vpop.permute.xlu0 %1693 }
 0x2c1   : > { %v1786_v54 = vsel %vm1602_vm3, %v1694_v39, 0.0  ;;  %v1690_v5 = vpop.permute.xlu1 %1689 }
 0x2c2   : > { %v1818_v61 = vadd.f32 %v1786_v54, %v1418_v9  ;;  %v1785_v60 = vsel %vm1601_vm6, %v1690_v5, 0.0  ;;  %1217 = vbcast.lane.b32.xlu0 %v4805_v49, 280  ;;  %v4482_v10 = vpop.f32.mrb[24].mxu1  ;;  %1213 = vbcast.lane.b32.xlu1 %v4805_v49, 272 }
 0x2c3   : > { %v1817_v25 = vadd.f32 %v1785_v60, %v1417_v52  ;;  %v4485_v59 = vpop.f32.mrb[25].mxu1 }
 0x2c4   : > { %v1153_v63 = vpop.permute.xlu0 %1152  ;;  %v4487_v11 = vpop.f32.mrb[26].mxu1 }
 0x2c5   : > { %v1858_v38 = vpack.c.bf16 %v1818_v61, %v1817_v25  ;;  %v1149_v13 = vpop.permute.xlu1 %1148  ;;  %v4489_v23 = vpop.f32.mrb[27].mxu1  ;;  %vm1236_vm7 = vcmp.eq.s32.totalorder %v1153_v63, %v4053_v51 }
 0x2c6   : > { %1585 = vbcast.lane.b32.xlu0 %v4806_v28, 280  ;;  %1581 = vbcast.lane.b32.xlu1 %v4806_v28, 272  ;;  %vm1235_vm9 = vcmp.eq.s32.totalorder %v1149_v13, %v4053_v51 }
 0x2c7   : > { %3151 = vmatmul.mubr.msk.bf16.gmra.mrb[60].mxu1 %vm1879_vm4, %v1858_v38 }
 0x2c8   : > { %v1521_v4 = vpop.permute.xlu0 %1520  ;;  %2293 = vmatprep.mubr.bf16.mxu1 %v4767_v20 }
 0x2c9   : > { %v1517_v37 = vpop.permute.xlu1 %1516  ;;  %vm1604_vm8 = vcmp.eq.s32.totalorder %v1521_v4, %v4053_v51 }
 0x2ca   : > { %1401 = vbcast.lane.b32.xlu0 %v4807_v55, 280  ;;  %v4496_v49 = vpop.f32.mrb[28].mxu1  ;;  %1397 = vbcast.lane.b32.xlu1 %v4807_v55, 272  ;;  %vm1603_vm10 = vcmp.eq.s32.totalorder %v1517_v37, %v4053_v51 }
 0x2cb   : > { %v4499_v33 = vpop.f32.mrb[29].mxu1 }
 0x2cc   : > { %v1337_v47 = vpop.permute.xlu0 %1336  ;;  %v4501_v45 = vpop.f32.mrb[30].mxu1 }
 0x2cd   : > { %v1333_v31 = vpop.permute.xlu1 %1332  ;;  %v4503_v19 = vpop.f32.mrb[31].mxu1  ;;  %v1420_v58 = vsel %vm1236_vm7, %v1337_v47, 0.0 }
 0x2ce   : > { %1769 = vbcast.lane.b32.xlu0 %v4808_v56, 280  ;;  %1765 = vbcast.lane.b32.xlu1 %v4808_v56, 272  ;;  %v1419_v41 = vsel %vm1235_vm9, %v1333_v31, 0.0 }
 0x2d0   : > { %v1705_v28 = vpop.permute.xlu0 %1704 }
 0x2d1   : > { %v1788_v15 = vsel %vm1604_vm8, %v1705_v28, 0.0  ;;  %v1701_v0 = vpop.permute.xlu1 %1700 }
 0x2d2   : > { %v1820_v55 = vadd.f32 %v1788_v15, %v1420_v58  ;;  %v1787_v42 = vsel %vm1603_vm10, %v1701_v0, 0.0  ;;  %v1972_v57 = vpop.f32.mrb[4].mxu0  ;;  %v2215_v17 = vpop.f32.mrb[32].mxu1 }
 0x2d3   : > { %v1819_v8 = vadd.f32 %v1787_v42, %v1419_v41  ;;  %v1974_v39 = vpop.f32.mrb[5].mxu0  ;;  %v2374_v56 = vmul.f32 %v2215_v17, %v4441_v2  ;;  %v2217_v9 = vpop.f32.mrb[33].mxu1 }
 0x2d4   : > { %v1976_v54 = vpop.f32.mrb[6].mxu0  ;;  %v2375_v5 = vmul.f32 %v2217_v9, %v4446_v44  ;;  %v1161_v52 = vpop.permute.xlu0 %1160 }
 0x2d5   : > { %v1859_v61 = vpack.c.bf16 %v1820_v55, %v1819_v8  ;;  %v1978_v60 = vpop.f32.mrb[7].mxu0  ;;  %v2219_v25 = vpop.f32.mrb[34].mxu1  ;;  %vm1238_vm11 = vcmp.eq.s32.totalorder %v1161_v52, %v4053_v51 }
 0x2d6   : > { %v2376_v63 = vmul.f32 %v2219_v25, %v4450_v21  ;;  %v1157_v38 = vpop.permute.xlu1 %1156  ;;  %v2221_v13 = vpop.f32.mrb[35].mxu1 }
 0x2d7   : > { %v2377_v4 = vmul.f32 %v2221_v13, %v4454_v1  ;;  %3152 = vmatmul.mubr.msk.bf16.gmra.mrb[64].mxu1 %vm1879_vm4, %v1859_v61  ;;  %vm1237_vm13 = vcmp.eq.s32.totalorder %v1157_v38, %v4053_v51 }
 0x2d8   : > { %v2438_v37 = vpack.c.bf16 %v2376_v63, %v2374_v56  ;;  %v1529_v47 = vpop.permute.xlu0 %1528  ;;  %2303 = vmatprep.mubr.bf16.mxu1 %v4767_v20 }
 0x2d9   : > { %v2439_v2 = vpack.c.bf16 %v2377_v4, %v2375_v5  ;;  %vm1606_vm12 = vcmp.eq.s32.totalorder %v1529_v47, %v4053_v51 }
 0x2da   : > { %v1525_v31 = vpop.permute.xlu1 %1524  ;;  %v2225_v28 = vpop.f32.mrb[36].mxu1 }
 0x2db   : > { %v2378_v44 = vmul.f32 %v2225_v28, %v1972_v57  ;;  %2630 = vmatprep.mubr.bf16.mxu0 %v2439_v2  ;;  %v2227_v58 = vpop.f32.mrb[37].mxu1  ;;  %vm1605_vm14 = vcmp.eq.s32.totalorder %v1525_v31, %v4053_v51 }
 0x2dc   : > { %v2379_v15 = vmul.f32 %v2227_v58, %v1974_v39  ;;  %2631 = vmatmul.mubr.bf16.vlgmr.msra.gmra.mrb[32].mxu0 %v2438_v37  ;;  %v1345_v0 = vpop.permute.xlu0 %1344  ;;  %v2229_v21 = vpop.f32.mrb[38].mxu1 }
 0x2dd   : > { %v2380_v41 = vmul.f32 %v2229_v21, %v1976_v54  ;;  %v2231_v55 = vpop.f32.mrb[39].mxu1  ;;  %v1422_v9 = vsel %vm1238_vm11, %v1345_v0, 0.0 }
 0x2de   : > { %v1341_v42 = vpop.permute.xlu1 %1340  ;;  %v2381_v1 = vmul.f32 %v2231_v55, %v1978_v60 }
 0x2df   : > { %v2440_v17 = vpack.c.bf16 %v2380_v41, %v2378_v44  ;;  %v1421_v54 = vsel %vm1237_vm13, %v1341_v42, 0.0 }
 0x2e0   : > { %v2441_v8 = vpack.c.bf16 %v2381_v1, %v2379_v15  ;;  %v1713_v56 = vpop.permute.xlu0 %1712 }
 0x2e1   : > { %v1790_v5 = vsel %vm1606_vm12, %v1713_v56, 0.0 }
 0x2e2   : > { %v1822_v57 = vadd.f32 %v1790_v5, %v1422_v9  ;;  %v1709_v39 = vpop.permute.xlu1 %1708  ;;  %2638 = vmatprep.mubr.bf16.mxu0 %v2441_v8 }
 0x2e3   : > { %v1789_v61 = vsel %vm1605_vm14, %v1709_v39, 0.0 }
 0x2e4   : > { %v1821_v25 = vadd.f32 %v1789_v61, %v1421_v54  ;;  %2639 = vmatmul.mubr.bf16.gmra.mrb[36].mxu0 %v2440_v17  ;;  %v1172_v60 = vpop.permute.xlu0 %1171 }
 0x2e5   : > { %vm1240_vm15 = vcmp.eq.s32.totalorder %v1172_v60, %v4053_v51 }
 0x2e6   : > { %v1860_v63 = vpack.c.bf16 %v1822_v57, %v1821_v25  ;;  %v1168_v52 = vpop.permute.xlu1 %1167 }
 0x2e7   : > { %vm1239_vm1 = vcmp.eq.s32.totalorder %v1168_v52, %v4053_v51 }
 0x2e8   : > { %3153 = vmatmul.mubr.msk.bf16.gmra.mrb[68].mxu1 %vm1879_vm4, %v1860_v63  ;;  %v1540_v13 = vpop.permute.xlu0 %1539 }
 0x2e9   : > { %2313 = vmatprep.mubr.bf16.mxu1 %v4767_v20  ;;  %vm1608_vm0 = vcmp.eq.s32.totalorder %v1540_v13, %v4053_v51 }
 0x2ea   : > { %v1536_v4 = vpop.permute.xlu1 %1535 }
 0x2eb   : > { %vm1607_vm2 = vcmp.eq.s32.totalorder %v1536_v4, %v4053_v51 }
 0x2ec   : > { %v1356_v37 = vpop.permute.xlu0 %1355 }
 0x2ed   : > { %v1424_v2 = vsel %vm1240_vm15, %v1356_v37, 0.0 }
 0x2ee   : > { %v1352_v38 = vpop.permute.xlu1 %1351 }
 0x2ef   : > { %v1423_v15 = vsel %vm1239_vm1, %v1352_v38, 0.0 }
 0x2f0   : > { %v1724_v47 = vpop.permute.xlu0 %1723 }
 0x2f1   : > { %v1792_v31 = vsel %vm1608_vm0, %v1724_v47, 0.0 }
 0x2f2   : > { %v1824_v28 = vadd.f32 %v1792_v31, %v1424_v2  ;;  %v1720_v44 = vpop.permute.xlu1 %1719  ;;  %v1982_v58 = vpop.f32.mrb[8].mxu0 }
 0x2f3   : > { %v1791_v0 = vsel %vm1607_vm2, %v1720_v44, 0.0  ;;  %v1984_v21 = vpop.f32.mrb[9].mxu0 }
 0x2f4   : > { %v1823_v41 = vadd.f32 %v1791_v0, %v1423_v15  ;;  %v1986_v55 = vpop.f32.mrb[10].mxu0  ;;  %v1180_v42 = vpop.permute.xlu0 %1179 }
 0x2f5   : > { %v1988_v1 = vpop.f32.mrb[11].mxu0  ;;  %vm1242_vm3 = vcmp.eq.s32.totalorder %v1180_v42, %v4053_v51 }
 0x2f6   : > { %v1861_v17 = vpack.c.bf16 %v1824_v28, %v1823_v41  ;;  %v1176_v8 = vpop.permute.xlu1 %1175 }
 0x2f7   : > { %vm1241_vm6 = vcmp.eq.s32.totalorder %v1176_v8, %v4053_v51 }
 0x2f8   : > { %3154 = vmatmul.mubr.msk.bf16.gmra.mrb[72].mxu1 %vm1879_vm4, %v1861_v17  ;;  %v1548_v56 = vpop.permute.xlu0 %1547 }
 0x2f9   : > { %2323 = vmatprep.mubr.bf16.mxu1 %v4767_v20  ;;  %vm1610_vm5 = vcmp.eq.s32.totalorder %v1548_v56, %v4053_v51 }
 0x2fa   : > { %v1544_v9 = vpop.permute.xlu1 %1543  ;;  %v2235_v5 = vpop.f32.mrb[40].mxu1 }
 0x2fb   : > { %v2382_v57 = vmul.f32 %v2235_v5, %v1982_v58  ;;  %v2237_v39 = vpop.f32.mrb[41].mxu1  ;;  %vm1609_vm7 = vcmp.eq.s32.totalorder %v1544_v9, %v4053_v51 }
 0x2fc   : > { %v2383_v54 = vmul.f32 %v2237_v39, %v1984_v21  ;;  %v2239_v61 = vpop.f32.mrb[42].mxu1  ;;  %v1364_v25 = vpop.permute.xlu0 %1363 }
 0x2fd   : > { %v2384_v60 = vmul.f32 %v2239_v61, %v1986_v55  ;;  %v2241_v63 = vpop.f32.mrb[43].mxu1  ;;  %v1426_v47 = vsel %vm1242_vm3, %v1364_v25, 0.0 }
 0x2fe   : > { %v2385_v52 = vmul.f32 %v2241_v63, %v1988_v1  ;;  %v1360_v13 = vpop.permute.xlu1 %1359 }
 0x2ff   : > { %v2442_v4 = vpack.c.bf16 %v2384_v60, %v2382_v57  ;;  %v1425_v44 = vsel %vm1241_vm6, %v1360_v13, 0.0 }
 0x300   : > { %v2443_v37 = vpack.c.bf16 %v2385_v52, %v2383_v54  ;;  %v1732_v38 = vpop.permute.xlu0 %1731 }
 0x301   : > { %v1794_v2 = vsel %vm1610_vm5, %v1732_v38, 0.0 }
 0x302   : > { %v1826_v31 = vadd.f32 %v1794_v2, %v1426_v47  ;;  %v1728_v28 = vpop.permute.xlu1 %1727  ;;  %2646 = vmatprep.mubr.bf16.mxu0 %v2443_v37 }
 0x303   : > { %v1793_v58 = vsel %vm1609_vm7, %v1728_v28, 0.0  ;;  %2647 = vmatmul.mubr.bf16.gmra.mrb[40].mxu0 %v2442_v4 }
 0x304   : > { %v1825_v15 = vadd.f32 %v1793_v58, %v1425_v44  ;;  %v1191_v0 = vpop.permute.xlu0 %1190 }
 0x305   : > { %vm1244_vm8 = vcmp.eq.s32.totalorder %v1191_v0, %v4053_v51 }
 0x306   : > { %v1862_v21 = vpack.c.bf16 %v1826_v31, %v1825_v15  ;;  %v1187_v41 = vpop.permute.xlu1 %1186 }
 0x307   : > { %vm1243_vm10 = vcmp.eq.s32.totalorder %v1187_v41, %v4053_v51 }
 0x308   : > { %3155 = vmatmul.mubr.msk.bf16.gmra.mrb[76].mxu1 %vm1879_vm4, %v1862_v21  ;;  %v1559_v55 = vpop.permute.xlu0 %1558 }
 0x309   : > { %2333 = vmatprep.mubr.bf16.mxu1 %v4767_v20  ;;  %vm1612_vm9 = vcmp.eq.s32.totalorder %v1559_v55, %v4053_v51 }
 0x30a   : > { %v1555_v42 = vpop.permute.xlu1 %1554 }
 0x30b   : > { %vm1611_vm11 = vcmp.eq.s32.totalorder %v1555_v42, %v4053_v51 }
 0x30c   : > { %v1375_v1 = vpop.permute.xlu0 %1374 }
 0x30d   : > { %v1428_v56 = vsel %vm1244_vm8, %v1375_v1, 0.0 }
 0x30e   : > { %v1371_v17 = vpop.permute.xlu1 %1370 }
 0x30f   : > { %v1427_v54 = vsel %vm1243_vm10, %v1371_v17, 0.0  ;;  %vm2987_vm10 = vcmask 1043459  }
 0x310   : > { %v1743_v8 = vpop.permute.xlu0 %1742 }
 0x311   : > { %v1796_v9 = vsel %vm1612_vm9, %v1743_v8, 0.0  ;;  %vm2985_vm9 = vcmask 1042434  }
 0x312   : > { %v1828_v5 = vadd.f32 %v1796_v9, %v1428_v56  ;;  %v1739_v57 = vpop.permute.xlu1 %1738  ;;  %v1992_v39 = vpop.f32.mrb[12].mxu0 }
 0x313   : > { %v1795_v61 = vsel %vm1611_vm11, %v1739_v57, 0.0  ;;  %v1994_v25 = vpop.f32.mrb[13].mxu0  ;;  %vm2989_vm11 = vcmask 1044484  }
 0x314   : > { %v1827_v60 = vadd.f32 %v1795_v61, %v1427_v54  ;;  %v1996_v63 = vpop.f32.mrb[14].mxu0  ;;  %v1199_v52 = vpop.permute.xlu0 %1198 }
 0x315   : > { %v1998_v13 = vpop.f32.mrb[15].mxu0  ;;  %vm1246_vm12 = vcmp.eq.s32.totalorder %v1199_v52, %v4053_v51 }
 0x316   : > { %v1863_v4 = vpack.c.bf16 %v1828_v5, %v1827_v60  ;;  %v1195_v37 = vpop.permute.xlu1 %1194 }
 0x317   : > { %vm1245_vm14 = vcmp.eq.s32.totalorder %v1195_v37, %v4053_v51 }
 0x318   : > { %3156 = vmatmul.mubr.msk.bf16.gmra.mrb[80].mxu1 %vm1879_vm4, %v1863_v4  ;;  %v1567_v38 = vpop.permute.xlu0 %1566 }
 0x319   : > { %2343 = vmatprep.mubr.bf16.mxu1 %v4767_v20  ;;  %vm1614_vm13 = vcmp.eq.s32.totalorder %v1567_v38, %v4053_v51 }
 0x31a   : > { %v1563_v47 = vpop.permute.xlu1 %1562  ;;  %v2245_v2 = vpop.f32.mrb[44].mxu1 }
 0x31b   : > { %v2386_v31 = vmul.f32 %v2245_v2, %v1992_v39  ;;  %v2247_v28 = vpop.f32.mrb[45].mxu1  ;;  %vm1613_vm15 = vcmp.eq.s32.totalorder %v1563_v47, %v4053_v51 }
 0x31c   : > { %v2387_v44 = vmul.f32 %v2247_v28, %v1994_v25  ;;  %v2249_v58 = vpop.f32.mrb[46].mxu1  ;;  %v1383_v15 = vpop.permute.xlu0 %1382 }
 0x31d   : > { %v2388_v0 = vmul.f32 %v2249_v58, %v1996_v63  ;;  %v2251_v21 = vpop.f32.mrb[47].mxu1  ;;  %v1430_v8 = vsel %vm1246_vm12, %v1383_v15, 0.0  ;;  %vm2991_vm12 = vcmask 1045509  }
 0x31e   : > { %v2389_v41 = vmul.f32 %v2251_v21, %v1998_v13  ;;  %v1379_v55 = vpop.permute.xlu1 %1378 }
 0x31f   : > { %v2444_v42 = vpack.c.bf16 %v2388_v0, %v2386_v31  ;;  %v1429_v57 = vsel %vm1245_vm14, %v1379_v55, 0.0  ;;  %vm2995_vm14 = vcmask 1047559  }
 0x320   : > { %v2445_v1 = vpack.c.bf16 %v2389_v41, %v2387_v44  ;;  %v1751_v17 = vpop.permute.xlu0 %1750 }
 0x321   : > { %v1798_v56 = vsel %vm1614_vm13, %v1751_v17, 0.0  ;;  %vm2993_vm13 = vcmask 1046534  }
 0x322   : > { %v1830_v9 = vadd.f32 %v1798_v56, %v1430_v8  ;;  %v1747_v5 = vpop.permute.xlu1 %1746  ;;  %2654 = vmatprep.mubr.bf16.mxu0 %v2445_v1 }
 0x323   : > { %v1797_v39 = vsel %vm1613_vm15, %v1747_v5, 0.0  ;;  %2655 = vmatmul.mubr.bf16.gmra.mrb[44].mxu0 %v2444_v42 }
 0x324   : > { %v1829_v54 = vadd.f32 %v1797_v39, %v1429_v57  ;;  %v1210_v61 = vpop.permute.xlu0 %1209 }
 0x325   : > { %vm1248_vm0 = vcmp.eq.s32.totalorder %v1210_v61, %v4053_v51 }
 0x326   : > { %v1864_v25 = vpack.c.bf16 %v1830_v9, %v1829_v54  ;;  %v1206_v60 = vpop.permute.xlu1 %1205 }
 0x327   : > { %vm1247_vm2 = vcmp.eq.s32.totalorder %v1206_v60, %v4053_v51 }
 0x328   : > { %3157 = vmatmul.mubr.msk.bf16.gmra.mrb[84].mxu1 %vm1879_vm4, %v1864_v25  ;;  %v1578_v63 = vpop.permute.xlu0 %1577 }
 0x329   : > { %2353 = vmatprep.mubr.bf16.mxu1 %v4767_v20  ;;  %vm1616_vm1 = vcmp.eq.s32.totalorder %v1578_v63, %v4053_v51 }
 0x32a   : > { %v1574_v52 = vpop.permute.xlu1 %1573 }
 0x32b   : > { %vm1615_vm3 = vcmp.eq.s32.totalorder %v1574_v52, %v4053_v51 }
 0x32c   : > { %v1394_v13 = vpop.permute.xlu0 %1393 }
 0x32d   : > { %v1432_v38 = vsel %vm1248_vm0, %v1394_v13, 0.0 }
 0x32e   : > { %v1390_v4 = vpop.permute.xlu1 %1389 }
 0x32f   : > { %v1431_v44 = vsel %vm1247_vm2, %v1390_v4, 0.0 }
 0x330   : > { %v1762_v37 = vpop.permute.xlu0 %1761 }
 0x331   : > { %v1800_v47 = vsel %vm1616_vm1, %v1762_v37, 0.0 }
 0x332   : > { %v1832_v2 = vadd.f32 %v1800_v47, %v1432_v38  ;;  %v1758_v31 = vpop.permute.xlu1 %1757  ;;  %v2002_v28 = vpop.f32.mrb[16].mxu0 }
 0x333   : > { %v1799_v58 = vsel %vm1615_vm3, %v1758_v31, 0.0  ;;  %v2004_v15 = vpop.f32.mrb[17].mxu0 }
 0x334   : > { %v1831_v0 = vadd.f32 %v1799_v58, %v1431_v44  ;;  %v2006_v21 = vpop.f32.mrb[18].mxu0  ;;  %v1218_v41 = vpop.permute.xlu0 %1217 }
 0x335   : > { %v2008_v55 = vpop.f32.mrb[19].mxu0  ;;  %vm1250_vm5 = vcmp.eq.s32.totalorder %v1218_v41, %v4053_v51 }
 0x336   : > { %v1865_v42 = vpack.c.bf16 %v1832_v2, %v1831_v0  ;;  %v1214_v1 = vpop.permute.xlu1 %1213 }
 0x337   : > { %vm1249_vm7 = vcmp.eq.s32.totalorder %v1214_v1, %v4053_v51 }
 0x338   : > { %3158 = vmatmul.mubr.msk.bf16.gmra.mrb[88].mxu1 %vm1879_vm4, %v1865_v42  ;;  %v1586_v17 = vpop.permute.xlu0 %1585 }
 0x339   : > { %2363 = vmatprep.mubr.bf16.mxu1 %v4767_v20  ;;  %vm1618_vm6 = vcmp.eq.s32.totalorder %v1586_v17, %v4053_v51 }
 0x33a   : > { %v1582_v8 = vpop.permute.xlu1 %1581  ;;  %v2255_v56 = vpop.f32.mrb[48].mxu1 }
 0x33b   : > { %v2390_v9 = vmul.f32 %v2255_v56, %v2002_v28  ;;  %v2257_v5 = vpop.f32.mrb[49].mxu1  ;;  %vm1617_vm8 = vcmp.eq.s32.totalorder %v1582_v8, %v4053_v51 }
 0x33c   : > { %v2391_v57 = vmul.f32 %v2257_v5, %v2004_v15  ;;  %v2259_v39 = vpop.f32.mrb[50].mxu1  ;;  %v1402_v54 = vpop.permute.xlu0 %1401 }
 0x33d   : > { %v2392_v61 = vmul.f32 %v2259_v39, %v2006_v21  ;;  %v2261_v25 = vpop.f32.mrb[51].mxu1  ;;  %v1434_v37 = vsel %vm1250_vm5, %v1402_v54, 0.0 }
 0x33e   : > { %v2393_v60 = vmul.f32 %v2261_v25, %v2008_v55  ;;  %v1398_v63 = vpop.permute.xlu1 %1397 }
 0x33f   : > { %v2446_v52 = vpack.c.bf16 %v2392_v61, %v2390_v9  ;;  %v1433_v2 = vsel %vm1249_vm7, %v1398_v63, 0.0 }
 0x340   : > { %v2447_v13 = vpack.c.bf16 %v2393_v60, %v2391_v57  ;;  %v1770_v4 = vpop.permute.xlu0 %1769 }
 0x341   : > { %v1802_v20 = vsel %vm1618_vm6, %v1770_v4, 0.0 }
 0x342   : > { %v1834_v38 = vadd.f32 %v1802_v20, %v1434_v37  ;;  %v1766_v47 = vpop.permute.xlu1 %1765  ;;  %2662 = vmatprep.mubr.bf16.mxu0 %v2447_v13 }
 0x343   : > { %v1801_v31 = vsel %vm1617_vm8, %v1766_v47, 0.0  ;;  %2663 = vmatmul.mubr.bf16.gmra.mrb[48].mxu0 %v2446_v52 }
 0x344   : > { %v1833_v28 = vadd.f32 %v1801_v31, %v1433_v2 }
 0x346   : > { %v1866_v44 = vpack.c.bf16 %v1834_v38, %v1833_v28 }
 0x348   : > { %3159 = vmatmul.mubr.msk.bf16.gmra.mrb[92].mxu1 %vm1879_vm4, %v1866_v44  ;;  %vm2983_vm4 = vcmask 1041409  }
 0x352   : > { %v2012_v58 = vpop.f32.mrb[20].mxu0 }
 0x353   : > { %v2014_v15 = vpop.f32.mrb[21].mxu0 }
 0x354   : > { %v2016_v0 = vpop.f32.mrb[22].mxu0 }
 0x355   : > { %v2018_v21 = vpop.f32.mrb[23].mxu0 }
 0x35a   : > { %v2265_v41 = vpop.f32.mrb[52].mxu1 }
 0x35b   : > { %v2394_v55 = vmul.f32 %v2265_v41, %v2012_v58  ;;  %v2267_v42 = vpop.f32.mrb[53].mxu1 }
 0x35c   : > { %v2395_v1 = vmul.f32 %v2267_v42, %v2014_v15  ;;  %v2269_v17 = vpop.f32.mrb[54].mxu1 }
 0x35d   : > { %v2396_v51 = vmul.f32 %v2269_v17, %v2016_v0  ;;  %v2271_v8 = vpop.f32.mrb[55].mxu1 }
 0x35e   : > { %v2397_v56 = vmul.f32 %v2271_v8, %v2018_v21 }
 0x35f   : > { %v2448_v9 = vpack.c.bf16 %v2396_v51, %v2394_v55 }
 0x360   : > { %v2449_v5 = vpack.c.bf16 %v2397_v56, %v2395_v1 }
 0x362   : > { %2670 = vmatprep.mubr.bf16.mxu0 %v2449_v5 }
 0x363   : > { %2671 = vmatmul.mubr.bf16.gmra.mrb[52].mxu0 %v2448_v9 }
 0x372   : > { %v2022_v57 = vpop.f32.mrb[24].mxu0 }
 0x373   : > { %v2024_v39 = vpop.f32.mrb[25].mxu0 }
 0x374   : > { %v2026_v54 = vpop.f32.mrb[26].mxu0 }
 0x375   : > { %v2028_v61 = vpop.f32.mrb[27].mxu0 }
 0x37a   : > { %v2275_v25 = vpop.f32.mrb[56].mxu1 }
 0x37b   : > { %v2398_v60 = vmul.f32 %v2275_v25, %v2022_v57  ;;  %v2277_v63 = vpop.f32.mrb[57].mxu1 }
 0x37c   : > { %v2399_v52 = vmul.f32 %v2277_v63, %v2024_v39  ;;  %v2279_v13 = vpop.f32.mrb[58].mxu1 }
 0x37d   : > { %v2400_v4 = vmul.f32 %v2279_v13, %v2026_v54  ;;  %v2281_v37 = vpop.f32.mrb[59].mxu1 }
 0x37e   : > { %v2401_v20 = vmul.f32 %v2281_v37, %v2028_v61 }
 0x37f   : > { %v2450_v38 = vpack.c.bf16 %v2400_v4, %v2398_v60 }
 0x380   : > { %v2451_v47 = vpack.c.bf16 %v2401_v20, %v2399_v52 }
 0x382   : > { %2678 = vmatprep.mubr.bf16.mxu0 %v2451_v47 }
 0x383   : > { %2679 = vmatmul.mubr.bf16.gmra.mrb[56].mxu0 %v2450_v38 }
 0x392   : > { %v2032_v2 = vpop.f32.mrb[28].mxu0 }
 0x393   : > { %v2034_v31 = vpop.f32.mrb[29].mxu0 }
 0x394   : > { %v2036_v28 = vpop.f32.mrb[30].mxu0 }
 0x395   : > { %v2038_v44 = vpop.f32.mrb[31].mxu0 }
 0x39a   : > { %v2285_v58 = vpop.f32.mrb[60].mxu1 }
 0x39b   : > { %v2402_v15 = vmul.f32 %v2285_v58, %v2032_v2  ;;  %v2287_v0 = vpop.f32.mrb[61].mxu1 }
 0x39c   : > { %v2403_v21 = vmul.f32 %v2287_v0, %v2034_v31  ;;  %v2289_v41 = vpop.f32.mrb[62].mxu1 }
 0x39d   : > { %v2404_v55 = vmul.f32 %v2289_v41, %v2036_v28  ;;  %v2291_v42 = vpop.f32.mrb[63].mxu1 }
 0x39e   : > { %v2405_v1 = vmul.f32 %v2291_v42, %v2038_v44 }
 0x39f   : > { %v2452_v17 = vpack.c.bf16 %v2404_v55, %v2402_v15 }
 0x3a0   : > { %v2453_v51 = vpack.c.bf16 %v2405_v1, %v2403_v21 }
 0x3a2   : > { %2686 = vmatprep.mubr.bf16.mxu0 %v2453_v51 }
 0x3a3   : > { %2687 = vmatmul.mubr.bf16.gmra.mrb[60].mxu0 %v2452_v17 }
 0x3aa   : > { %v2295_v8 = vpop.f32.mrb[64].mxu1 }
 0x3ab   : > { %v2406_v56 = vmul.f32 %v2295_v8, %v4381_v14  ;;  %v2297_v9 = vpop.f32.mrb[65].mxu1 }
 0x3ac   : > { %v2407_v5 = vmul.f32 %v2297_v9, %v4384_v22  ;;  %v2299_v57 = vpop.f32.mrb[66].mxu1 }
 0x3ad   : > { %v2408_v39 = vmul.f32 %v2299_v57, %v4386_v30  ;;  %v2301_v54 = vpop.f32.mrb[67].mxu1 }
 0x3ae   : > { %v2409_v61 = vmul.f32 %v2301_v54, %v4388_v53 }
 0x3af   : > { %v2454_v25 = vpack.c.bf16 %v2408_v39, %v2406_v56  ;;  %v3198_v60 = vpop.f32.mrb[32].mxu0 }
 0x3b0   : > { %v2455_v63 = vpack.c.bf16 %v2409_v61, %v2407_v5  ;;  %v3199_v52 = vpop.f32.mrb[33].mxu0 }
 0x3b1   : > { %v3200_v13 = vadd.f32 %v3199_v52, %v3198_v60  ;;  %v3201_v4 = vpop.f32.mrb[34].mxu0 }
 0x3b2   : > { %v3202_v37 = vpop.f32.mrb[35].mxu0  ;;  %2694 = vmatprep.mubr.bf16.mxu0 %v2455_v63 }
 0x3b3   : > { %v2759_v20 = vrot.slane %v3200_v13, 4  ;;  %v3203_v38 = vadd.f32 %v3202_v37, %v3201_v4  ;;  %2695 = vmatmul.mubr.bf16.gmra.mrb[64].mxu0 %v2454_v25 }
 0x3b5   : > { %v2760_v14 = vmax.f32 %v3200_v13, %v2759_v20  ;;  %v2765_v47 = vrot.slane %v3203_v38, 4 }
 0x3b7   : > { %v2761_v22 = vrot.slane %v2760_v14, 2  ;;  %v2766_v2 = vmax.f32 %v3203_v38, %v2765_v47  ;;  %v3204_v31 = vpop.f32.mrb[36].mxu0 }
 0x3b8   : > { %v3205_v30 = vpop.f32.mrb[37].mxu0 }
 0x3b9   : > { %v2762_v28 = vmax.f32 %v2760_v14, %v2761_v22  ;;  %v2767_v44 = vrot.slane %v2766_v2, 2  ;;  %v3206_v53 = vadd.f32 %v3205_v30, %v3204_v31  ;;  %v3207_v58 = vpop.f32.mrb[38].mxu0 }
 0x3ba   : > { %v3208_v15 = vpop.f32.mrb[39].mxu0 }
 0x3bb   : > { %v2763_v0 = vrot.slane %v2762_v28, 1  ;;  %v2768_v21 = vmax.f32 %v2766_v2, %v2767_v44  ;;  %v2771_v41 = vrot.slane %v3206_v53, 4  ;;  %v2305_v55 = vpop.f32.mrb[68].mxu1  ;;  %v3209_v42 = vadd.f32 %v3208_v15, %v3207_v58 }
 0x3bc   : > { %v2410_v1 = vmul.f32 %v2305_v55, %v4397_v62  ;;  %v2307_v17 = vpop.f32.mrb[69].mxu1 }
 0x3bd   : > { %v2769_v51 = vrot.slane %v2768_v21, 1  ;;  %v2772_v8 = vmax.f32 %v3206_v53, %v2771_v41  ;;  %v2777_v56 = vrot.slane %v3209_v42, 4  ;;  %v2309_v9 = vpop.f32.mrb[70].mxu1  ;;  %v2764_v5 = vmax.f32 %v2762_v28, %v2763_v0 }
 0x3be   : > { %v2411_v57 = vmul.f32 %v2307_v17, %v4400_v32  ;;  %v2412_v39 = vmul.f32 %v2309_v9, %v4402_v7  ;;  %v2311_v54 = vpop.f32.mrb[71].mxu1 }
 0x3bf   : > { %v2770_v61 = vmax.f32 %v2768_v21, %v2769_v51  ;;  %v2773_v25 = vrot.slane %v2772_v8, 2  ;;  %v2778_v60 = vmax.f32 %v3209_v42, %v2777_v56  ;;  %v2413_v63 = vmul.f32 %v2311_v54, %v4404_v40 }
 0x3c0   : > { %v2456_v52 = vpack.c.bf16 %v2412_v39, %v2410_v1 }
 0x3c1   : > { %v2984_v62 = vsel %vm2983_vm4, %v2770_v61, %v2764_v5  ;;  %v2774_v13 = vmax.f32 %v2772_v8, %v2773_v25  ;;  %v2779_v4 = vrot.slane %v2778_v60, 2  ;;  %v2457_v37 = vpack.c.bf16 %v2413_v63, %v2411_v57 }
 0x3c3   : > { %v2775_v20 = vrot.slane %v2774_v13, 1  ;;  %v2780_v38 = vmax.f32 %v2778_v60, %v2779_v4  ;;  %2702 = vmatprep.mubr.bf16.mxu0 %v2457_v37 }
 0x3c4   : > { %2703 = vmatmul.mubr.bf16.gmra.mrb[68].mxu0 %v2456_v52 }
 0x3c5   : > { %v2776_v32 = vmax.f32 %v2774_v13, %v2775_v20  ;;  %v2781_v14 = vrot.slane %v2780_v38, 1 }
 0x3c7   : > { %v2986_v7 = vsel %vm2985_vm9, %v2776_v32, %v2984_v62  ;;  %v2782_v47 = vmax.f32 %v2780_v38, %v2781_v14 }
 0x3c9   : > { %v2988_v22 = vsel %vm2987_vm10, %v2782_v47, %v2986_v7 }
 0x3cb   : > { %v2315_v40 = vpop.f32.mrb[72].mxu1 }
 0x3cc   : > { %v2414_v2 = vmul.f32 %v2315_v40, %v4415_v18  ;;  %v2317_v31 = vpop.f32.mrb[73].mxu1 }
 0x3cd   : > { %v2415_v30 = vmul.f32 %v2317_v31, %v4418_v24  ;;  %v2319_v28 = vpop.f32.mrb[74].mxu1 }
 0x3ce   : > { %v2416_v44 = vmul.f32 %v2319_v28, %v4420_v50  ;;  %v2321_v53 = vpop.f32.mrb[75].mxu1 }
 0x3cf   : > { %v2417_v58 = vmul.f32 %v2321_v53, %v4422_v43 }
 0x3d0   : > { %v2458_v15 = vpack.c.bf16 %v2416_v44, %v2414_v2 }
 0x3d1   : > { %v2459_v0 = vpack.c.bf16 %v2417_v58, %v2415_v30 }
 0x3d3   : > { %2710 = vmatprep.mubr.bf16.mxu0 %v2459_v0 }
 0x3d4   : > { %2711 = vmatmul.mubr.bf16.gmra.mrb[72].mxu0 %v2458_v15 }
 0x3d6   : > { %v3210_v21 = vpop.f32.mrb[40].mxu0 }
 0x3d7   : > { %v3211_v41 = vpop.f32.mrb[41].mxu0 }
 0x3d8   : > { %v3212_v55 = vadd.f32 %v3211_v41, %v3210_v21  ;;  %v3213_v42 = vpop.f32.mrb[42].mxu0 }
 0x3d9   : > { %v3214_v1 = vpop.f32.mrb[43].mxu0 }
 0x3da   : > { %v2783_v17 = vrot.slane %v3212_v55, 4  ;;  %v3215_v18 = vadd.f32 %v3214_v1, %v3213_v42 }
 0x3db   : > { %v2325_v51 = vpop.f32.mrb[76].mxu1 }
 0x3dc   : > { %v2784_v8 = vmax.f32 %v3212_v55, %v2783_v17  ;;  %v2789_v24 = vrot.slane %v3215_v18, 4  ;;  %v2418_v56 = vmul.f32 %v2325_v51, %v4429_v48  ;;  %v2327_v50 = vpop.f32.mrb[77].mxu1 }
 0x3dd   : > { %v2419_v9 = vmul.f32 %v2327_v50, %v4432_v3  ;;  %v2329_v43 = vpop.f32.mrb[78].mxu1 }
 0x3de   : > { %v2785_v5 = vrot.slane %v2784_v8, 2  ;;  %v2790_v57 = vmax.f32 %v3215_v18, %v2789_v24  ;;  %v2420_v39 = vmul.f32 %v2329_v43, %v4434_v36  ;;  %v2331_v54 = vpop.f32.mrb[79].mxu1 }
 0x3df   : > { %v2421_v61 = vmul.f32 %v2331_v54, %v4436_v12 }
 0x3e0   : > { %v2786_v25 = vmax.f32 %v2784_v8, %v2785_v5  ;;  %v2791_v60 = vrot.slane %v2790_v57, 2  ;;  %v2460_v63 = vpack.c.bf16 %v2420_v39, %v2418_v56 }
 0x3e1   : > { %v2461_v52 = vpack.c.bf16 %v2421_v61, %v2419_v9 }
 0x3e2   : > { %v2787_v62 = vrot.slane %v2786_v25, 1  ;;  %v2792_v13 = vmax.f32 %v2790_v57, %v2791_v60 }
 0x3e3   : > { %2718 = vmatprep.mubr.bf16.mxu0 %v2461_v52 }
 0x3e4   : > { %v2788_v48 = vmax.f32 %v2786_v25, %v2787_v62  ;;  %v2793_v4 = vrot.slane %v2792_v13, 1  ;;  %2719 = vmatmul.mubr.bf16.gmra.mrb[76].mxu0 %v2460_v63 }
 0x3e6   : > { %v2990_v3 = vsel %vm2989_vm11, %v2788_v48, %v2988_v22  ;;  %v2794_v37 = vmax.f32 %v2792_v13, %v2793_v4 }
 0x3e8   : > { %v2992_v36 = vsel %vm2991_vm12, %v2794_v37, %v2990_v3 }
 0x3eb   : > { %v2335_v20 = vpop.f32.mrb[80].mxu1 }
 0x3ec   : > { %v2422_v12 = vmul.f32 %v2335_v20, %v4443_v46  ;;  %v2337_v38 = vpop.f32.mrb[81].mxu1 }
 0x3ed   : > { %v2423_v32 = vmul.f32 %v2337_v38, %v4448_v29  ;;  %v2339_v14 = vpop.f32.mrb[82].mxu1 }
 0x3ee   : > { %v2424_v7 = vmul.f32 %v2339_v14, %v4452_v34  ;;  %v2341_v47 = vpop.f32.mrb[83].mxu1 }
 0x3ef   : > { %v2425_v40 = vmul.f32 %v2341_v47, %v4456_v26 }
 0x3f0   : > { %v2462_v2 = vpack.c.bf16 %v2424_v7, %v2422_v12 }
 0x3f1   : > { %v2463_v31 = vpack.c.bf16 %v2425_v40, %v2423_v32 }
 0x3f3   : > { %2726 = vmatprep.mubr.bf16.mxu0 %v2463_v31 }
 0x3f4   : > { %2727 = vmatmul.mubr.bf16.gmra.mrb[80].mxu0 %v2462_v2 }
 0x3f6   : > { %v3216_v22 = vpop.f32.mrb[44].mxu0 }
 0x3f7   : > { %v3217_v30 = vpop.f32.mrb[45].mxu0 }
 0x3f8   : > { %v3218_v28 = vadd.f32 %v3217_v30, %v3216_v22  ;;  %v3219_v44 = vpop.f32.mrb[46].mxu0 }
 0x3f9   : > { %v3220_v53 = vpop.f32.mrb[47].mxu0 }
 0x3fa   : > { %v2795_v46 = vrot.slane %v3218_v28, 4  ;;  %v3221_v58 = vadd.f32 %v3220_v53, %v3219_v44 }
 0x3fb   : > { %v2345_v15 = vpop.f32.mrb[84].mxu1 }
 0x3fc   : > { %v2796_v29 = vmax.f32 %v3218_v28, %v2795_v46  ;;  %v2801_v0 = vrot.slane %v3221_v58, 4  ;;  %v2426_v34 = vmul.f32 %v2345_v15, %v4465_v6  ;;  %v2347_v21 = vpop.f32.mrb[85].mxu1 }
 0x3fd   : > { %v2427_v26 = vmul.f32 %v2347_v21, %v4468_v35  ;;  %v2349_v41 = vpop.f32.mrb[86].mxu1 }
 0x3fe   : > { %v2797_v55 = vrot.slane %v2796_v29, 2  ;;  %v2802_v42 = vmax.f32 %v3221_v58, %v2801_v0  ;;  %v2428_v1 = vmul.f32 %v2349_v41, %v4470_v16  ;;  %v2351_v17 = vpop.f32.mrb[87].mxu1 }
 0x3ff   : > { %v2429_v18 = vmul.f32 %v2351_v17, %v4472_v27 }
 0x400   : > { %v2798_v51 = vmax.f32 %v2796_v29, %v2797_v55  ;;  %v2803_v8 = vrot.slane %v2802_v42, 2  ;;  %v2464_v24 = vpack.c.bf16 %v2428_v1, %v2426_v34 }
 0x401   : > { %v2465_v56 = vpack.c.bf16 %v2429_v18, %v2427_v26 }
 0x402   : > { %v2799_v50 = vrot.slane %v2798_v51, 1  ;;  %v2804_v9 = vmax.f32 %v2802_v42, %v2803_v8 }
 0x403   : > { %2734 = vmatprep.mubr.bf16.mxu0 %v2465_v56 }
 0x404   : > { %v2800_v6 = vmax.f32 %v2798_v51, %v2799_v50  ;;  %v2805_v35 = vrot.slane %v2804_v9, 1  ;;  %2735 = vmatmul.mubr.bf16.gmra.mrb[84].mxu0 %v2464_v24 }
 0x406   : > { %v2994_v16 = vsel %vm2993_vm13, %v2800_v6, %v2992_v36  ;;  %v2806_v43 = vmax.f32 %v2804_v9, %v2805_v35 }
 0x408   : > { %v2996_v27 = vsel %vm2995_vm14, %v2806_v43, %v2994_v16 }
 0x409   : > { %3022 = vst [vmem:[%s4592_s30] sm:$0xff] %v2996_v27 }
 0x40b   : > { %v2355_v5 = vpop.f32.mrb[88].mxu1 }
 0x40c   : > { %v2430_v57 = vmul.f32 %v2355_v5, %v4482_v10  ;;  %v2357_v39 = vpop.f32.mrb[89].mxu1 }
 0x40d   : > { %v2431_v54 = vmul.f32 %v2357_v39, %v4485_v59  ;;  %v2359_v61 = vpop.f32.mrb[90].mxu1 }
 0x40e   : > { %v2432_v25 = vmul.f32 %v2359_v61, %v4487_v11  ;;  %v2361_v60 = vpop.f32.mrb[91].mxu1 }
 0x40f   : > { %v2433_v63 = vmul.f32 %v2361_v60, %v4489_v23 }
 0x410   : > { %v2466_v52 = vpack.c.bf16 %v2432_v25, %v2430_v57 }
 0x411   : > { %v2467_v62 = vpack.c.bf16 %v2433_v63, %v2431_v54 }
 0x413   : > { %2742 = vmatprep.mubr.bf16.mxu0 %v2467_v62 }
 0x414   : > { %2743 = vmatmul.mubr.bf16.gmra.mrb[88].mxu0 %v2466_v52 }
 0x416   : > { %v3222_v13 = vpop.f32.mrb[48].mxu0 }
 0x417   : > { %v3223_v48 = vpop.f32.mrb[49].mxu0 }
 0x418   : > { %v3224_v4 = vadd.f32 %v3223_v48, %v3222_v13  ;;  %v3225_v3 = vpop.f32.mrb[50].mxu0 }
 0x419   : > { %v3226_v37 = vpop.f32.mrb[51].mxu0 }
 0x41a   : > { %v2807_v36 = vrot.slane %v3224_v4, 4  ;;  %v3227_v10 = vadd.f32 %v3226_v37, %v3225_v3 }
 0x41b   : > { %v2365_v20 = vpop.f32.mrb[92].mxu1 }
 0x41c   : > { %v2808_v12 = vmax.f32 %v3224_v4, %v2807_v36  ;;  %v2813_v59 = vrot.slane %v3227_v10, 4  ;;  %v2434_v38 = vmul.f32 %v2365_v20, %v4496_v49  ;;  %v2367_v11 = vpop.f32.mrb[93].mxu1 }
 0x41d   : > { %v2435_v32 = vmul.f32 %v2367_v11, %v4499_v33  ;;  %v2369_v23 = vpop.f32.mrb[94].mxu1 }
 0x41e   : > { %v2809_v14 = vrot.slane %v2808_v12, 2  ;;  %v2814_v7 = vmax.f32 %v3227_v10, %v2813_v59  ;;  %v2436_v47 = vmul.f32 %v2369_v23, %v4501_v45  ;;  %v2371_v40 = vpop.f32.mrb[95].mxu1 }
 0x41f   : > { %v2437_v2 = vmul.f32 %v2371_v40, %v4503_v19 }
 0x420   : > { %v2810_v31 = vmax.f32 %v2808_v12, %v2809_v14  ;;  %v2815_v22 = vrot.slane %v2814_v7, 2  ;;  %v2468_v30 = vpack.c.bf16 %v2436_v47, %v2434_v38 }
 0x421   : > { %v2469_v28 = vpack.c.bf16 %v2437_v2, %v2435_v32 }
 0x422   : > { %v2811_v44 = vrot.slane %v2810_v31, 1  ;;  %v2816_v53 = vmax.f32 %v2814_v7, %v2815_v22 }
 0x423   : > { %2750 = vmatprep.mubr.bf16.mxu0 %v2469_v28 }
 0x424   : > { %v2817_v46 = vrot.slane %v2816_v53, 1  ;;  %2751 = vmatmul.mubr.bf16.gmra.mrb[92].mxu0 %v2468_v30  ;;  %v2812_v49 = vmax.f32 %v2810_v31, %v2811_v44 }
 0x426   : > { %v2818_v58 = vmax.f32 %v2816_v53, %v2817_v46 }
 0x428   : > { %v2997_v33 = vsel %vm2983_vm4, %v2818_v58, %v2812_v49 }
 0x436   : > { %v3228_v15 = vpop.f32.mrb[52].mxu0 }
 0x437   : > { %v3229_v29 = vpop.f32.mrb[53].mxu0 }
 0x438   : > { %v3230_v0 = vadd.f32 %v3229_v29, %v3228_v15  ;;  %v3231_v45 = vpop.f32.mrb[54].mxu0 }
 0x439   : > { %v3232_v34 = vpop.f32.mrb[55].mxu0 }
 0x43a   : > { %v2819_v21 = vrot.slane %v3230_v0, 4  ;;  %v3233_v19 = vadd.f32 %v3232_v34, %v3231_v45 }
 0x43c   : > { %v2820_v26 = vmax.f32 %v3230_v0, %v2819_v21  ;;  %v2825_v41 = vrot.slane %v3233_v19, 4 }
 0x43e   : > { %v2821_v55 = vrot.slane %v2820_v26, 2  ;;  %v2826_v42 = vmax.f32 %v3233_v19, %v2825_v41 }
 0x440   : > { %v2822_v1 = vmax.f32 %v2820_v26, %v2821_v55  ;;  %v2827_v17 = vrot.slane %v2826_v42, 2 }
 0x442   : > { %v2823_v18 = vrot.slane %v2822_v1, 1  ;;  %v2828_v51 = vmax.f32 %v2826_v42, %v2827_v17 }
 0x444   : > { %v2824_v8 = vmax.f32 %v2822_v1, %v2823_v18  ;;  %v2829_v24 = vrot.slane %v2828_v51, 1 }
 0x446   : > { %v2998_v56 = vsel %vm2985_vm9, %v2824_v8, %v2997_v33  ;;  %v2830_v50 = vmax.f32 %v2828_v51, %v2829_v24 }
 0x448   : > { %v2999_v9 = vsel %vm2987_vm10, %v2830_v50, %v2998_v56 }
 0x456   : > { %v3234_v6 = vpop.f32.mrb[56].mxu0 }
 0x457   : > { %v3235_v35 = vpop.f32.mrb[57].mxu0 }
 0x458   : > { %v3236_v16 = vadd.f32 %v3235_v35, %v3234_v6  ;;  %v3237_v43 = vpop.f32.mrb[58].mxu0 }
 0x459   : > { %v3238_v27 = vpop.f32.mrb[59].mxu0 }
 0x45a   : > { %v2831_v5 = vrot.slane %v3236_v16, 4  ;;  %v3239_v57 = vadd.f32 %v3238_v27, %v3237_v43 }
 0x45c   : > { %v2832_v39 = vmax.f32 %v3236_v16, %v2831_v5  ;;  %v2837_v54 = vrot.slane %v3239_v57, 4 }
 0x45e   : > { %v2833_v61 = vrot.slane %v2832_v39, 2  ;;  %v2838_v25 = vmax.f32 %v3239_v57, %v2837_v54 }
 0x460   : > { %v2834_v60 = vmax.f32 %v2832_v39, %v2833_v61  ;;  %v2839_v63 = vrot.slane %v2838_v25, 2 }
 0x462   : > { %v2835_v52 = vrot.slane %v2834_v60, 1  ;;  %v2840_v62 = vmax.f32 %v2838_v25, %v2839_v63 }
 0x464   : > { %v2836_v13 = vmax.f32 %v2834_v60, %v2835_v52  ;;  %v2841_v48 = vrot.slane %v2840_v62, 1 }
 0x466   : > { %v3000_v4 = vsel %vm2989_vm11, %v2836_v13, %v2999_v9  ;;  %v2842_v3 = vmax.f32 %v2840_v62, %v2841_v48 }
 0x468   : > { %v3001_v37 = vsel %vm2991_vm12, %v2842_v3, %v3000_v4 }
 0x476   : > { %v3240_v36 = vpop.f32.mrb[60].mxu0 }
 0x477   : > { %v3241_v10 = vpop.f32.mrb[61].mxu0 }
 0x478   : > { %v3242_v20 = vadd.f32 %v3241_v10, %v3240_v36  ;;  %v3243_v12 = vpop.f32.mrb[62].mxu0 }
 0x479   : > { %v3244_v59 = vpop.f32.mrb[63].mxu0 }
 0x47a   : > { %v2843_v38 = vrot.slane %v3242_v20, 4  ;;  %v3245_v11 = vadd.f32 %v3244_v59, %v3243_v12 }
 0x47c   : > { %v2844_v32 = vmax.f32 %v3242_v20, %v2843_v38  ;;  %v2849_v23 = vrot.slane %v3245_v11, 4 }
 0x47e   : > { %v2845_v14 = vrot.slane %v2844_v32, 2  ;;  %v2850_v7 = vmax.f32 %v3245_v11, %v2849_v23 }
 0x480   : > { %v2846_v47 = vmax.f32 %v2844_v32, %v2845_v14  ;;  %v2851_v40 = vrot.slane %v2850_v7, 2 }
 0x482   : > { %v2847_v2 = vrot.slane %v2846_v47, 1  ;;  %v2852_v31 = vmax.f32 %v2850_v7, %v2851_v40 }
 0x484   : > { %v2848_v22 = vmax.f32 %v2846_v47, %v2847_v2  ;;  %v2853_v30 = vrot.slane %v2852_v31, 1 }
 0x486   : > { %v3002_v28 = vsel %vm2993_vm13, %v2848_v22, %v3001_v37  ;;  %v2854_v44 = vmax.f32 %v2852_v31, %v2853_v30  ;;  %v3246_v53 = vpop.f32.mrb[64].mxu0 }
 0x487   : > { %v3247_v46 = vpop.f32.mrb[65].mxu0 }
 0x488   : > { %v3003_v49 = vsel %vm2995_vm14, %v2854_v44, %v3002_v28  ;;  %v3248_v58 = vadd.f32 %v3247_v46, %v3246_v53  ;;  %v3249_v33 = vpop.f32.mrb[66].mxu0 }
 0x489   : > { %3023 = vst [vmem:[%s4592_s30 + $0x8] sm:$0xff] %v3003_v49  ;;  %v3250_v15 = vpop.f32.mrb[67].mxu0 }
 0x48a   : > { %v2855_v29 = vrot.slane %v3248_v58, 4  ;;  %v3251_v0 = vadd.f32 %v3250_v15, %v3249_v33 }
 0x48c   : > { %v2856_v45 = vmax.f32 %v3248_v58, %v2855_v29  ;;  %v2861_v34 = vrot.slane %v3251_v0, 4 }
 0x48e   : > { %v2857_v21 = vrot.slane %v2856_v45, 2  ;;  %v2862_v19 = vmax.f32 %v3251_v0, %v2861_v34 }
 0x490   : > { %v2858_v26 = vmax.f32 %v2856_v45, %v2857_v21  ;;  %v2863_v41 = vrot.slane %v2862_v19, 2 }
 0x492   : > { %v2859_v55 = vrot.slane %v2858_v26, 1  ;;  %v2864_v42 = vmax.f32 %v2862_v19, %v2863_v41 }
 0x494   : > { %v2865_v1 = vrot.slane %v2864_v42, 1  ;;  %v2860_v17 = vmax.f32 %v2858_v26, %v2859_v55 }
 0x496   : > { %v2866_v18 = vmax.f32 %v2864_v42, %v2865_v1 }
 0x497   : > { %v3252_v51 = vpop.f32.mrb[68].mxu0 }
 0x498   : > { %v3004_v8 = vsel %vm2983_vm4, %v2866_v18, %v2860_v17  ;;  %v3253_v24 = vpop.f32.mrb[69].mxu0 }
 0x499   : > { %v3254_v56 = vadd.f32 %v3253_v24, %v3252_v51  ;;  %v3255_v50 = vpop.f32.mrb[70].mxu0 }
 0x49a   : > { %v3256_v9 = vpop.f32.mrb[71].mxu0 }
 0x49b   : > { %v2867_v6 = vrot.slane %v3254_v56, 4  ;;  %v3257_v35 = vadd.f32 %v3256_v9, %v3255_v50 }
 0x49d   : > { %v2868_v16 = vmax.f32 %v3254_v56, %v2867_v6  ;;  %v2873_v43 = vrot.slane %v3257_v35, 4 }
 0x49f   : > { %v2869_v27 = vrot.slane %v2868_v16, 2  ;;  %v2874_v5 = vmax.f32 %v3257_v35, %v2873_v43 }
 0x4a1   : > { %v2870_v57 = vmax.f32 %v2868_v16, %v2869_v27  ;;  %v2875_v39 = vrot.slane %v2874_v5, 2 }
 0x4a3   : > { %v2871_v54 = vrot.slane %v2870_v57, 1  ;;  %v2876_v61 = vmax.f32 %v2874_v5, %v2875_v39 }
 0x4a5   : > { %v2872_v25 = vmax.f32 %v2870_v57, %v2871_v54  ;;  %v2877_v60 = vrot.slane %v2876_v61, 1 }
 0x4a7   : > { %v3005_v63 = vsel %vm2985_vm9, %v2872_v25, %v3004_v8  ;;  %v2878_v52 = vmax.f32 %v2876_v61, %v2877_v60  ;;  %v3258_v62 = vpop.f32.mrb[72].mxu0 }
 0x4a8   : > { %v3259_v13 = vpop.f32.mrb[73].mxu0 }
 0x4a9   : > { %v3006_v48 = vsel %vm2987_vm10, %v2878_v52, %v3005_v63  ;;  %v3260_v4 = vadd.f32 %v3259_v13, %v3258_v62  ;;  %v3261_v3 = vpop.f32.mrb[74].mxu0 }
 0x4aa   : > { %v3262_v37 = vpop.f32.mrb[75].mxu0 }
 0x4ab   : > { %v2879_v36 = vrot.slane %v3260_v4, 4  ;;  %v3263_v10 = vadd.f32 %v3262_v37, %v3261_v3 }
 0x4ad   : > { %v2880_v20 = vmax.f32 %v3260_v4, %v2879_v36  ;;  %v2885_v12 = vrot.slane %v3263_v10, 4 }
 0x4af   : > { %v2881_v59 = vrot.slane %v2880_v20, 2  ;;  %v2886_v38 = vmax.f32 %v3263_v10, %v2885_v12 }
 0x4b1   : > { %v2882_v11 = vmax.f32 %v2880_v20, %v2881_v59  ;;  %v2887_v32 = vrot.slane %v2886_v38, 2 }
 0x4b3   : > { %v2883_v23 = vrot.slane %v2882_v11, 1  ;;  %v2888_v14 = vmax.f32 %v2886_v38, %v2887_v32 }
 0x4b5   : > { %v2884_v7 = vmax.f32 %v2882_v11, %v2883_v23  ;;  %v2889_v47 = vrot.slane %v2888_v14, 1 }
 0x4b7   : > { %v3007_v40 = vsel %vm2989_vm11, %v2884_v7, %v3006_v48  ;;  %v2890_v2 = vmax.f32 %v2888_v14, %v2889_v47  ;;  %v3264_v31 = vpop.f32.mrb[76].mxu0 }
 0x4b8   : > { %v3265_v22 = vpop.f32.mrb[77].mxu0 }
 0x4b9   : > { %v3008_v30 = vsel %vm2991_vm12, %v2890_v2, %v3007_v40  ;;  %v3266_v28 = vadd.f32 %v3265_v22, %v3264_v31  ;;  %v3267_v44 = vpop.f32.mrb[78].mxu0 }
 0x4ba   : > { %v3268_v53 = vpop.f32.mrb[79].mxu0 }
 0x4bb   : > { %v2891_v46 = vrot.slane %v3266_v28, 4  ;;  %v3269_v49 = vadd.f32 %v3268_v53, %v3267_v44 }
 0x4bd   : > { %v2892_v58 = vmax.f32 %v3266_v28, %v2891_v46  ;;  %v2897_v33 = vrot.slane %v3269_v49, 4 }
 0x4bf   : > { %v2893_v15 = vrot.slane %v2892_v58, 2  ;;  %v2898_v29 = vmax.f32 %v3269_v49, %v2897_v33 }
 0x4c1   : > { %v2894_v0 = vmax.f32 %v2892_v58, %v2893_v15  ;;  %v2899_v45 = vrot.slane %v2898_v29, 2 }
 0x4c3   : > { %v2895_v34 = vrot.slane %v2894_v0, 1  ;;  %v2900_v21 = vmax.f32 %v2898_v29, %v2899_v45 }
 0x4c5   : > { %v2896_v19 = vmax.f32 %v2894_v0, %v2895_v34  ;;  %v2901_v26 = vrot.slane %v2900_v21, 1 }
 0x4c7   : > { %v3009_v41 = vsel %vm2993_vm13, %v2896_v19, %v3008_v30  ;;  %v2902_v55 = vmax.f32 %v2900_v21, %v2901_v26  ;;  %v3270_v42 = vpop.f32.mrb[80].mxu0 }
 0x4c8   : > { %v3271_v1 = vpop.f32.mrb[81].mxu0 }
 0x4c9   : > { %v3010_v17 = vsel %vm2995_vm14, %v2902_v55, %v3009_v41  ;;  %v3272_v18 = vadd.f32 %v3271_v1, %v3270_v42  ;;  %v3273_v51 = vpop.f32.mrb[82].mxu0 }
 0x4ca   : > { %3024 = vst [vmem:[%s4592_s30 + $0x10] sm:$0xff] %v3010_v17  ;;  %v3274_v8 = vpop.f32.mrb[83].mxu0 }
 0x4cb   : > { %v2903_v24 = vrot.slane %v3272_v18, 4  ;;  %v3275_v56 = vadd.f32 %v3274_v8, %v3273_v51 }
 0x4cd   : > { %v2904_v50 = vmax.f32 %v3272_v18, %v2903_v24  ;;  %v2909_v9 = vrot.slane %v3275_v56, 4 }
 0x4cf   : > { %v2905_v6 = vrot.slane %v2904_v50, 2  ;;  %v2910_v35 = vmax.f32 %v3275_v56, %v2909_v9 }
 0x4d1   : > { %v2906_v16 = vmax.f32 %v2904_v50, %v2905_v6  ;;  %v2911_v43 = vrot.slane %v2910_v35, 2 }
 0x4d3   : > { %v2907_v27 = vrot.slane %v2906_v16, 1  ;;  %v2912_v5 = vmax.f32 %v2910_v35, %v2911_v43 }
 0x4d5   : > { %v2913_v57 = vrot.slane %v2912_v5, 1  ;;  %v2908_v39 = vmax.f32 %v2906_v16, %v2907_v27 }
 0x4d7   : > { %v2914_v54 = vmax.f32 %v2912_v5, %v2913_v57  ;;  %v3276_v61 = vpop.f32.mrb[84].mxu0 }
 0x4d8   : > { %v3277_v25 = vpop.f32.mrb[85].mxu0 }
 0x4d9   : > { %v3011_v60 = vsel %vm2983_vm4, %v2914_v54, %v2908_v39  ;;  %v3278_v63 = vadd.f32 %v3277_v25, %v3276_v61  ;;  %v3279_v52 = vpop.f32.mrb[86].mxu0 }
 0x4da   : > { %v3280_v62 = vpop.f32.mrb[87].mxu0 }
 0x4db   : > { %v2915_v13 = vrot.slane %v3278_v63, 4  ;;  %v3281_v48 = vadd.f32 %v3280_v62, %v3279_v52 }
 0x4dd   : > { %v2916_v4 = vmax.f32 %v3278_v63, %v2915_v13  ;;  %v2921_v3 = vrot.slane %v3281_v48, 4 }
 0x4df   : > { %v2917_v37 = vrot.slane %v2916_v4, 2  ;;  %v2922_v36 = vmax.f32 %v3281_v48, %v2921_v3 }
 0x4e1   : > { %v2918_v10 = vmax.f32 %v2916_v4, %v2917_v37  ;;  %v2923_v20 = vrot.slane %v2922_v36, 2 }
 0x4e3   : > { %v2919_v12 = vrot.slane %v2918_v10, 1  ;;  %v2924_v59 = vmax.f32 %v2922_v36, %v2923_v20 }
 0x4e5   : > { %v2920_v38 = vmax.f32 %v2918_v10, %v2919_v12  ;;  %v2925_v11 = vrot.slane %v2924_v59, 1 }
 0x4e7   : > { %v3012_v32 = vsel %vm2985_vm9, %v2920_v38, %v3011_v60  ;;  %v2926_v23 = vmax.f32 %v2924_v59, %v2925_v11  ;;  %v3282_v14 = vpop.f32.mrb[88].mxu0 }
 0x4e8   : > { %v3283_v7 = vpop.f32.mrb[89].mxu0 }
 0x4e9   : > { %v3013_v47 = vsel %vm2987_vm10, %v2926_v23, %v3012_v32  ;;  %v3284_v40 = vadd.f32 %v3283_v7, %v3282_v14  ;;  %v3285_v2 = vpop.f32.mrb[90].mxu0 }
 0x4ea   : > { %v3286_v31 = vpop.f32.mrb[91].mxu0 }
 0x4eb   : > { %v2927_v22 = vrot.slane %v3284_v40, 4  ;;  %v3287_v30 = vadd.f32 %v3286_v31, %v3285_v2 }
 0x4ed   : > { %v2928_v28 = vmax.f32 %v3284_v40, %v2927_v22  ;;  %v2933_v44 = vrot.slane %v3287_v30, 4 }
 0x4ef   : > { %v2929_v53 = vrot.slane %v2928_v28, 2  ;;  %v2934_v46 = vmax.f32 %v3287_v30, %v2933_v44 }
 0x4f1   : > { %v2930_v49 = vmax.f32 %v2928_v28, %v2929_v53  ;;  %v2935_v58 = vrot.slane %v2934_v46, 2 }
 0x4f3   : > { %v2931_v33 = vrot.slane %v2930_v49, 1  ;;  %v2936_v15 = vmax.f32 %v2934_v46, %v2935_v58 }
 0x4f5   : > { %v2932_v29 = vmax.f32 %v2930_v49, %v2931_v33  ;;  %v2937_v0 = vrot.slane %v2936_v15, 1 }
 0x4f7   : > { %v3014_v45 = vsel %vm2989_vm11, %v2932_v29, %v3013_v47  ;;  %v2938_v34 = vmax.f32 %v2936_v15, %v2937_v0  ;;  %v3288_v21 = vpop.f32.mrb[92].mxu0 }
 0x4f8   : > { %v3289_v19 = vpop.f32.mrb[93].mxu0 }
 0x4f9   : > { %v3015_v26 = vsel %vm2991_vm12, %v2938_v34, %v3014_v45  ;;  %v3290_v41 = vadd.f32 %v3289_v19, %v3288_v21  ;;  %v3291_v55 = vpop.f32.mrb[94].mxu0 }
 0x4fa   : > { %v3292_v42 = vpop.f32.mrb[95].mxu0 }
 0x4fb   : > { %v2939_v1 = vrot.slane %v3290_v41, 4  ;;  %v3293_v17 = vadd.f32 %v3292_v42, %v3291_v55 }
 0x4fd   : > { %v2940_v18 = vmax.f32 %v3290_v41, %v2939_v1  ;;  %v2945_v51 = vrot.slane %v3293_v17, 4 }
 0x4ff   : > { %v2941_v8 = vrot.slane %v2940_v18, 2  ;;  %v2946_v24 = vmax.f32 %v3293_v17, %v2945_v51 }
 0x501   : > { %v2942_v56 = vmax.f32 %v2940_v18, %v2941_v8  ;;  %v2947_v50 = vrot.slane %v2946_v24, 2 }
 0x503   : > { %v2943_v9 = vrot.slane %v2942_v56, 1  ;;  %v2948_v6 = vmax.f32 %v2946_v24, %v2947_v50 }
 0x505   : > { %v2944_v35 = vmax.f32 %v2942_v56, %v2943_v9  ;;  %v2949_v16 = vrot.slane %v2948_v6, 1 }
 0x507   : > { %v3016_v43 = vsel %vm2993_vm13, %v2944_v35, %v3015_v26  ;;  %v2950_v27 = vmax.f32 %v2948_v6, %v2949_v16 }
 0x509   : > { %v3017_v5 = vsel %vm2995_vm14, %v2950_v27, %v3016_v43 }
 0x50a   : > { %3025 = vst [vmem:[%s4592_s30 + $0x18] sm:$0xff] %v3017_v5 }
 0x50b   : > { %3429 = shalt.err (!%p3426_p7)
}
 0x50c   : > { %s3430_s16 = scalar_lea.hbm %s4630_s11, 512  ;;  %s3434_s25 = scalar_lea.hbm %s4684_s5, 1024 }
 0x50d   : > { %p3431_p8 = scmp.ne.s32.totalorder %s4630_s11, %s3430_s16  ;;  %p3435_p1 = scmp.lt.u32.totalorder %s4630_s11, %s4684_s5 }
 0x50e   : > { %p3436_p0 = scmp.lt.u32.totalorder %s3434_s25, %s3430_s16  ;;  %p3438_p6 = scmp.lt.u32.totalorder %s3430_s16, %s4630_s11 }
 0x50f   : > { %p3432_p11 = pnand %p3431_p8, %p4809_p9 }
 0x510   : > { %p3437_p5 = por %p3436_p0, %p3435_p1 }
 0x511   : > { %p3433_p13 = pneg %p3432_p11 }
 0x512   : > { %p3439_p10 = por %p3438_p6, %p3437_p5 }
 0x514   : > { %p3440_p12 = pnand %p3439_p10, %p3433_p13 }
 0x516   : > { %3443 = shalt.err (!%p3440_p12)
}
 0x517   : > { %s3492_s30 = smov 128   ;;  %s3493_s7 = smov 8  }
 0x518   : > { %3308 = dma.vmem_to_hbm [thread:$0]  (%p4809_p9), %s4632_s8, 512, %s4630_s11, %s4638_s22, %s3492_s30, %s3492_s30, %s3493_s7  }
 0x519 PF: > { %p3320_p2 = scmp.ge.s32.totalorder %s3482_s21, 2  ;;  %s3055_s9 = sand.u32 1, %s3470_s18  }
 0x51a   : > { %p4810_p3 = scmp.ne.s32.totalorder %s4719_s29, 0  ;;  %s3056_s10 = scalar_lea.sflag [#allocation4], %s3055_s9 }
 0x51c   : > { %p3315_p4 = pnand %p3320_p2, %p4810_p3 }
 0x51e   : > { %3465 = dma.done.wait (!%p3315_p4), %s3056_s10, 512  }
 0x51f   : > { %3467 = vsyncadd (!%p3315_p4), %s3056_s10, 4294966784  ;;  %p16_p7 = scmp.ge.s32.totalorder %s3549_s24, 4   ;;  %s4811_s18 = smov %s3474_s19 }
 0x520   : > { %s4812_s19 = smov %s3478_s20  ;;  %s4813_s20 = smov %s3560_s27 }
 0x521   : > { %s4814_s21 = smov %s3549_s24  ;;  %18 = sbr.rel (!%p16_p7) target bundleno = 4 (0x4), region = 80 }
 0x528   :  { %3061 = vsyncpa [#allocation3], 1 }
 0x529   :  { %3063 = vsyncpa [#allocation3 + $0x1], 1 }
 0x52a   :  { %3064 = vsyncpa [#allocation4], 1 }
 0x52b   :  { %3066 = vsyncpa [#allocation4 + $0x1], 1 }

</bundles_post_ra>
